<compile_context>
chip_gen: v6e
topology: v6e:2x2x1
jax: 0.10.0
libtpu: 0.0.40
codegen_flags: <defaults>
</compile_context>

<pallas_src>
import inspect

import numpy as np
import jax
import jax.numpy as jnp
from jax import lax
from jax.experimental import pallas as pl
from jax.experimental.pallas import tpu as pltpu


# ---------------------------------------------------------------------------
# Interpolation matrices (host-side numpy parameter/glue setup).
# ---------------------------------------------------------------------------
def _bilinear_matrix(in_size: int, scale: int) -> np.ndarray:
    """(out, in) matrix matching torch.nn.Upsample(mode='bilinear',
    align_corners=False) along one axis."""
    out_size = in_size * scale
    dst = np.arange(out_size, dtype=np.float64)
    src = (dst + 0.5) / scale - 0.5            # half-pixel centers
    src = np.maximum(src, 0.0)                 # PyTorch clamps negative coords
    x0 = np.minimum(np.floor(src).astype(np.int64), in_size - 1)
    x1 = np.minimum(x0 + 1, in_size - 1)
    lam = src - x0
    A = np.zeros((out_size, in_size), dtype=np.float64)
    A[np.arange(out_size), x0] += 1.0 - lam
    A[np.arange(out_size), x1] += lam
    return A


def _nearest_matrix(in_size: int, scale: int) -> np.ndarray:
    """(out, in) matrix matching torch.nn.Upsample(mode='nearest')."""
    out_size = in_size * scale
    dst = np.arange(out_size)
    A = np.zeros((out_size, in_size), dtype=np.float64)
    A[dst, dst // scale] = 1.0
    return A


def _interp_matrix(in_size: int, scale: int, mode: str) -> np.ndarray:
    if mode == "bilinear":
        return _bilinear_matrix(in_size, scale)
    if mode == "nearest":
        return _nearest_matrix(in_size, scale)
    raise ValueError(f"unsupported mode: {mode}")  # TODO(synk): bicubic not implemented


def _composed_matrix(in_size: int, factors, mode: str) -> np.ndarray:
    """Compose the per-stage 1-D interpolation matrices (float64 on host)."""
    A = np.eye(in_size, dtype=np.float64)
    size = in_size
    for f in factors:
        A = _interp_matrix(size, int(f), mode) @ A
        size *= int(f)
    return A


# ---------------------------------------------------------------------------
# Small host-side planning helpers.
# ---------------------------------------------------------------------------
def _padded_bytes(rows: int, cols: int, itemsize: int) -> int:
    """VMEM footprint of a (rows, cols) tile padded to (8, 128) granules."""
    r = -(-rows // 8) * 8
    c = -(-cols // 128) * 128
    return int(r * c * itemsize)


def _vmem_limit_bytes() -> int:
    cap = 64 << 20                             # conservative fallback (v7x per-core)
    try:
        info = pltpu.get_tpu_info()
        cap = int(getattr(info, "vmem_capacity_bytes", cap)) or cap
    except Exception:
        pass
    # Leave headroom for surrounding XLA fusions: 48 MiB on 64-MiB parts (v7x),
    # 64 MiB elsewhere (feedback: 96 MiB squeezed neighbouring fusions).
    return min(cap * 3 // 4, 64 << 20)


def _num_tensorcores() -> int:
    try:
        kind = (getattr(jax.devices()[0], "device_kind", "") or "").lower()
        if "v7" in kind or "v4" in kind:
            return 2
    except Exception:
        pass
    return 1


def _supports_pipeline_mode() -> bool:
    try:
        return ("pipeline_mode" in inspect.signature(pl.BlockSpec).parameters
                and hasattr(pl, "Buffered"))
    except (TypeError, ValueError):
        return False


_PIPELINE_MODE_OK = _supports_pipeline_mode()


def _spec(block_shape, index_map, *, single_buffered=False):
    """BlockSpec; grid-invariant inputs get a single buffer when supported."""
    if single_buffered and _PIPELINE_MODE_OK:
        return pl.BlockSpec(block_shape, index_map, pipeline_mode=pl.Buffered(1))
    return pl.BlockSpec(block_shape, index_map)


def _pick_bb(B, valid, vmem_for_bb, budget, multi_core, payload_for_bb,
             target_bytes=512 << 10):
    """Images per grid step: divisor of B, (8,128)-legal, fits the VMEM budget.
    Multi-TC chips prefer an even grid that is as deep as possible while keeping
    blocks >= target_bytes; single-TC chips just take the largest fitting block."""
    cands = [d for d in range(1, B + 1)
             if B % d == 0 and valid(d) and vmem_for_bb(d) <= budget]
    if not cands:
        return None

    def choose(pool):
        sat = [d for d in pool if payload_for_bb(d) >= target_bytes]
        return min(sat) if sat else max(pool)

    if multi_core:
        even = [d for d in cands if (B // d) >= 2 and (B // d) % 2 == 0]
        if even:
            return choose(even)
        ge2 = [d for d in cands if (B // d) >= 2]
        if ge2:
            return choose(ge2)
    return max(cands)


# ---------------------------------------------------------------------------
# Path 1: lane-dense single-matmul (Kronecker) kernel for narrow outputs.
# ---------------------------------------------------------------------------
def _kron_kernel(k_ref, x_ref, o_ref):
    xb = x_ref[...].astype(k_ref.dtype)                       # in-kernel cast
    o_ref[...] = jnp.dot(xb, k_ref[...],
                         preferred_element_type=jnp.float32).astype(o_ref.dtype)


def _upsample_kron(xb, a_h_np, a_w_np, out_dtype, cdt, vmem_limit, multi_core):
    B, H, W = xb.shape
    Ho, Wo = a_h_np.shape[0], a_w_np.shape[0]
    HW, HoWo = H * W, Ho * Wo
    k = jnp.asarray(np.kron(a_h_np, a_w_np).T, dtype=cdt)     # (H*W, Ho*Wo)
    x2 = xb.reshape(B, HW)                                     # metadata reshape

    in_item = jnp.dtype(xb.dtype).itemsize
    out_item = jnp.dtype(out_dtype).itemsize
    k_item = jnp.dtype(cdt).itemsize
    k_bufs = 1 if _PIPELINE_MODE_OK else 2
    fixed = k_bufs * _padded_bytes(HW, HoWo, k_item)
    budget = int(vmem_limit * 0.8)

    def vmem_for_bb(d):
        return (fixed + 2 * _padded_bytes(d, HW, in_item)
                + 2 * _padded_bytes(d, HoWo, out_item))

    def payload_for_bb(d):
        return d * (HW * in_item + HoWo * out_item)

    valid = lambda d: (d % 8 == 0) or (d == B)
    bb = _pick_bb(B, valid, vmem_for_bb, budget, multi_core, payload_for_bb)
    if bb is None:
        return None                                            # fall back to separable

    cost = pl.CostEstimate(
        flops=2 * B * HW * HoWo, transcendentals=0,
        bytes_accessed=B * HW * in_item + B * HoWo * out_item + HW * HoWo * k_item)

    out = pl.pallas_call(
        _kron_kernel,
        out_shape=jax.ShapeDtypeStruct((B, HoWo), out_dtype),
        grid=(B // bb,),
        in_specs=[
            _spec((HW, HoWo), lambda i: (0, 0), single_buffered=True),  # shared K
            pl.BlockSpec((bb, HW), lambda i: (i, 0)),                   # bb images
        ],
        out_specs=pl.BlockSpec((bb, HoWo), lambda i: (i, 0)),           # lane-dense
        compiler_params=pltpu.CompilerParams(
            dimension_semantics=("parallel",),
            vmem_limit_bytes=int(vmem_limit)),
        cost_estimate=cost,
    )(k, x2)
    return out                                                 # (B, Ho*Wo)


# ---------------------------------------------------------------------------
# Path 2: separable kernels (general case).
# ---------------------------------------------------------------------------
def _make_direct_kernel(bb, ho):
    """One Wo tile: per-image (A_h @ x) @ A_w^T stored straight to the flat
    output block -- no scratch round-trip."""
    def kernel(a_h_ref, a_wt_ref, x_ref, o_ref):
        a_h = a_h_ref[...]
        a_wt_f = a_wt_ref[...].astype(jnp.float32)             # hoisted out of loop

        def body(b, carry):
            xb = x_ref[b].astype(a_h.dtype)                    # in-kernel cast
            t = jnp.dot(a_h, xb, preferred_element_type=jnp.float32)
            out = jnp.dot(t, a_wt_f, preferred_element_type=jnp.float32)
            start = b * ho
            if ho % 8 == 0:
                start = pl.multiple_of(start, 8)
            o_ref[pl.ds(start, ho), :] = out.astype(o_ref.dtype)
            return carry

        lax.fori_loop(0, bb, body, 0)
    return kernel


def _make_tiled_kernel(bb, ho):
    """Multiple Wo tiles: H-side intermediate computed once per image block
    (j == 0) into a persistent f32 scratch and reused across Wo tiles."""
    def kernel(a_h_ref, a_wt_ref, x_ref, o_ref, tmp_ref):
        @pl.when(pl.program_id(1) == 0)
        def _():
            a_h = a_h_ref[...]

            def body(b, carry):
                xb = x_ref[b].astype(a_h.dtype)                # in-kernel cast
                t = jnp.dot(a_h, xb, preferred_element_type=jnp.float32)
                start = b * ho
                if ho % 8 == 0:
                    start = pl.multiple_of(start, 8)
                tmp_ref[pl.ds(start, ho), :] = t               # f32 intermediate
                return carry

            lax.fori_loop(0, bb, body, 0)

        out = jnp.dot(tmp_ref[...], a_wt_ref[...].astype(jnp.float32),
                      preferred_element_type=jnp.float32)
        o_ref[...] = out.astype(o_ref.dtype)
    return kernel


def _upsample_separable(xb, a_h_np, a_w_np, out_dtype, cdt, vmem_limit,
                        multi_core, wo_tile):
    B, H, W = xb.shape
    Ho, Wo = a_h_np.shape[0], a_w_np.shape[0]
    a_h = jnp.asarray(a_h_np, dtype=cdt)                       # (Ho, H)
    a_wt = jnp.asarray(a_w_np.T, dtype=cdt)                    # (W, Wo)

    in_item = jnp.dtype(xb.dtype).itemsize
    out_item = jnp.dtype(out_dtype).itemsize
    c_item = jnp.dtype(cdt).itemsize
    budget = int(vmem_limit * 0.8)
    ah_bufs = 1 if _PIPELINE_MODE_OK else 2

    if wo_tile is not None:
        two_candidates = [int(wo_tile)]
    else:
        two_candidates = sorted({d for d in range(128, Wo + 1, 128) if Wo % d == 0},
                                reverse=True) or [Wo]

    valid = lambda d: ((d * Ho) % 8 == 0) or (d == B)
    plan = None
    for two in two_candidates:
        nwt = Wo // two
        use_scratch = nwt > 1

        def vmem_for_bb(d, two=two, use_scratch=use_scratch):
            b = (ah_bufs * _padded_bytes(Ho, H, c_item)
                 + 2 * _padded_bytes(W, two, c_item)
                 + 2 * d * _padded_bytes(H, W, in_item)
                 + 2 * _padded_bytes(d * Ho, two, out_item))
            if use_scratch:
                b += _padded_bytes(d * Ho, W, 4)
            return b

        def payload_for_bb(d, two=two):
            return d * (H * W * in_item + Ho * two * out_item)

        bb = _pick_bb(B, valid, vmem_for_bb, budget, multi_core, payload_for_bb)
        if bb is not None:
            plan = (two, nwt, bb, use_scratch)
            break

    if plan is None:
        # Best effort: smallest Wo tile, one image per step.
        # TODO(synk): H-axis / banded-A tiling for extremely large images.
        two = two_candidates[-1]
        plan = (two, Wo // two, 1, (Wo // two) > 1)

    two, nwt, bb, use_scratch = plan
    grid_b = B // bb
    cost = pl.CostEstimate(
        flops=2 * B * Ho * W * (H + Wo), transcendentals=0,
        bytes_accessed=(B * H * W * in_item + B * Ho * Wo * out_item
                        + (Ho * H + grid_b * nwt * W * two) * c_item))
    out_shape = jax.ShapeDtypeStruct((B * Ho, Wo), out_dtype)   # flat 2-D output

    if not use_scratch:
        out = pl.pallas_call(
            _make_direct_kernel(bb, Ho),
            out_shape=out_shape,
            grid=(grid_b,),
            in_specs=[
                _spec((Ho, H), lambda i: (0, 0), single_buffered=True),
                _spec((W, Wo), lambda i: (0, 0), single_buffered=True),
                pl.BlockSpec((bb, H, W), lambda i: (i, 0, 0)),
            ],
            out_specs=pl.BlockSpec((bb * Ho, Wo), lambda i: (i, 0)),
            compiler_params=pltpu.CompilerParams(
                dimension_semantics=("parallel",),
                vmem_limit_bytes=int(vmem_limit)),
            cost_estimate=cost,
        )(a_h, a_wt, xb)
    else:
        out = pl.pallas_call(
            _make_tiled_kernel(bb, Ho),
            out_shape=out_shape,
            grid=(grid_b, nwt),
            in_specs=[
                _spec((Ho, H), lambda i, j: (0, 0), single_buffered=True),
                pl.BlockSpec((W, two), lambda i, j: (0, j)),
                pl.BlockSpec((bb, H, W), lambda i, j: (i, 0, 0)),
            ],
            out_specs=pl.BlockSpec((bb * Ho, two), lambda i, j: (i, j)),
            scratch_shapes=[pltpu.VMEM((bb * Ho, W), jnp.float32)],
            compiler_params=pltpu.CompilerParams(
                dimension_semantics=("parallel", "arbitrary"),
                vmem_limit_bytes=int(vmem_limit)),
            cost_estimate=cost,
        )(a_h, a_wt, xb)
    return out                                                  # (B*Ho, Wo)


# ---------------------------------------------------------------------------
# Public wrapper: mirrors Upsampler.forward(x) with all stages fused.
# ---------------------------------------------------------------------------
def upsampler(x: jax.Array, downscale_factors, mode: str = "bilinear",
              *, compute_dtype=None, out_dtype=None, wo_tile=None) -> jax.Array:
    if not jnp.issubdtype(x.dtype, jnp.floating):
        x = x.astype(jnp.float32)               # nn.Upsample requires float input
    out_dtype = jnp.dtype(out_dtype) if out_dtype is not None else x.dtype
    factors = [int(f) for f in downscale_factors]
    total = 1
    for f in factors:
        total *= f
    if total == 1:
        return x.astype(out_dtype)

    N, C, H, W = x.shape
    Ho, Wo = H * total, W * total
    B = N * C
    cdt = jnp.dtype(compute_dtype) if compute_dtype is not None else jnp.dtype(x.dtype)

    a_h_np = _composed_matrix(H, factors, mode)                 # (Ho, H) float64
    a_w_np = _composed_matrix(W, factors, mode)                 # (Wo, W) float64
    xb = x.reshape(B, H, W)                                     # metadata reshape

    vmem_limit = _vmem_limit_bytes()
    multi_core = _num_tensorcores() >= 2

    # Lane-dense Kronecker path for narrow outputs (Wo < 128): avoids masked
    # vst on every store and the scratch round-trip entirely.
    k_bytes = H * W * Ho * Wo * jnp.dtype(cdt).itemsize
    if wo_tile is None and Wo < 128 and k_bytes <= min(int(vmem_limit * 0.4), 24 << 20):
        out = _upsample_kron(xb, a_h_np, a_w_np, out_dtype, cdt, vmem_limit, multi_core)
        if out is not None:
            return out.reshape(N, C, Ho, Wo)                    # metadata reshape

    if wo_tile is not None and Wo % int(wo_tile) != 0:
        raise ValueError("wo_tile must divide the output width")

    out = _upsample_separable(xb, a_h_np, a_w_np, out_dtype, cdt, vmem_limit,
                              multi_core, wo_tile)
    return out.reshape(N, C, Ho, Wo)                            # metadata reshape


# ---------------------------------------------------------------------------
# Reference (numpy, sequential per-stage, float64) for tolerance checks.
# ---------------------------------------------------------------------------
def _reference_upsampler(x_np, factors, mode):
    out = np.asarray(x_np, dtype=np.float64)
    for f in factors:
        Ah = _interp_matrix(out.shape[2], int(f), mode)
        Aw = _interp_matrix(out.shape[3], int(f), mode)
        out = np.einsum("oh,nchw,pw->ncop", Ah, out, Aw)
    return out


if __name__ == "__main__":
    key = jax.random.PRNGKey(0)
    x = jax.random.normal(key, (2, 4, 16, 16), dtype=jnp.float32)
    factors = [2, 2]                           # 16 -> 32 -> 64, fused into one x4 map

    # Lane-dense Kronecker path (Wo = 64 < 128), bilinear align_corners=False.
    y = upsampler(x, factors, "bilinear")
    jax.block_until_ready(y)
    assert y.shape == (2, 4, 64, 64), y.shape
    ref = _reference_upsampler(np.asarray(x), factors, "bilinear")
    assert np.allclose(np.asarray(y), ref, rtol=1e-4, atol=1e-4), \
        float(np.max(np.abs(np.asarray(y, dtype=np.float64) - ref)))

    # nearest mode (exact selection matrices).
    yn = upsampler(x, factors, "nearest")
    jax.block_until_ready(yn)
    refn = _reference_upsampler(np.asarray(x), factors, "nearest")
    assert np.allclose(np.asarray(yn), refn, rtol=1e-5, atol=1e-5)

    # bf16 MXU-operand path (f32 accumulation, f32 intermediate).
    yb = upsampler(x, factors, "bilinear", compute_dtype=jnp.bfloat16)
    jax.block_until_ready(yb)
    assert np.allclose(np.asarray(yb, dtype=np.float64), ref, rtol=0.05, atol=0.1)

    # Separable direct path (Wo = 128): flat 2-D output, no scratch.
    x2 = jax.random.normal(jax.random.PRNGKey(1), (1, 2, 16, 32), dtype=jnp.float32)
    y2 = upsampler(x2, factors, "bilinear")
    jax.block_until_ready(y2)
    assert y2.shape == (1, 2, 64, 128), y2.shape
    ref2 = _reference_upsampler(np.asarray(x2), factors, "bilinear")
    assert np.allclose(np.asarray(y2), ref2, rtol=1e-4, atol=1e-4)

    # Separable Wo-tiled path (explicit 128-wide tiles): exercises the 2-D grid
    # with the persistent H-side scratch reused across Wo tiles.
    x3 = jax.random.normal(jax.random.PRNGKey(2), (1, 2, 16, 64), dtype=jnp.float32)
    y3 = upsampler(x3, factors, "bilinear", wo_tile=128)
    jax.block_until_ready(y3)
    assert y3.shape == (1, 2, 64, 256), y3.shape
    ref3 = _reference_upsampler(np.asarray(x3), factors, "bilinear")
    assert np.allclose(np.asarray(y3), ref3, rtol=1e-4, atol=1e-4)

    print("KERNEL_OK")
</pallas_src>

<mosaic_0001>
module attributes {stable_mosaic.version = 11 : i64} {
  func.func @_kron_kernel(%arg0: i32, %arg1: memref<256x4096xf32, #tpu.memory_space<vmem>>, %arg2: memref<8x256xf32, #tpu.memory_space<vmem>>, %arg3: memref<8x4096xf32, #tpu.memory_space<vmem>>) attributes {dimension_semantics = [#tpu.dimension_semantics<parallel>], iteration_bounds = array<i64: 1>, scalar_prefetch = 0 : i64, scratch_operands = 0 : i64, tpu.core_type = #tpu.core_type<tc>, window_params = [{pipeline_mode = #tpu.pipeline_mode<synchronous>, transform_indices = @transform_0, window_bounds = array<i64: 256, 4096>}, {transform_indices = @transform_1, window_bounds = array<i64: 8, 256>}, {transform_indices = @transform_2, window_bounds = array<i64: 8, 4096>}]} {
    %c0 = arith.constant 0 : index
    %c0_0 = arith.constant 0 : index
    %0 = vector.load %arg2[%c0, %c0_0] : memref<8x256xf32, #tpu.memory_space<vmem>>, vector<8x256xf32>
    %c0_1 = arith.constant 0 : index
    %c0_2 = arith.constant 0 : index
    %1 = vector.load %arg1[%c0_1, %c0_2] : memref<256x4096xf32, #tpu.memory_space<vmem>>, vector<256x4096xf32>
    %cst = arith.constant dense<0.000000e+00> : vector<8x4096xf32>
    %2 = tpu.matmul %0, %1, %cst {dimension_numbers = #tpu.dot_dimension_numbers<[1], [0], [0], [1], [0, 0, 1, 1], [], []>} : vector<8x256xf32>, vector<256x4096xf32>, vector<8x4096xf32> -> vector<8x4096xf32>
    %c0_3 = arith.constant 0 : index
    %c0_4 = arith.constant 0 : index
    %3 = vector.load %arg3[%c0_3, %c0_4] : memref<8x4096xf32, #tpu.memory_space<vmem>>, vector<8x4096xf32>
    tpu.vector_store %arg3[%c0_3, %c0_4], %2 {strides = array<i32>} : memref<8x4096xf32, #tpu.memory_space<vmem>>, vector<8x4096xf32>,
    return
  }
  func.func @transform_0(%arg0: i32) -> (i32, i32) {
    %c0_i32 = arith.constant 0 : i32
    %c0_i32_0 = arith.constant 0 : i32
    %c0_i32_1 = arith.constant 0 : i32
    return %c0_i32, %c0_i32_0 : i32, i32
  }
  func.func @transform_1(%arg0: i32) -> (i32, i32) {
    %c0_i32 = arith.constant 0 : i32
    %c0_i32_0 = arith.constant 0 : i32
    return %arg0, %c0_i32 : i32, i32
  }
  func.func @transform_2(%arg0: i32) -> (i32, i32) {
    %c0_i32 = arith.constant 0 : i32
    %c0_i32_0 = arith.constant 0 : i32
    return %arg0, %c0_i32 : i32, i32
  }
}

</mosaic_0001>

<bundles_post_ra>
// kernel: tpu_custom_call.1
= control target key start
LH: loop header
LB: loop body
LE: loop exit
PB: predicated region body
PF: predicated region fallthrough
CT: control target
= control target key end

     0   :  { %7 = vsyncpa [#allocation3], 0  ;;  %s2402_s0 = inlined_call_operand.hbm [shape: f32[256,4096], index: 0, kind: input, shape index: {}]   ;;  %s2403_s1 = inlined_call_operand.hbm [shape: f32[8,256], index: 1, kind: input, shape index: {}]   ;;  %s2404_s2 = inlined_call_operand.hbm [shape: f32[8,4096], index: 2, kind: output, shape index: {}]  }
   0x1   :  { %8 = vsyncpa [#allocation6], 0 }
   0x2   :  { %9 = vsyncpa [#allocation4], 0  ;;  %s2325_s9 = smov [#allocation2]  }
   0x3   :  { %s15_s10 = sshll.u32 %s2325_s9, 4  ;;  %s16_s10 = int_to_ptr.vmem [resolvable:$true] %s15_s10 }
   0x4   :  { %s2267_s11 = scalar_lea.vmem %s16_s10, 131072  ;;  %p2272_p1 = scmp.lt.s32.totalorder %s16_s10, %s16_s10 }
   0x5   :  { %p2268_p0 = scmp.ne.s32.totalorder %s16_s10, %s2267_s11  ;;  %p2273_p2 = scmp.lt.s32.totalorder %s2267_s11, %s2267_s11 }
   0x7   :  { %p2274_p3 = por %p2273_p2, %p2272_p1 }
   0x9   :  { %p2275_p4 = pnand %p2274_p3, %p2268_p0 }
   0xb   :  { %2278 = shalt.err (!%p2275_p4)
}
   0xc   :  { %s2326_s12 = smov 4096   ;;  %s2327_s13 = smov 256  }
   0xd   :  { %21 = dma.hbm_to_vmem [thread:$0]  %s2402_s0, 131072, %s16_s10, [#allocation3], %s2326_s12, %s2326_s12, %s2327_s13  }
   0xe   :  { %s2328_s16 = smov [#allocation5]  }
   0xf   :  { %s28_s17 = sshll.u32 %s2328_s16, 4  ;;  %s29_s17 = int_to_ptr.vmem [resolvable:$true] %s28_s17 }
  0x10   :  { %s2287_s18 = scalar_lea.vmem %s29_s17, 256  ;;  %p2292_p6 = scmp.lt.s32.totalorder %s29_s17, %s29_s17 }
  0x11   :  { %p2288_p5 = scmp.ne.s32.totalorder %s29_s17, %s2287_s18  ;;  %p2293_p7 = scmp.lt.s32.totalorder %s2287_s18, %s2287_s18 }
  0x13   :  { %p2294_p8 = por %p2293_p7, %p2292_p6 }
  0x15   :  { %p2295_p9 = pnand %p2294_p8, %p2288_p5 }
  0x17   :  { %2298 = shalt.err (!%p2295_p9)
}
  0x18   :  { %31 = dma.hbm_to_vmem [thread:$0]  %s2403_s1, 256, %s29_s17, [#allocation6]  }
  0x19   :  { %2319 = dma.done.wait [#allocation3], 131072  }
  0x1a   :  { %2320 = vsyncadd [#allocation3], 4294836224 }
  0x1b   :  { %2321 = dma.done.wait [#allocation6], 256  }
  0x1c   :  { %2322 = vsyncadd [#allocation6], 4294967040  ;;  %v521_v0 = vld [vmem:[#allocation2 + $0xf08] sm:$0xff]  ;;  %v523_v1 = vld [vmem:[#allocation2 + $0xf18] sm:$0xff]  ;;  %s2329_s0 = smov [#allocation7]  }
  0x1d   :  { %v520_v2 = vld [vmem:[#allocation2 + $0xf00] sm:$0xff]  ;;  %1064 = vmatprep.subr.mxu0 %v521_v0  ;;  %1135 = vmatprep.subr.mxu1 %v523_v1  ;;  %v522_v3 = vld [vmem:[#allocation2 + $0xf10] sm:$0xff]  ;;  %v489_v4 = vld [vmem:[#allocation2 + $0xe08] sm:$0xff]  ;;  %s2238_s1 = sshll.u32 %s2329_s0, 4  ;;  %s2239_s1 = int_to_ptr.vmem [resolvable:$true] %s2238_s1 }
  0x1e   :  { %v491_v5 = vld [vmem:[#allocation2 + $0xe18] sm:$0xff]  ;;  %1065 = vmatpush1.msra.mxu0 %v520_v2  ;;  %1136 = vmatpush1.msra.mxu1 %v522_v3  ;;  %v488_v6 = vld [vmem:[#allocation2 + $0xe00] sm:$0xff]  ;;  %v490_v7 = vld [vmem:[#allocation2 + $0xe10] sm:$0xff]  ;;  %s2299_s21 = scalar_lea.vmem %s2239_s1, 4096  ;;  %p2304_p11 = scmp.lt.s32.totalorder %s2239_s1, %s2239_s1 }
  0x1f   :  { %v457_v8 = vld [vmem:[#allocation2 + $0xd08] sm:$0xff]  ;;  %1066 = vmatprep.subr.mxu0 %v489_v4  ;;  %1137 = vmatprep.subr.mxu1 %v491_v5  ;;  %v459_v9 = vld [vmem:[#allocation2 + $0xd18] sm:$0xff]  ;;  %v456_v10 = vld [vmem:[#allocation2 + $0xd00] sm:$0xff]  ;;  %p2300_p10 = scmp.ne.s32.totalorder %s2239_s1, %s2299_s21  ;;  %p2305_p12 = scmp.lt.s32.totalorder %s2299_s21, %s2299_s21 }
  0x20   :  { %v458_v11 = vld [vmem:[#allocation2 + $0xd10] sm:$0xff]  ;;  %1067 = vmatpush1.msra.mxu0 %v488_v6  ;;  %1138 = vmatpush1.msra.mxu1 %v490_v7  ;;  %v425_v12 = vld [vmem:[#allocation2 + $0xc08] sm:$0xff]  ;;  %v427_v13 = vld [vmem:[#allocation2 + $0xc18] sm:$0xff] }
  0x21   :  { %1068 = vmatprep.subr.mxu0 %v457_v8  ;;  %1139 = vmatprep.subr.mxu1 %v459_v9  ;;  %v424_v14 = vld [vmem:[#allocation2 + $0xc00] sm:$0xff]  ;;  %v426_v15 = vld [vmem:[#allocation2 + $0xc10] sm:$0xff]  ;;  %v393_v16 = vld [vmem:[#allocation2 + $0xb08] sm:$0xff]  ;;  %p2306_p13 = por %p2305_p12, %p2304_p11 }
  0x22   :  { %1069 = vmatpush1.msra.mxu0 %v456_v10  ;;  %1140 = vmatpush1.msra.mxu1 %v458_v11  ;;  %v395_v17 = vld [vmem:[#allocation2 + $0xb18] sm:$0xff]  ;;  %v392_v18 = vld [vmem:[#allocation2 + $0xb00] sm:$0xff]  ;;  %v394_v19 = vld [vmem:[#allocation2 + $0xb10] sm:$0xff] }
  0x23   :  { %1070 = vmatprep.subr.mxu0 %v425_v12  ;;  %1141 = vmatprep.subr.mxu1 %v427_v13  ;;  %v361_v20 = vld [vmem:[#allocation2 + $0xa08] sm:$0xff]  ;;  %v363_v21 = vld [vmem:[#allocation2 + $0xa18] sm:$0xff]  ;;  %v360_v22 = vld [vmem:[#allocation2 + $0xa00] sm:$0xff]  ;;  %p2307_p0 = pnand %p2306_p13, %p2300_p10 }
  0x24   :  { %1071 = vmatpush1.msra.mxu0 %v424_v14  ;;  %1142 = vmatpush1.msra.mxu1 %v426_v15  ;;  %v362_v23 = vld [vmem:[#allocation2 + $0xa10] sm:$0xff]  ;;  %v329_v24 = vld [vmem:[#allocation2 + $0x908] sm:$0xff]  ;;  %v331_v25 = vld [vmem:[#allocation2 + $0x918] sm:$0xff] }
  0x25   :  { %1072 = vmatprep.subr.mxu0 %v393_v16  ;;  %1143 = vmatprep.subr.mxu1 %v395_v17  ;;  %v328_v26 = vld [vmem:[#allocation2 + $0x900] sm:$0xff]  ;;  %v330_v27 = vld [vmem:[#allocation2 + $0x910] sm:$0xff]  ;;  %v297_v28 = vld [vmem:[#allocation2 + $0x808] sm:$0xff] }
  0x26   :  { %1073 = vmatpush1.msra.mxu0 %v392_v18  ;;  %1144 = vmatpush1.msra.mxu1 %v394_v19  ;;  %v299_v29 = vld [vmem:[#allocation2 + $0x818] sm:$0xff]  ;;  %v296_v30 = vld [vmem:[#allocation2 + $0x800] sm:$0xff]  ;;  %v298_v31 = vld [vmem:[#allocation2 + $0x810] sm:$0xff] }
  0x27   :  { %1074 = vmatprep.subr.mxu0 %v361_v20  ;;  %1145 = vmatprep.subr.mxu1 %v363_v21  ;;  %v265_v32 = vld [vmem:[#allocation2 + $0x708] sm:$0xff]  ;;  %v267_v33 = vld [vmem:[#allocation2 + $0x718] sm:$0xff]  ;;  %v264_v34 = vld [vmem:[#allocation2 + $0x700] sm:$0xff] }
  0x28   :  { %1075 = vmatpush1.msra.mxu0 %v360_v22  ;;  %1146 = vmatpush1.msra.mxu1 %v362_v23  ;;  %v266_v35 = vld [vmem:[#allocation2 + $0x710] sm:$0xff]  ;;  %v233_v36 = vld [vmem:[#allocation2 + $0x608] sm:$0xff]  ;;  %v235_v37 = vld [vmem:[#allocation2 + $0x618] sm:$0xff] }
  0x29   :  { %1076 = vmatprep.subr.mxu0 %v329_v24  ;;  %1147 = vmatprep.subr.mxu1 %v331_v25  ;;  %v232_v38 = vld [vmem:[#allocation2 + $0x600] sm:$0xff]  ;;  %v234_v39 = vld [vmem:[#allocation2 + $0x610] sm:$0xff]  ;;  %v201_v40 = vld [vmem:[#allocation2 + $0x508] sm:$0xff] }
  0x2a   :  { %1077 = vmatpush1.msra.mxu0 %v328_v26  ;;  %1148 = vmatpush1.msra.mxu1 %v330_v27  ;;  %v203_v41 = vld [vmem:[#allocation2 + $0x518] sm:$0xff]  ;;  %v200_v42 = vld [vmem:[#allocation2 + $0x500] sm:$0xff]  ;;  %v202_v43 = vld [vmem:[#allocation2 + $0x510] sm:$0xff] }
  0x2b   :  { %1078 = vmatprep.subr.mxu0 %v297_v28  ;;  %1149 = vmatprep.subr.mxu1 %v299_v29  ;;  %v169_v44 = vld [vmem:[#allocation2 + $0x408] sm:$0xff]  ;;  %v171_v45 = vld [vmem:[#allocation2 + $0x418] sm:$0xff]  ;;  %v168_v46 = vld [vmem:[#allocation2 + $0x400] sm:$0xff] }
  0x2c   :  { %1079 = vmatpush1.msra.mxu0 %v296_v30  ;;  %1150 = vmatpush1.msra.mxu1 %v298_v31  ;;  %v170_v47 = vld [vmem:[#allocation2 + $0x410] sm:$0xff]  ;;  %v137_v48 = vld [vmem:[#allocation2 + $0x308] sm:$0xff]  ;;  %v139_v49 = vld [vmem:[#allocation2 + $0x318] sm:$0xff] }
  0x2d   :  { %1080 = vmatprep.subr.mxu0 %v265_v32  ;;  %1151 = vmatprep.subr.mxu1 %v267_v33  ;;  %v136_v50 = vld [vmem:[#allocation2 + $0x300] sm:$0xff]  ;;  %v138_v51 = vld [vmem:[#allocation2 + $0x310] sm:$0xff]  ;;  %v105_v52 = vld [vmem:[#allocation2 + $0x208] sm:$0xff] }
  0x2e   :  { %1081 = vmatpush1.msra.mxu0 %v264_v34  ;;  %1152 = vmatpush1.msra.mxu1 %v266_v35  ;;  %v107_v53 = vld [vmem:[#allocation2 + $0x218] sm:$0xff]  ;;  %v104_v54 = vld [vmem:[#allocation2 + $0x200] sm:$0xff]  ;;  %v106_v55 = vld [vmem:[#allocation2 + $0x210] sm:$0xff] }
  0x2f   :  { %1082 = vmatprep.subr.mxu0 %v233_v36  ;;  %1153 = vmatprep.subr.mxu1 %v235_v37  ;;  %v73_v56 = vld [vmem:[#allocation2 + $0x108] sm:$0xff]  ;;  %v75_v57 = vld [vmem:[#allocation2 + $0x118] sm:$0xff]  ;;  %v72_v58 = vld [vmem:[#allocation2 + $0x100] sm:$0xff] }
  0x30   :  { %1083 = vmatpush1.msra.mxu0 %v232_v38  ;;  %1154 = vmatpush1.msra.mxu1 %v234_v39  ;;  %v74_v59 = vld [vmem:[#allocation2 + $0x110] sm:$0xff]  ;;  %v41_v60 = vld [vmem:[#allocation2 + $0x8] sm:$0xff]  ;;  %v43_v61 = vld [vmem:[#allocation2 + $0x18] sm:$0xff] }
  0x31   :  { %1084 = vmatprep.subr.mxu0 %v201_v40  ;;  %1155 = vmatprep.subr.mxu1 %v203_v41  ;;  %v40_v62 = vld [vmem:[#allocation2] sm:$0xff]  ;;  %v42_v63 = vld [vmem:[#allocation2 + $0x10] sm:$0xff]  ;;  %v1033_v0 = vld [vmem:[#allocation2 + $0x1f08] sm:$0xff] }
  0x32   :  { %1085 = vmatpush1.msra.mxu0 %v200_v42  ;;  %1156 = vmatpush1.msra.mxu1 %v202_v43  ;;  %v1035_v1 = vld [vmem:[#allocation2 + $0x1f18] sm:$0xff]  ;;  %v1032_v2 = vld [vmem:[#allocation2 + $0x1f00] sm:$0xff]  ;;  %v1034_v3 = vld [vmem:[#allocation2 + $0x1f10] sm:$0xff] }
  0x33   :  { %1086 = vmatprep.subr.mxu0 %v169_v44  ;;  %1157 = vmatprep.subr.mxu1 %v171_v45  ;;  %v1001_v4 = vld [vmem:[#allocation2 + $0x1e08] sm:$0xff]  ;;  %v1003_v5 = vld [vmem:[#allocation2 + $0x1e18] sm:$0xff]  ;;  %v1000_v6 = vld [vmem:[#allocation2 + $0x1e00] sm:$0xff] }
  0x34   :  { %1087 = vmatpush1.msra.mxu0 %v168_v46  ;;  %1158 = vmatpush1.msra.mxu1 %v170_v47  ;;  %v1002_v7 = vld [vmem:[#allocation2 + $0x1e10] sm:$0xff]  ;;  %v969_v8 = vld [vmem:[#allocation2 + $0x1d08] sm:$0xff]  ;;  %v971_v9 = vld [vmem:[#allocation2 + $0x1d18] sm:$0xff] }
  0x35   :  { %1088 = vmatprep.subr.mxu0 %v137_v48  ;;  %1159 = vmatprep.subr.mxu1 %v139_v49  ;;  %v968_v10 = vld [vmem:[#allocation2 + $0x1d00] sm:$0xff]  ;;  %v970_v11 = vld [vmem:[#allocation2 + $0x1d10] sm:$0xff]  ;;  %v937_v12 = vld [vmem:[#allocation2 + $0x1c08] sm:$0xff] }
  0x36   :  { %1089 = vmatpush1.msra.mxu0 %v136_v50  ;;  %1160 = vmatpush1.msra.mxu1 %v138_v51  ;;  %v939_v13 = vld [vmem:[#allocation2 + $0x1c18] sm:$0xff]  ;;  %v936_v14 = vld [vmem:[#allocation2 + $0x1c00] sm:$0xff]  ;;  %v938_v15 = vld [vmem:[#allocation2 + $0x1c10] sm:$0xff] }
  0x37   :  { %1090 = vmatprep.subr.mxu0 %v105_v52  ;;  %1161 = vmatprep.subr.mxu1 %v107_v53  ;;  %v905_v16 = vld [vmem:[#allocation2 + $0x1b08] sm:$0xff]  ;;  %v907_v17 = vld [vmem:[#allocation2 + $0x1b18] sm:$0xff]  ;;  %v904_v18 = vld [vmem:[#allocation2 + $0x1b00] sm:$0xff] }
  0x38   :  { %1091 = vmatpush1.msra.mxu0 %v104_v54  ;;  %1162 = vmatpush1.msra.mxu1 %v106_v55  ;;  %v906_v19 = vld [vmem:[#allocation2 + $0x1b10] sm:$0xff]  ;;  %v873_v20 = vld [vmem:[#allocation2 + $0x1a08] sm:$0xff]  ;;  %v875_v21 = vld [vmem:[#allocation2 + $0x1a18] sm:$0xff] }
  0x39   :  { %1092 = vmatprep.subr.mxu0 %v73_v56  ;;  %1163 = vmatprep.subr.mxu1 %v75_v57  ;;  %v872_v22 = vld [vmem:[#allocation2 + $0x1a00] sm:$0xff]  ;;  %v874_v23 = vld [vmem:[#allocation2 + $0x1a10] sm:$0xff]  ;;  %v841_v24 = vld [vmem:[#allocation2 + $0x1908] sm:$0xff] }
  0x3a   :  { %1093 = vmatpush1.msra.mxu0 %v72_v58  ;;  %1164 = vmatpush1.msra.mxu1 %v74_v59  ;;  %v843_v25 = vld [vmem:[#allocation2 + $0x1918] sm:$0xff]  ;;  %v840_v26 = vld [vmem:[#allocation2 + $0x1900] sm:$0xff]  ;;  %v842_v27 = vld [vmem:[#allocation2 + $0x1910] sm:$0xff] }
  0x3b   :  { %1094 = vmatprep.subr.mxu0 %v41_v60  ;;  %1165 = vmatprep.subr.mxu1 %v43_v61  ;;  %v809_v28 = vld [vmem:[#allocation2 + $0x1808] sm:$0xff]  ;;  %v811_v29 = vld [vmem:[#allocation2 + $0x1818] sm:$0xff]  ;;  %v808_v30 = vld [vmem:[#allocation2 + $0x1800] sm:$0xff] }
  0x3c   :  { %1095 = vmatpush1.msra.mxu0 %v40_v62  ;;  %1166 = vmatpush1.msra.mxu1 %v42_v63  ;;  %v810_v31 = vld [vmem:[#allocation2 + $0x1810] sm:$0xff]  ;;  %v777_v32 = vld [vmem:[#allocation2 + $0x1708] sm:$0xff]  ;;  %v779_v33 = vld [vmem:[#allocation2 + $0x1718] sm:$0xff] }
  0x3d   :  { %1096 = vmatprep.subr.mxu0 %v1033_v0  ;;  %1167 = vmatprep.subr.mxu1 %v1035_v1  ;;  %v776_v34 = vld [vmem:[#allocation2 + $0x1700] sm:$0xff]  ;;  %v778_v35 = vld [vmem:[#allocation2 + $0x1710] sm:$0xff]  ;;  %v745_v36 = vld [vmem:[#allocation2 + $0x1608] sm:$0xff] }
  0x3e   :  { %1097 = vmatpush2.msra.mxu0 %v1032_v2  ;;  %1168 = vmatpush2.msra.mxu1 %v1034_v3  ;;  %v747_v37 = vld [vmem:[#allocation2 + $0x1618] sm:$0xff]  ;;  %v744_v38 = vld [vmem:[#allocation2 + $0x1600] sm:$0xff]  ;;  %v746_v39 = vld [vmem:[#allocation2 + $0x1610] sm:$0xff] }
  0x3f   :  { %1098 = vmatprep.subr.mxu0 %v1001_v4  ;;  %1169 = vmatprep.subr.mxu1 %v1003_v5  ;;  %v713_v40 = vld [vmem:[#allocation2 + $0x1508] sm:$0xff]  ;;  %v715_v41 = vld [vmem:[#allocation2 + $0x1518] sm:$0xff]  ;;  %v712_v42 = vld [vmem:[#allocation2 + $0x1500] sm:$0xff] }
  0x40   :  { %1099 = vmatpush2.msra.mxu0 %v1000_v6  ;;  %1170 = vmatpush2.msra.mxu1 %v1002_v7  ;;  %v714_v43 = vld [vmem:[#allocation2 + $0x1510] sm:$0xff]  ;;  %v681_v44 = vld [vmem:[#allocation2 + $0x1408] sm:$0xff]  ;;  %v683_v45 = vld [vmem:[#allocation2 + $0x1418] sm:$0xff] }
  0x41   :  { %1100 = vmatprep.subr.mxu0 %v969_v8  ;;  %1171 = vmatprep.subr.mxu1 %v971_v9  ;;  %v680_v46 = vld [vmem:[#allocation2 + $0x1400] sm:$0xff]  ;;  %v682_v47 = vld [vmem:[#allocation2 + $0x1410] sm:$0xff]  ;;  %v649_v48 = vld [vmem:[#allocation2 + $0x1308] sm:$0xff] }
  0x42   :  { %1101 = vmatpush2.msra.mxu0 %v968_v10  ;;  %1172 = vmatpush2.msra.mxu1 %v970_v11  ;;  %v651_v49 = vld [vmem:[#allocation2 + $0x1318] sm:$0xff]  ;;  %v648_v50 = vld [vmem:[#allocation2 + $0x1300] sm:$0xff]  ;;  %v650_v51 = vld [vmem:[#allocation2 + $0x1310] sm:$0xff] }
  0x43   :  { %1102 = vmatprep.subr.mxu0 %v937_v12  ;;  %1173 = vmatprep.subr.mxu1 %v939_v13  ;;  %v617_v52 = vld [vmem:[#allocation2 + $0x1208] sm:$0xff]  ;;  %v619_v53 = vld [vmem:[#allocation2 + $0x1218] sm:$0xff]  ;;  %v616_v54 = vld [vmem:[#allocation2 + $0x1200] sm:$0xff] }
  0x44   :  { %1103 = vmatpush2.msra.mxu0 %v936_v14  ;;  %1174 = vmatpush2.msra.mxu1 %v938_v15  ;;  %v618_v55 = vld [vmem:[#allocation2 + $0x1210] sm:$0xff]  ;;  %v585_v56 = vld [vmem:[#allocation2 + $0x1108] sm:$0xff]  ;;  %v587_v57 = vld [vmem:[#allocation2 + $0x1118] sm:$0xff] }
  0x45   :  { %1104 = vmatprep.subr.mxu0 %v905_v16  ;;  %1175 = vmatprep.subr.mxu1 %v907_v17  ;;  %v584_v58 = vld [vmem:[#allocation2 + $0x1100] sm:$0xff]  ;;  %v586_v59 = vld [vmem:[#allocation2 + $0x1110] sm:$0xff]  ;;  %v553_v60 = vld [vmem:[#allocation2 + $0x1008] sm:$0xff] }
  0x46   :  { %1105 = vmatpush2.msra.mxu0 %v904_v18  ;;  %1176 = vmatpush2.msra.mxu1 %v906_v19  ;;  %v555_v61 = vld [vmem:[#allocation2 + $0x1018] sm:$0xff]  ;;  %v552_v62 = vld [vmem:[#allocation2 + $0x1000] sm:$0xff]  ;;  %v2351_v63 = vld [vmem:[#allocation5 + $0x8] sm:$0xff] }
  0x47   :  { %1106 = vmatprep.subr.mxu0 %v873_v20  ;;  %1177 = vmatprep.subr.mxu1 %v875_v21  ;;  %v554_v0 = vld [vmem:[#allocation2 + $0x1010] sm:$0xff]  ;;  %v2353_v1 = vld [vmem:[#allocation5] sm:$0xff]  ;;  %v525_v2 = vld [vmem:[#allocation2 + $0xf28] sm:$0xff] }
  0x48   :  { %1107 = vmatpush2.msra.mxu0 %v872_v22  ;;  %1178 = vmatpush2.msra.mxu1 %v874_v23  ;;  %v527_v3 = vld [vmem:[#allocation2 + $0xf38] sm:$0xff]  ;;  %v524_v4 = vld [vmem:[#allocation2 + $0xf20] sm:$0xff]  ;;  %v526_v5 = vld [vmem:[#allocation2 + $0xf30] sm:$0xff] }
  0x49   :  { %1108 = vmatprep.subr.mxu0 %v841_v24  ;;  %1179 = vmatprep.subr.mxu1 %v843_v25  ;;  %v493_v6 = vld [vmem:[#allocation2 + $0xe28] sm:$0xff]  ;;  %v495_v7 = vld [vmem:[#allocation2 + $0xe38] sm:$0xff]  ;;  %v492_v8 = vld [vmem:[#allocation2 + $0xe20] sm:$0xff] }
  0x4a   :  { %1109 = vmatpush2.msra.mxu0 %v840_v26  ;;  %1180 = vmatpush2.msra.mxu1 %v842_v27  ;;  %v494_v9 = vld [vmem:[#allocation2 + $0xe30] sm:$0xff]  ;;  %v461_v10 = vld [vmem:[#allocation2 + $0xd28] sm:$0xff]  ;;  %v463_v11 = vld [vmem:[#allocation2 + $0xd38] sm:$0xff] }
  0x4b   :  { %1110 = vmatprep.subr.mxu0 %v809_v28  ;;  %1181 = vmatprep.subr.mxu1 %v811_v29  ;;  %v460_v12 = vld [vmem:[#allocation2 + $0xd20] sm:$0xff]  ;;  %v462_v13 = vld [vmem:[#allocation2 + $0xd30] sm:$0xff]  ;;  %v429_v14 = vld [vmem:[#allocation2 + $0xc28] sm:$0xff] }
  0x4c   :  { %1111 = vmatpush2.msra.mxu0 %v808_v30  ;;  %1182 = vmatpush2.msra.mxu1 %v810_v31  ;;  %v431_v15 = vld [vmem:[#allocation2 + $0xc38] sm:$0xff]  ;;  %v428_v16 = vld [vmem:[#allocation2 + $0xc20] sm:$0xff]  ;;  %v430_v17 = vld [vmem:[#allocation2 + $0xc30] sm:$0xff] }
  0x4d   :  { %1112 = vmatprep.subr.mxu0 %v777_v32  ;;  %1183 = vmatprep.subr.mxu1 %v779_v33  ;;  %v397_v18 = vld [vmem:[#allocation2 + $0xb28] sm:$0xff]  ;;  %v399_v19 = vld [vmem:[#allocation2 + $0xb38] sm:$0xff]  ;;  %v396_v20 = vld [vmem:[#allocation2 + $0xb20] sm:$0xff] }
  0x4e   :  { %1113 = vmatpush2.msra.mxu0 %v776_v34  ;;  %1184 = vmatpush2.msra.mxu1 %v778_v35  ;;  %v398_v21 = vld [vmem:[#allocation2 + $0xb30] sm:$0xff]  ;;  %v365_v22 = vld [vmem:[#allocation2 + $0xa28] sm:$0xff]  ;;  %v367_v23 = vld [vmem:[#allocation2 + $0xa38] sm:$0xff] }
  0x4f   :  { %1114 = vmatprep.subr.mxu0 %v745_v36  ;;  %1185 = vmatprep.subr.mxu1 %v747_v37  ;;  %v364_v24 = vld [vmem:[#allocation2 + $0xa20] sm:$0xff]  ;;  %v366_v25 = vld [vmem:[#allocation2 + $0xa30] sm:$0xff]  ;;  %v333_v26 = vld [vmem:[#allocation2 + $0x928] sm:$0xff] }
  0x50   :  { %1115 = vmatpush2.msra.mxu0 %v744_v38  ;;  %1186 = vmatpush2.msra.mxu1 %v746_v39  ;;  %v335_v27 = vld [vmem:[#allocation2 + $0x938] sm:$0xff]  ;;  %v332_v28 = vld [vmem:[#allocation2 + $0x920] sm:$0xff]  ;;  %v334_v29 = vld [vmem:[#allocation2 + $0x930] sm:$0xff] }
  0x51   :  { %1116 = vmatprep.subr.mxu0 %v713_v40  ;;  %1187 = vmatprep.subr.mxu1 %v715_v41  ;;  %v301_v30 = vld [vmem:[#allocation2 + $0x828] sm:$0xff]  ;;  %v303_v31 = vld [vmem:[#allocation2 + $0x838] sm:$0xff]  ;;  %v300_v32 = vld [vmem:[#allocation2 + $0x820] sm:$0xff] }
  0x52   :  { %1117 = vmatpush2.msra.mxu0 %v712_v42  ;;  %1188 = vmatpush2.msra.mxu1 %v714_v43  ;;  %v302_v33 = vld [vmem:[#allocation2 + $0x830] sm:$0xff]  ;;  %v269_v34 = vld [vmem:[#allocation2 + $0x728] sm:$0xff]  ;;  %v271_v35 = vld [vmem:[#allocation2 + $0x738] sm:$0xff] }
  0x53   :  { %1118 = vmatprep.subr.mxu0 %v681_v44  ;;  %1189 = vmatprep.subr.mxu1 %v683_v45  ;;  %v268_v36 = vld [vmem:[#allocation2 + $0x720] sm:$0xff]  ;;  %v270_v37 = vld [vmem:[#allocation2 + $0x730] sm:$0xff]  ;;  %v237_v38 = vld [vmem:[#allocation2 + $0x628] sm:$0xff] }
  0x54   :  { %1119 = vmatpush2.msra.mxu0 %v680_v46  ;;  %1190 = vmatpush2.msra.mxu1 %v682_v47  ;;  %v239_v39 = vld [vmem:[#allocation2 + $0x638] sm:$0xff]  ;;  %v236_v40 = vld [vmem:[#allocation2 + $0x620] sm:$0xff]  ;;  %v238_v41 = vld [vmem:[#allocation2 + $0x630] sm:$0xff] }
  0x55   :  { %1120 = vmatprep.subr.mxu0 %v649_v48  ;;  %1191 = vmatprep.subr.mxu1 %v651_v49  ;;  %v205_v42 = vld [vmem:[#allocation2 + $0x528] sm:$0xff]  ;;  %v207_v43 = vld [vmem:[#allocation2 + $0x538] sm:$0xff]  ;;  %v204_v44 = vld [vmem:[#allocation2 + $0x520] sm:$0xff] }
  0x56   :  { %1121 = vmatpush2.msra.mxu0 %v648_v50  ;;  %1192 = vmatpush2.msra.mxu1 %v650_v51  ;;  %v206_v45 = vld [vmem:[#allocation2 + $0x530] sm:$0xff]  ;;  %v173_v46 = vld [vmem:[#allocation2 + $0x428] sm:$0xff]  ;;  %v175_v47 = vld [vmem:[#allocation2 + $0x438] sm:$0xff] }
  0x57   :  { %1122 = vmatprep.subr.mxu0 %v617_v52  ;;  %1193 = vmatprep.subr.mxu1 %v619_v53  ;;  %v172_v48 = vld [vmem:[#allocation2 + $0x420] sm:$0xff]  ;;  %v174_v49 = vld [vmem:[#allocation2 + $0x430] sm:$0xff]  ;;  %v141_v50 = vld [vmem:[#allocation2 + $0x328] sm:$0xff] }
  0x58   :  { %1123 = vmatpush2.msra.mxu0 %v616_v54  ;;  %1194 = vmatpush2.msra.mxu1 %v618_v55  ;;  %v143_v51 = vld [vmem:[#allocation2 + $0x338] sm:$0xff]  ;;  %v140_v52 = vld [vmem:[#allocation2 + $0x320] sm:$0xff]  ;;  %v142_v53 = vld [vmem:[#allocation2 + $0x330] sm:$0xff] }
  0x59   :  { %1124 = vmatprep.subr.mxu0 %v585_v56  ;;  %1195 = vmatprep.subr.mxu1 %v587_v57  ;;  %v109_v54 = vld [vmem:[#allocation2 + $0x228] sm:$0xff]  ;;  %v111_v55 = vld [vmem:[#allocation2 + $0x238] sm:$0xff]  ;;  %v108_v56 = vld [vmem:[#allocation2 + $0x220] sm:$0xff] }
  0x5a   :  { %1125 = vmatpush2.msra.mxu0 %v584_v58  ;;  %1196 = vmatpush2.msra.mxu1 %v586_v59  ;;  %v110_v57 = vld [vmem:[#allocation2 + $0x230] sm:$0xff]  ;;  %v77_v58 = vld [vmem:[#allocation2 + $0x128] sm:$0xff]  ;;  %v79_v59 = vld [vmem:[#allocation2 + $0x138] sm:$0xff] }
  0x5b   :  { %1126 = vmatprep.subr.mxu0 %v553_v60  ;;  %1197 = vmatprep.subr.mxu1 %v555_v61  ;;  %v76_v60 = vld [vmem:[#allocation2 + $0x120] sm:$0xff]  ;;  %v78_v61 = vld [vmem:[#allocation2 + $0x130] sm:$0xff] }
  0x5c   :  { %1127 = vmatpush2.msra.mxu0 %v552_v62  ;;  %1128 = vmatprep.mubr.f32.mxu0 %v2351_v63  ;;  %v45_v62 = vld [vmem:[#allocation2 + $0x28] sm:$0xff] }
  0x5d   :  { %1198 = vmatpush2.msra.mxu1 %v554_v0  ;;  %1199 = vmatprep.mubr.f32.mxu1 %v2351_v63  ;;  %v47_v0 = vld [vmem:[#allocation2 + $0x38] sm:$0xff] }
  0x5e   :  { %1129 = vmatmul.mubr.f32.vlgmr.msra.gmra.mxu0 %v2353_v1  ;;  %1200 = vmatmul.mubr.f32.vlgmr.msra.gmra.mxu1 %v2353_v1 }
  0x5f   :  { %1206 = vmatprep.subr.mxu0 %v525_v2  ;;  %1277 = vmatprep.subr.mxu1 %v527_v3  ;;  %v44_v2 = vld [vmem:[#allocation2 + $0x20] sm:$0xff]  ;;  %v46_v3 = vld [vmem:[#allocation2 + $0x30] sm:$0xff] }
  0x60   :  { %1207 = vmatpush1.msra.mxu0 %v524_v4  ;;  %1278 = vmatpush1.msra.mxu1 %v526_v5  ;;  %v1037_v4 = vld [vmem:[#allocation2 + $0x1f28] sm:$0xff]  ;;  %v1039_v5 = vld [vmem:[#allocation2 + $0x1f38] sm:$0xff] }
  0x61   :  { %1208 = vmatprep.subr.mxu0 %v493_v6  ;;  %1279 = vmatprep.subr.mxu1 %v495_v7  ;;  %v1036_v6 = vld [vmem:[#allocation2 + $0x1f20] sm:$0xff]  ;;  %v1038_v7 = vld [vmem:[#allocation2 + $0x1f30] sm:$0xff] }
  0x62   :  { %1209 = vmatpush1.msra.mxu0 %v492_v8  ;;  %1280 = vmatpush1.msra.mxu1 %v494_v9  ;;  %v1005_v8 = vld [vmem:[#allocation2 + $0x1e28] sm:$0xff]  ;;  %v1007_v9 = vld [vmem:[#allocation2 + $0x1e38] sm:$0xff] }
  0x63   :  { %1210 = vmatprep.subr.mxu0 %v461_v10  ;;  %1281 = vmatprep.subr.mxu1 %v463_v11  ;;  %v1004_v10 = vld [vmem:[#allocation2 + $0x1e20] sm:$0xff]  ;;  %v1006_v11 = vld [vmem:[#allocation2 + $0x1e30] sm:$0xff] }
  0x64   :  { %1211 = vmatpush1.msra.mxu0 %v460_v12  ;;  %1282 = vmatpush1.msra.mxu1 %v462_v13  ;;  %v973_v12 = vld [vmem:[#allocation2 + $0x1d28] sm:$0xff]  ;;  %v975_v13 = vld [vmem:[#allocation2 + $0x1d38] sm:$0xff] }
  0x65   :  { %1212 = vmatprep.subr.mxu0 %v429_v14  ;;  %1283 = vmatprep.subr.mxu1 %v431_v15  ;;  %v972_v14 = vld [vmem:[#allocation2 + $0x1d20] sm:$0xff]  ;;  %v974_v15 = vld [vmem:[#allocation2 + $0x1d30] sm:$0xff] }
  0x66   :  { %1213 = vmatpush1.msra.mxu0 %v428_v16  ;;  %1284 = vmatpush1.msra.mxu1 %v430_v17  ;;  %v941_v16 = vld [vmem:[#allocation2 + $0x1c28] sm:$0xff]  ;;  %v943_v17 = vld [vmem:[#allocation2 + $0x1c38] sm:$0xff] }
  0x67   :  { %1214 = vmatprep.subr.mxu0 %v397_v18  ;;  %1285 = vmatprep.subr.mxu1 %v399_v19  ;;  %v940_v18 = vld [vmem:[#allocation2 + $0x1c20] sm:$0xff]  ;;  %v942_v19 = vld [vmem:[#allocation2 + $0x1c30] sm:$0xff] }
  0x68   :  { %1215 = vmatpush1.msra.mxu0 %v396_v20  ;;  %1286 = vmatpush1.msra.mxu1 %v398_v21  ;;  %v909_v20 = vld [vmem:[#allocation2 + $0x1b28] sm:$0xff]  ;;  %v911_v21 = vld [vmem:[#allocation2 + $0x1b38] sm:$0xff] }
  0x69   :  { %1216 = vmatprep.subr.mxu0 %v365_v22  ;;  %1287 = vmatprep.subr.mxu1 %v367_v23  ;;  %v908_v22 = vld [vmem:[#allocation2 + $0x1b20] sm:$0xff]  ;;  %v910_v23 = vld [vmem:[#allocation2 + $0x1b30] sm:$0xff] }
  0x6a   :  { %1217 = vmatpush1.msra.mxu0 %v364_v24  ;;  %1288 = vmatpush1.msra.mxu1 %v366_v25  ;;  %v877_v24 = vld [vmem:[#allocation2 + $0x1a28] sm:$0xff]  ;;  %v879_v25 = vld [vmem:[#allocation2 + $0x1a38] sm:$0xff] }
  0x6b   :  { %1218 = vmatprep.subr.mxu0 %v333_v26  ;;  %1289 = vmatprep.subr.mxu1 %v335_v27  ;;  %v876_v26 = vld [vmem:[#allocation2 + $0x1a20] sm:$0xff]  ;;  %v878_v27 = vld [vmem:[#allocation2 + $0x1a30] sm:$0xff] }
  0x6c   :  { %1219 = vmatpush1.msra.mxu0 %v332_v28  ;;  %1290 = vmatpush1.msra.mxu1 %v334_v29  ;;  %v845_v28 = vld [vmem:[#allocation2 + $0x1928] sm:$0xff]  ;;  %v847_v29 = vld [vmem:[#allocation2 + $0x1938] sm:$0xff] }
  0x6d   :  { %1220 = vmatprep.subr.mxu0 %v301_v30  ;;  %1291 = vmatprep.subr.mxu1 %v303_v31  ;;  %v844_v30 = vld [vmem:[#allocation2 + $0x1920] sm:$0xff]  ;;  %v846_v31 = vld [vmem:[#allocation2 + $0x1930] sm:$0xff] }
  0x6e   :  { %1221 = vmatpush1.msra.mxu0 %v300_v32  ;;  %1292 = vmatpush1.msra.mxu1 %v302_v33  ;;  %v813_v32 = vld [vmem:[#allocation2 + $0x1828] sm:$0xff]  ;;  %v815_v33 = vld [vmem:[#allocation2 + $0x1838] sm:$0xff] }
  0x6f   :  { %1222 = vmatprep.subr.mxu0 %v269_v34  ;;  %1293 = vmatprep.subr.mxu1 %v271_v35  ;;  %v812_v34 = vld [vmem:[#allocation2 + $0x1820] sm:$0xff]  ;;  %v814_v35 = vld [vmem:[#allocation2 + $0x1830] sm:$0xff] }
  0x70   :  { %1223 = vmatpush1.msra.mxu0 %v268_v36  ;;  %1294 = vmatpush1.msra.mxu1 %v270_v37  ;;  %v781_v36 = vld [vmem:[#allocation2 + $0x1728] sm:$0xff]  ;;  %v783_v37 = vld [vmem:[#allocation2 + $0x1738] sm:$0xff] }
  0x71   :  { %1224 = vmatprep.subr.mxu0 %v237_v38  ;;  %1295 = vmatprep.subr.mxu1 %v239_v39  ;;  %v780_v38 = vld [vmem:[#allocation2 + $0x1720] sm:$0xff]  ;;  %v782_v39 = vld [vmem:[#allocation2 + $0x1730] sm:$0xff] }
  0x72   :  { %1225 = vmatpush1.msra.mxu0 %v236_v40  ;;  %1296 = vmatpush1.msra.mxu1 %v238_v41  ;;  %v749_v40 = vld [vmem:[#allocation2 + $0x1628] sm:$0xff]  ;;  %v751_v41 = vld [vmem:[#allocation2 + $0x1638] sm:$0xff] }
  0x73   :  { %1226 = vmatprep.subr.mxu0 %v205_v42  ;;  %1297 = vmatprep.subr.mxu1 %v207_v43  ;;  %v748_v42 = vld [vmem:[#allocation2 + $0x1620] sm:$0xff]  ;;  %v750_v43 = vld [vmem:[#allocation2 + $0x1630] sm:$0xff] }
  0x74   :  { %1227 = vmatpush1.msra.mxu0 %v204_v44  ;;  %1298 = vmatpush1.msra.mxu1 %v206_v45  ;;  %v717_v44 = vld [vmem:[#allocation2 + $0x1528] sm:$0xff]  ;;  %v719_v45 = vld [vmem:[#allocation2 + $0x1538] sm:$0xff] }
  0x75   :  { %1228 = vmatprep.subr.mxu0 %v173_v46  ;;  %1299 = vmatprep.subr.mxu1 %v175_v47  ;;  %v716_v46 = vld [vmem:[#allocation2 + $0x1520] sm:$0xff]  ;;  %v718_v47 = vld [vmem:[#allocation2 + $0x1530] sm:$0xff] }
  0x76   :  { %1229 = vmatpush1.msra.mxu0 %v172_v48  ;;  %1300 = vmatpush1.msra.mxu1 %v174_v49  ;;  %v685_v48 = vld [vmem:[#allocation2 + $0x1428] sm:$0xff]  ;;  %v687_v49 = vld [vmem:[#allocation2 + $0x1438] sm:$0xff] }
  0x77   :  { %1230 = vmatprep.subr.mxu0 %v141_v50  ;;  %1301 = vmatprep.subr.mxu1 %v143_v51  ;;  %v684_v50 = vld [vmem:[#allocation2 + $0x1420] sm:$0xff]  ;;  %v686_v51 = vld [vmem:[#allocation2 + $0x1430] sm:$0xff] }
  0x78   :  { %1231 = vmatpush1.msra.mxu0 %v140_v52  ;;  %1302 = vmatpush1.msra.mxu1 %v142_v53  ;;  %v653_v52 = vld [vmem:[#allocation2 + $0x1328] sm:$0xff]  ;;  %v655_v53 = vld [vmem:[#allocation2 + $0x1338] sm:$0xff] }
  0x79   :  { %1232 = vmatprep.subr.mxu0 %v109_v54  ;;  %1303 = vmatprep.subr.mxu1 %v111_v55  ;;  %v652_v54 = vld [vmem:[#allocation2 + $0x1320] sm:$0xff]  ;;  %v654_v55 = vld [vmem:[#allocation2 + $0x1330] sm:$0xff] }
  0x7a   :  { %1233 = vmatpush1.msra.mxu0 %v108_v56  ;;  %1304 = vmatpush1.msra.mxu1 %v110_v57  ;;  %v621_v56 = vld [vmem:[#allocation2 + $0x1228] sm:$0xff]  ;;  %v623_v57 = vld [vmem:[#allocation2 + $0x1238] sm:$0xff] }
  0x7b   :  { %1234 = vmatprep.subr.mxu0 %v77_v58  ;;  %1305 = vmatprep.subr.mxu1 %v79_v59  ;;  %v620_v58 = vld [vmem:[#allocation2 + $0x1220] sm:$0xff]  ;;  %v622_v59 = vld [vmem:[#allocation2 + $0x1230] sm:$0xff] }
  0x7c   :  { %1235 = vmatpush1.msra.mxu0 %v76_v60  ;;  %1306 = vmatpush1.msra.mxu1 %v78_v61  ;;  %v589_v60 = vld [vmem:[#allocation2 + $0x1128] sm:$0xff]  ;;  %v591_v61 = vld [vmem:[#allocation2 + $0x1138] sm:$0xff] }
  0x7d   :  { %1236 = vmatprep.subr.mxu0 %v45_v62  ;;  %1307 = vmatprep.subr.mxu1 %v47_v0  ;;  %v588_v62 = vld [vmem:[#allocation2 + $0x1120] sm:$0xff]  ;;  %v590_v0 = vld [vmem:[#allocation2 + $0x1130] sm:$0xff] }
  0x7e   :  { %1237 = vmatpush1.msra.mxu0 %v44_v2  ;;  %1308 = vmatpush1.msra.mxu1 %v46_v3  ;;  %v557_v2 = vld [vmem:[#allocation2 + $0x1028] sm:$0xff]  ;;  %v559_v3 = vld [vmem:[#allocation2 + $0x1038] sm:$0xff] }
  0x7f   :  { %1238 = vmatprep.subr.mxu0 %v1037_v4  ;;  %1309 = vmatprep.subr.mxu1 %v1039_v5  ;;  %v556_v4 = vld [vmem:[#allocation2 + $0x1020] sm:$0xff]  ;;  %v558_v5 = vld [vmem:[#allocation2 + $0x1030] sm:$0xff] }
  0x80   :  { %1239 = vmatpush2.msra.mxu0 %v1036_v6  ;;  %1310 = vmatpush2.msra.mxu1 %v1038_v7  ;;  %v529_v6 = vld [vmem:[#allocation2 + $0xf48] sm:$0xff]  ;;  %v531_v7 = vld [vmem:[#allocation2 + $0xf58] sm:$0xff] }
  0x81   :  { %1240 = vmatprep.subr.mxu0 %v1005_v8  ;;  %1311 = vmatprep.subr.mxu1 %v1007_v9  ;;  %v528_v8 = vld [vmem:[#allocation2 + $0xf40] sm:$0xff]  ;;  %v530_v9 = vld [vmem:[#allocation2 + $0xf50] sm:$0xff] }
  0x82   :  { %1241 = vmatpush2.msra.mxu0 %v1004_v10  ;;  %1312 = vmatpush2.msra.mxu1 %v1006_v11  ;;  %v497_v10 = vld [vmem:[#allocation2 + $0xe48] sm:$0xff]  ;;  %v499_v11 = vld [vmem:[#allocation2 + $0xe58] sm:$0xff] }
  0x83   :  { %1242 = vmatprep.subr.mxu0 %v973_v12  ;;  %1313 = vmatprep.subr.mxu1 %v975_v13  ;;  %v496_v12 = vld [vmem:[#allocation2 + $0xe40] sm:$0xff]  ;;  %v498_v13 = vld [vmem:[#allocation2 + $0xe50] sm:$0xff] }
  0x84   :  { %1243 = vmatpush2.msra.mxu0 %v972_v14  ;;  %1314 = vmatpush2.msra.mxu1 %v974_v15  ;;  %v465_v14 = vld [vmem:[#allocation2 + $0xd48] sm:$0xff]  ;;  %v467_v15 = vld [vmem:[#allocation2 + $0xd58] sm:$0xff] }
  0x85   :  { %1244 = vmatprep.subr.mxu0 %v941_v16  ;;  %1315 = vmatprep.subr.mxu1 %v943_v17  ;;  %v464_v16 = vld [vmem:[#allocation2 + $0xd40] sm:$0xff]  ;;  %v433_v17 = vld [vmem:[#allocation2 + $0xc48] sm:$0xff] }
  0x86   :  { %1245 = vmatpush2.msra.mxu0 %v940_v18  ;;  %1316 = vmatpush2.msra.mxu1 %v942_v19  ;;  %v435_v18 = vld [vmem:[#allocation2 + $0xc58] sm:$0xff]  ;;  %v434_v19 = vld [vmem:[#allocation2 + $0xc50] sm:$0xff] }
  0x87   :  { %1246 = vmatprep.subr.mxu0 %v909_v20  ;;  %1317 = vmatprep.subr.mxu1 %v911_v21  ;;  %v401_v20 = vld [vmem:[#allocation2 + $0xb48] sm:$0xff]  ;;  %v403_v21 = vld [vmem:[#allocation2 + $0xb58] sm:$0xff] }
  0x88   :  { %1247 = vmatpush2.msra.mxu0 %v908_v22  ;;  %1318 = vmatpush2.msra.mxu1 %v910_v23  ;;  %v400_v22 = vld [vmem:[#allocation2 + $0xb40] sm:$0xff]  ;;  %v402_v23 = vld [vmem:[#allocation2 + $0xb50] sm:$0xff] }
  0x89   :  { %1248 = vmatprep.subr.mxu0 %v877_v24  ;;  %1319 = vmatprep.subr.mxu1 %v879_v25  ;;  %v369_v24 = vld [vmem:[#allocation2 + $0xa48] sm:$0xff]  ;;  %v371_v25 = vld [vmem:[#allocation2 + $0xa58] sm:$0xff] }
  0x8a   :  { %1249 = vmatpush2.msra.mxu0 %v876_v26  ;;  %1320 = vmatpush2.msra.mxu1 %v878_v27  ;;  %v368_v26 = vld [vmem:[#allocation2 + $0xa40] sm:$0xff]  ;;  %v370_v27 = vld [vmem:[#allocation2 + $0xa50] sm:$0xff] }
  0x8b   :  { %1250 = vmatprep.subr.mxu0 %v845_v28  ;;  %1321 = vmatprep.subr.mxu1 %v847_v29  ;;  %v337_v28 = vld [vmem:[#allocation2 + $0x948] sm:$0xff]  ;;  %v339_v29 = vld [vmem:[#allocation2 + $0x958] sm:$0xff] }
  0x8c   :  { %1251 = vmatpush2.msra.mxu0 %v844_v30  ;;  %1322 = vmatpush2.msra.mxu1 %v846_v31  ;;  %v336_v30 = vld [vmem:[#allocation2 + $0x940] sm:$0xff]  ;;  %v338_v31 = vld [vmem:[#allocation2 + $0x950] sm:$0xff] }
  0x8d   :  { %1252 = vmatprep.subr.mxu0 %v813_v32  ;;  %1323 = vmatprep.subr.mxu1 %v815_v33  ;;  %v305_v32 = vld [vmem:[#allocation2 + $0x848] sm:$0xff]  ;;  %v307_v33 = vld [vmem:[#allocation2 + $0x858] sm:$0xff] }
  0x8e   :  { %1253 = vmatpush2.msra.mxu0 %v812_v34  ;;  %1324 = vmatpush2.msra.mxu1 %v814_v35  ;;  %v304_v34 = vld [vmem:[#allocation2 + $0x840] sm:$0xff]  ;;  %v306_v35 = vld [vmem:[#allocation2 + $0x850] sm:$0xff] }
  0x8f   :  { %1254 = vmatprep.subr.mxu0 %v781_v36  ;;  %1325 = vmatprep.subr.mxu1 %v783_v37  ;;  %v273_v36 = vld [vmem:[#allocation2 + $0x748] sm:$0xff]  ;;  %v275_v37 = vld [vmem:[#allocation2 + $0x758] sm:$0xff] }
  0x90   :  { %1255 = vmatpush2.msra.mxu0 %v780_v38  ;;  %1326 = vmatpush2.msra.mxu1 %v782_v39  ;;  %v272_v38 = vld [vmem:[#allocation2 + $0x740] sm:$0xff]  ;;  %v274_v39 = vld [vmem:[#allocation2 + $0x750] sm:$0xff] }
  0x91   :  { %1256 = vmatprep.subr.mxu0 %v749_v40  ;;  %1327 = vmatprep.subr.mxu1 %v751_v41  ;;  %v241_v40 = vld [vmem:[#allocation2 + $0x648] sm:$0xff]  ;;  %v243_v41 = vld [vmem:[#allocation2 + $0x658] sm:$0xff] }
  0x92   :  { %1257 = vmatpush2.msra.mxu0 %v748_v42  ;;  %1328 = vmatpush2.msra.mxu1 %v750_v43  ;;  %v240_v42 = vld [vmem:[#allocation2 + $0x640] sm:$0xff]  ;;  %v242_v43 = vld [vmem:[#allocation2 + $0x650] sm:$0xff] }
  0x93   :  { %1258 = vmatprep.subr.mxu0 %v717_v44  ;;  %1329 = vmatprep.subr.mxu1 %v719_v45  ;;  %v209_v44 = vld [vmem:[#allocation2 + $0x548] sm:$0xff]  ;;  %v211_v45 = vld [vmem:[#allocation2 + $0x558] sm:$0xff] }
  0x94   :  { %1259 = vmatpush2.msra.mxu0 %v716_v46  ;;  %1330 = vmatpush2.msra.mxu1 %v718_v47  ;;  %v208_v46 = vld [vmem:[#allocation2 + $0x540] sm:$0xff]  ;;  %v210_v47 = vld [vmem:[#allocation2 + $0x550] sm:$0xff] }
  0x95   :  { %1260 = vmatprep.subr.mxu0 %v685_v48  ;;  %1331 = vmatprep.subr.mxu1 %v687_v49  ;;  %v177_v48 = vld [vmem:[#allocation2 + $0x448] sm:$0xff]  ;;  %v179_v49 = vld [vmem:[#allocation2 + $0x458] sm:$0xff] }
  0x96   :  { %1261 = vmatpush2.msra.mxu0 %v684_v50  ;;  %1332 = vmatpush2.msra.mxu1 %v686_v51  ;;  %v176_v50 = vld [vmem:[#allocation2 + $0x440] sm:$0xff]  ;;  %v178_v51 = vld [vmem:[#allocation2 + $0x450] sm:$0xff] }
  0x97   :  { %1262 = vmatprep.subr.mxu0 %v653_v52  ;;  %1333 = vmatprep.subr.mxu1 %v655_v53  ;;  %v145_v52 = vld [vmem:[#allocation2 + $0x348] sm:$0xff]  ;;  %v147_v53 = vld [vmem:[#allocation2 + $0x358] sm:$0xff] }
  0x98   :  { %1263 = vmatpush2.msra.mxu0 %v652_v54  ;;  %1334 = vmatpush2.msra.mxu1 %v654_v55  ;;  %v144_v54 = vld [vmem:[#allocation2 + $0x340] sm:$0xff]  ;;  %v146_v55 = vld [vmem:[#allocation2 + $0x350] sm:$0xff] }
  0x99   :  { %1264 = vmatprep.subr.mxu0 %v621_v56  ;;  %1335 = vmatprep.subr.mxu1 %v623_v57  ;;  %v113_v56 = vld [vmem:[#allocation2 + $0x248] sm:$0xff]  ;;  %v115_v57 = vld [vmem:[#allocation2 + $0x258] sm:$0xff] }
  0x9a   :  { %1265 = vmatpush2.msra.mxu0 %v620_v58  ;;  %1336 = vmatpush2.msra.mxu1 %v622_v59  ;;  %v112_v58 = vld [vmem:[#allocation2 + $0x240] sm:$0xff]  ;;  %v114_v59 = vld [vmem:[#allocation2 + $0x250] sm:$0xff] }
  0x9b   :  { %1266 = vmatprep.subr.mxu0 %v589_v60  ;;  %1337 = vmatprep.subr.mxu1 %v591_v61  ;;  %v81_v60 = vld [vmem:[#allocation2 + $0x148] sm:$0xff]  ;;  %v83_v61 = vld [vmem:[#allocation2 + $0x158] sm:$0xff] }
  0x9c   :  { %1267 = vmatpush2.msra.mxu0 %v588_v62  ;;  %1338 = vmatpush2.msra.mxu1 %v590_v0  ;;  %v80_v62 = vld [vmem:[#allocation2 + $0x140] sm:$0xff]  ;;  %v82_v0 = vld [vmem:[#allocation2 + $0x150] sm:$0xff] }
  0x9d   :  { %1268 = vmatprep.subr.mxu0 %v557_v2  ;;  %1339 = vmatprep.subr.mxu1 %v559_v3  ;;  %v49_v2 = vld [vmem:[#allocation2 + $0x48] sm:$0xff]  ;;  %v51_v3 = vld [vmem:[#allocation2 + $0x58] sm:$0xff] }
  0x9e   :  { %1269 = vmatpush2.msra.mxu0 %v556_v4  ;;  %1270 = vmatprep.mubr.f32.mxu0 %v2351_v63  ;;  %v48_v4 = vld [vmem:[#allocation2 + $0x40] sm:$0xff] }
  0x9f   :  { %1340 = vmatpush2.msra.mxu1 %v558_v5  ;;  %1341 = vmatprep.mubr.f32.mxu1 %v2351_v63  ;;  %v466_v63 = vld [vmem:[#allocation2 + $0xd50] sm:$0xff] }
  0xa0   :  { %1271 = vmatmul.mubr.f32.vlgmr.msra.gmra.mxu0 %v2353_v1  ;;  %1342 = vmatmul.mubr.f32.vlgmr.msra.gmra.mxu1 %v2353_v1  ;;  %v432_v1 = vld [vmem:[#allocation2 + $0xc40] sm:$0xff]  ;;  %v50_v5 = vld [vmem:[#allocation2 + $0x50] sm:$0xff] }
  0xa1   :  { %1348 = vmatprep.subr.mxu0 %v529_v6  ;;  %1419 = vmatprep.subr.mxu1 %v531_v7  ;;  %v1041_v6 = vld [vmem:[#allocation2 + $0x1f48] sm:$0xff]  ;;  %v1043_v7 = vld [vmem:[#allocation2 + $0x1f58] sm:$0xff] }
  0xa2   :  { %1349 = vmatpush1.msra.mxu0 %v528_v8  ;;  %1420 = vmatpush1.msra.mxu1 %v530_v9  ;;  %v1040_v8 = vld [vmem:[#allocation2 + $0x1f40] sm:$0xff]  ;;  %v1042_v9 = vld [vmem:[#allocation2 + $0x1f50] sm:$0xff] }
  0xa3   :  { %1350 = vmatprep.subr.mxu0 %v497_v10  ;;  %1421 = vmatprep.subr.mxu1 %v499_v11  ;;  %v1009_v10 = vld [vmem:[#allocation2 + $0x1e48] sm:$0xff]  ;;  %v1011_v11 = vld [vmem:[#allocation2 + $0x1e58] sm:$0xff] }
  0xa4   :  { %1351 = vmatpush1.msra.mxu0 %v496_v12  ;;  %1422 = vmatpush1.msra.mxu1 %v498_v13  ;;  %v1008_v12 = vld [vmem:[#allocation2 + $0x1e40] sm:$0xff]  ;;  %v1010_v13 = vld [vmem:[#allocation2 + $0x1e50] sm:$0xff] }
  0xa5   :  { %1352 = vmatprep.subr.mxu0 %v465_v14  ;;  %1423 = vmatprep.subr.mxu1 %v467_v15  ;;  %v977_v14 = vld [vmem:[#allocation2 + $0x1d48] sm:$0xff]  ;;  %v979_v15 = vld [vmem:[#allocation2 + $0x1d58] sm:$0xff] }
  0xa6   :  { %1353 = vmatpush1.msra.mxu0 %v464_v16  ;;  %1424 = vmatpush1.msra.mxu1 %v466_v63  ;;  %v976_v16 = vld [vmem:[#allocation2 + $0x1d40] sm:$0xff]  ;;  %v978_v63 = vld [vmem:[#allocation2 + $0x1d50] sm:$0xff] }
  0xa7   :  { %1354 = vmatprep.subr.mxu0 %v433_v17  ;;  %1425 = vmatprep.subr.mxu1 %v435_v18  ;;  %v945_v17 = vld [vmem:[#allocation2 + $0x1c48] sm:$0xff]  ;;  %v947_v18 = vld [vmem:[#allocation2 + $0x1c58] sm:$0xff] }
  0xa8   :  { %1355 = vmatpush1.msra.mxu0 %v432_v1  ;;  %1426 = vmatpush1.msra.mxu1 %v434_v19  ;;  %v944_v1 = vld [vmem:[#allocation2 + $0x1c40] sm:$0xff]  ;;  %v946_v19 = vld [vmem:[#allocation2 + $0x1c50] sm:$0xff] }
  0xa9   :  { %1356 = vmatprep.subr.mxu0 %v401_v20  ;;  %1427 = vmatprep.subr.mxu1 %v403_v21  ;;  %v913_v20 = vld [vmem:[#allocation2 + $0x1b48] sm:$0xff]  ;;  %v915_v21 = vld [vmem:[#allocation2 + $0x1b58] sm:$0xff] }
  0xaa   :  { %1357 = vmatpush1.msra.mxu0 %v400_v22  ;;  %1428 = vmatpush1.msra.mxu1 %v402_v23  ;;  %v912_v22 = vld [vmem:[#allocation2 + $0x1b40] sm:$0xff]  ;;  %v914_v23 = vld [vmem:[#allocation2 + $0x1b50] sm:$0xff] }
  0xab   :  { %1358 = vmatprep.subr.mxu0 %v369_v24  ;;  %1429 = vmatprep.subr.mxu1 %v371_v25  ;;  %v881_v24 = vld [vmem:[#allocation2 + $0x1a48] sm:$0xff]  ;;  %v883_v25 = vld [vmem:[#allocation2 + $0x1a58] sm:$0xff] }
  0xac   :  { %1359 = vmatpush1.msra.mxu0 %v368_v26  ;;  %1430 = vmatpush1.msra.mxu1 %v370_v27  ;;  %v880_v26 = vld [vmem:[#allocation2 + $0x1a40] sm:$0xff]  ;;  %v882_v27 = vld [vmem:[#allocation2 + $0x1a50] sm:$0xff] }
  0xad   :  { %1360 = vmatprep.subr.mxu0 %v337_v28  ;;  %1431 = vmatprep.subr.mxu1 %v339_v29  ;;  %v849_v28 = vld [vmem:[#allocation2 + $0x1948] sm:$0xff]  ;;  %v851_v29 = vld [vmem:[#allocation2 + $0x1958] sm:$0xff] }
  0xae   :  { %1361 = vmatpush1.msra.mxu0 %v336_v30  ;;  %1432 = vmatpush1.msra.mxu1 %v338_v31  ;;  %v848_v30 = vld [vmem:[#allocation2 + $0x1940] sm:$0xff]  ;;  %v850_v31 = vld [vmem:[#allocation2 + $0x1950] sm:$0xff] }
  0xaf   :  { %1362 = vmatprep.subr.mxu0 %v305_v32  ;;  %1433 = vmatprep.subr.mxu1 %v307_v33  ;;  %v817_v32 = vld [vmem:[#allocation2 + $0x1848] sm:$0xff]  ;;  %v819_v33 = vld [vmem:[#allocation2 + $0x1858] sm:$0xff] }
  0xb0   :  { %1363 = vmatpush1.msra.mxu0 %v304_v34  ;;  %1434 = vmatpush1.msra.mxu1 %v306_v35  ;;  %v816_v34 = vld [vmem:[#allocation2 + $0x1840] sm:$0xff]  ;;  %v818_v35 = vld [vmem:[#allocation2 + $0x1850] sm:$0xff] }
  0xb1   :  { %1364 = vmatprep.subr.mxu0 %v273_v36  ;;  %1435 = vmatprep.subr.mxu1 %v275_v37  ;;  %v785_v36 = vld [vmem:[#allocation2 + $0x1748] sm:$0xff]  ;;  %v787_v37 = vld [vmem:[#allocation2 + $0x1758] sm:$0xff] }
  0xb2   :  { %1365 = vmatpush1.msra.mxu0 %v272_v38  ;;  %1436 = vmatpush1.msra.mxu1 %v274_v39  ;;  %v784_v38 = vld [vmem:[#allocation2 + $0x1740] sm:$0xff]  ;;  %v786_v39 = vld [vmem:[#allocation2 + $0x1750] sm:$0xff] }
  0xb3   :  { %1366 = vmatprep.subr.mxu0 %v241_v40  ;;  %1437 = vmatprep.subr.mxu1 %v243_v41  ;;  %v753_v40 = vld [vmem:[#allocation2 + $0x1648] sm:$0xff]  ;;  %v755_v41 = vld [vmem:[#allocation2 + $0x1658] sm:$0xff] }
  0xb4   :  { %1367 = vmatpush1.msra.mxu0 %v240_v42  ;;  %1438 = vmatpush1.msra.mxu1 %v242_v43  ;;  %v752_v42 = vld [vmem:[#allocation2 + $0x1640] sm:$0xff]  ;;  %v754_v43 = vld [vmem:[#allocation2 + $0x1650] sm:$0xff] }
  0xb5   :  { %1368 = vmatprep.subr.mxu0 %v209_v44  ;;  %1439 = vmatprep.subr.mxu1 %v211_v45  ;;  %v721_v44 = vld [vmem:[#allocation2 + $0x1548] sm:$0xff]  ;;  %v723_v45 = vld [vmem:[#allocation2 + $0x1558] sm:$0xff] }
  0xb6   :  { %1369 = vmatpush1.msra.mxu0 %v208_v46  ;;  %1440 = vmatpush1.msra.mxu1 %v210_v47  ;;  %v720_v46 = vld [vmem:[#allocation2 + $0x1540] sm:$0xff]  ;;  %v722_v47 = vld [vmem:[#allocation2 + $0x1550] sm:$0xff] }
  0xb7   :  { %1370 = vmatprep.subr.mxu0 %v177_v48  ;;  %1441 = vmatprep.subr.mxu1 %v179_v49  ;;  %v689_v48 = vld [vmem:[#allocation2 + $0x1448] sm:$0xff]  ;;  %v691_v49 = vld [vmem:[#allocation2 + $0x1458] sm:$0xff] }
  0xb8   :  { %1371 = vmatpush1.msra.mxu0 %v176_v50  ;;  %1442 = vmatpush1.msra.mxu1 %v178_v51  ;;  %v688_v50 = vld [vmem:[#allocation2 + $0x1440] sm:$0xff]  ;;  %v690_v51 = vld [vmem:[#allocation2 + $0x1450] sm:$0xff] }
  0xb9   :  { %1372 = vmatprep.subr.mxu0 %v145_v52  ;;  %1443 = vmatprep.subr.mxu1 %v147_v53  ;;  %v657_v52 = vld [vmem:[#allocation2 + $0x1348] sm:$0xff]  ;;  %v659_v53 = vld [vmem:[#allocation2 + $0x1358] sm:$0xff] }
  0xba   :  { %1373 = vmatpush1.msra.mxu0 %v144_v54  ;;  %1444 = vmatpush1.msra.mxu1 %v146_v55  ;;  %v656_v54 = vld [vmem:[#allocation2 + $0x1340] sm:$0xff]  ;;  %v658_v55 = vld [vmem:[#allocation2 + $0x1350] sm:$0xff] }
  0xbb   :  { %1374 = vmatprep.subr.mxu0 %v113_v56  ;;  %1445 = vmatprep.subr.mxu1 %v115_v57  ;;  %v625_v56 = vld [vmem:[#allocation2 + $0x1248] sm:$0xff]  ;;  %v627_v57 = vld [vmem:[#allocation2 + $0x1258] sm:$0xff] }
  0xbc   :  { %1375 = vmatpush1.msra.mxu0 %v112_v58  ;;  %1446 = vmatpush1.msra.mxu1 %v114_v59  ;;  %v624_v58 = vld [vmem:[#allocation2 + $0x1240] sm:$0xff]  ;;  %v626_v59 = vld [vmem:[#allocation2 + $0x1250] sm:$0xff] }
  0xbd   :  { %1376 = vmatprep.subr.mxu0 %v81_v60  ;;  %1447 = vmatprep.subr.mxu1 %v83_v61  ;;  %v593_v60 = vld [vmem:[#allocation2 + $0x1148] sm:$0xff]  ;;  %v595_v61 = vld [vmem:[#allocation2 + $0x1158] sm:$0xff] }
  0xbe   :  { %1377 = vmatpush1.msra.mxu0 %v80_v62  ;;  %1448 = vmatpush1.msra.mxu1 %v82_v0  ;;  %v592_v62 = vld [vmem:[#allocation2 + $0x1140] sm:$0xff]  ;;  %v594_v0 = vld [vmem:[#allocation2 + $0x1150] sm:$0xff] }
  0xbf   :  { %1378 = vmatprep.subr.mxu0 %v49_v2  ;;  %1449 = vmatprep.subr.mxu1 %v51_v3  ;;  %v561_v2 = vld [vmem:[#allocation2 + $0x1048] sm:$0xff]  ;;  %v563_v3 = vld [vmem:[#allocation2 + $0x1058] sm:$0xff] }
  0xc0   :  { %1379 = vmatpush1.msra.mxu0 %v48_v4  ;;  %1450 = vmatpush1.msra.mxu1 %v50_v5  ;;  %v560_v4 = vld [vmem:[#allocation2 + $0x1040] sm:$0xff]  ;;  %v562_v5 = vld [vmem:[#allocation2 + $0x1050] sm:$0xff] }
  0xc1   :  { %1380 = vmatprep.subr.mxu0 %v1041_v6  ;;  %1451 = vmatprep.subr.mxu1 %v1043_v7  ;;  %v2363_v6 = vld [vmem:[#allocation5 + $0x8] sm:$0xff] }
  0xc2   :  { %1381 = vmatpush2.msra.mxu0 %v1040_v8  ;;  %1452 = vmatpush2.msra.mxu1 %v1042_v9  ;;  %v533_v7 = vld [vmem:[#allocation2 + $0xf68] sm:$0xff]  ;;  %v535_v8 = vld [vmem:[#allocation2 + $0xf78] sm:$0xff]  ;;  %v532_v9 = vld [vmem:[#allocation2 + $0xf60] sm:$0xff] }
  0xc3   :  { %1382 = vmatprep.subr.mxu0 %v1009_v10  ;;  %1453 = vmatprep.subr.mxu1 %v1011_v11  ;;  %v534_v10 = vld [vmem:[#allocation2 + $0xf70] sm:$0xff]  ;;  %v2367_v11 = vld [vmem:[#allocation5] sm:$0xff] }
  0xc4   :  { %1383 = vmatpush2.msra.mxu0 %v1008_v12  ;;  %1454 = vmatpush2.msra.mxu1 %v1010_v13  ;;  %v501_v12 = vld [vmem:[#allocation2 + $0xe68] sm:$0xff]  ;;  %v503_v13 = vld [vmem:[#allocation2 + $0xe78] sm:$0xff] }
  0xc5   :  { %1384 = vmatprep.subr.mxu0 %v977_v14  ;;  %1455 = vmatprep.subr.mxu1 %v979_v15  ;;  %v500_v14 = vld [vmem:[#allocation2 + $0xe60] sm:$0xff]  ;;  %v502_v15 = vld [vmem:[#allocation2 + $0xe70] sm:$0xff] }
  0xc6   :  { %1385 = vmatpush2.msra.mxu0 %v976_v16  ;;  %1456 = vmatpush2.msra.mxu1 %v978_v63  ;;  %v469_v16 = vld [vmem:[#allocation2 + $0xd68] sm:$0xff]  ;;  %v471_v63 = vld [vmem:[#allocation2 + $0xd78] sm:$0xff] }
  0xc7   :  { %1386 = vmatprep.subr.mxu0 %v945_v17  ;;  %1457 = vmatprep.subr.mxu1 %v947_v18  ;;  %v468_v17 = vld [vmem:[#allocation2 + $0xd60] sm:$0xff]  ;;  %v470_v18 = vld [vmem:[#allocation2 + $0xd70] sm:$0xff] }
  0xc8   :  { %1387 = vmatpush2.msra.mxu0 %v944_v1  ;;  %1458 = vmatpush2.msra.mxu1 %v946_v19  ;;  %v437_v1 = vld [vmem:[#allocation2 + $0xc68] sm:$0xff]  ;;  %v439_v19 = vld [vmem:[#allocation2 + $0xc78] sm:$0xff] }
  0xc9   :  { %1388 = vmatprep.subr.mxu0 %v913_v20  ;;  %1459 = vmatprep.subr.mxu1 %v915_v21  ;;  %v436_v20 = vld [vmem:[#allocation2 + $0xc60] sm:$0xff]  ;;  %v438_v21 = vld [vmem:[#allocation2 + $0xc70] sm:$0xff] }
  0xca   :  { %1389 = vmatpush2.msra.mxu0 %v912_v22  ;;  %1460 = vmatpush2.msra.mxu1 %v914_v23  ;;  %v405_v22 = vld [vmem:[#allocation2 + $0xb68] sm:$0xff]  ;;  %v407_v23 = vld [vmem:[#allocation2 + $0xb78] sm:$0xff] }
  0xcb   :  { %1390 = vmatprep.subr.mxu0 %v881_v24  ;;  %1461 = vmatprep.subr.mxu1 %v883_v25  ;;  %v404_v24 = vld [vmem:[#allocation2 + $0xb60] sm:$0xff]  ;;  %v406_v25 = vld [vmem:[#allocation2 + $0xb70] sm:$0xff] }
  0xcc   :  { %1391 = vmatpush2.msra.mxu0 %v880_v26  ;;  %1462 = vmatpush2.msra.mxu1 %v882_v27  ;;  %v373_v26 = vld [vmem:[#allocation2 + $0xa68] sm:$0xff]  ;;  %v375_v27 = vld [vmem:[#allocation2 + $0xa78] sm:$0xff] }
  0xcd   :  { %1392 = vmatprep.subr.mxu0 %v849_v28  ;;  %1463 = vmatprep.subr.mxu1 %v851_v29  ;;  %v372_v28 = vld [vmem:[#allocation2 + $0xa60] sm:$0xff]  ;;  %v374_v29 = vld [vmem:[#allocation2 + $0xa70] sm:$0xff] }
  0xce   :  { %1393 = vmatpush2.msra.mxu0 %v848_v30  ;;  %1464 = vmatpush2.msra.mxu1 %v850_v31  ;;  %v341_v30 = vld [vmem:[#allocation2 + $0x968] sm:$0xff]  ;;  %v343_v31 = vld [vmem:[#allocation2 + $0x978] sm:$0xff] }
  0xcf   :  { %1394 = vmatprep.subr.mxu0 %v817_v32  ;;  %1465 = vmatprep.subr.mxu1 %v819_v33  ;;  %v340_v32 = vld [vmem:[#allocation2 + $0x960] sm:$0xff]  ;;  %v342_v33 = vld [vmem:[#allocation2 + $0x970] sm:$0xff] }
  0xd0   :  { %1395 = vmatpush2.msra.mxu0 %v816_v34  ;;  %1466 = vmatpush2.msra.mxu1 %v818_v35  ;;  %v309_v34 = vld [vmem:[#allocation2 + $0x868] sm:$0xff]  ;;  %v311_v35 = vld [vmem:[#allocation2 + $0x878] sm:$0xff] }
  0xd1   :  { %1396 = vmatprep.subr.mxu0 %v785_v36  ;;  %1467 = vmatprep.subr.mxu1 %v787_v37  ;;  %v308_v36 = vld [vmem:[#allocation2 + $0x860] sm:$0xff]  ;;  %v310_v37 = vld [vmem:[#allocation2 + $0x870] sm:$0xff] }
  0xd2   :  { %1397 = vmatpush2.msra.mxu0 %v784_v38  ;;  %1468 = vmatpush2.msra.mxu1 %v786_v39  ;;  %v277_v38 = vld [vmem:[#allocation2 + $0x768] sm:$0xff]  ;;  %v279_v39 = vld [vmem:[#allocation2 + $0x778] sm:$0xff] }
  0xd3   :  { %1398 = vmatprep.subr.mxu0 %v753_v40  ;;  %1469 = vmatprep.subr.mxu1 %v755_v41  ;;  %v276_v40 = vld [vmem:[#allocation2 + $0x760] sm:$0xff]  ;;  %v278_v41 = vld [vmem:[#allocation2 + $0x770] sm:$0xff] }
  0xd4   :  { %1399 = vmatpush2.msra.mxu0 %v752_v42  ;;  %1470 = vmatpush2.msra.mxu1 %v754_v43  ;;  %v245_v42 = vld [vmem:[#allocation2 + $0x668] sm:$0xff]  ;;  %v247_v43 = vld [vmem:[#allocation2 + $0x678] sm:$0xff] }
  0xd5   :  { %1400 = vmatprep.subr.mxu0 %v721_v44  ;;  %1471 = vmatprep.subr.mxu1 %v723_v45  ;;  %v244_v44 = vld [vmem:[#allocation2 + $0x660] sm:$0xff]  ;;  %v246_v45 = vld [vmem:[#allocation2 + $0x670] sm:$0xff] }
  0xd6   :  { %1401 = vmatpush2.msra.mxu0 %v720_v46  ;;  %1472 = vmatpush2.msra.mxu1 %v722_v47  ;;  %v213_v46 = vld [vmem:[#allocation2 + $0x568] sm:$0xff]  ;;  %v215_v47 = vld [vmem:[#allocation2 + $0x578] sm:$0xff] }
  0xd7   :  { %1402 = vmatprep.subr.mxu0 %v689_v48  ;;  %1473 = vmatprep.subr.mxu1 %v691_v49  ;;  %v212_v48 = vld [vmem:[#allocation2 + $0x560] sm:$0xff]  ;;  %v214_v49 = vld [vmem:[#allocation2 + $0x570] sm:$0xff] }
  0xd8   :  { %1403 = vmatpush2.msra.mxu0 %v688_v50  ;;  %1474 = vmatpush2.msra.mxu1 %v690_v51  ;;  %v181_v50 = vld [vmem:[#allocation2 + $0x468] sm:$0xff]  ;;  %v183_v51 = vld [vmem:[#allocation2 + $0x478] sm:$0xff] }
  0xd9   :  { %1404 = vmatprep.subr.mxu0 %v657_v52  ;;  %1475 = vmatprep.subr.mxu1 %v659_v53  ;;  %v180_v52 = vld [vmem:[#allocation2 + $0x460] sm:$0xff]  ;;  %v182_v53 = vld [vmem:[#allocation2 + $0x470] sm:$0xff] }
  0xda   :  { %1405 = vmatpush2.msra.mxu0 %v656_v54  ;;  %1476 = vmatpush2.msra.mxu1 %v658_v55  ;;  %v149_v54 = vld [vmem:[#allocation2 + $0x368] sm:$0xff]  ;;  %v151_v55 = vld [vmem:[#allocation2 + $0x378] sm:$0xff] }
  0xdb   :  { %1406 = vmatprep.subr.mxu0 %v625_v56  ;;  %1477 = vmatprep.subr.mxu1 %v627_v57  ;;  %v148_v56 = vld [vmem:[#allocation2 + $0x360] sm:$0xff]  ;;  %v150_v57 = vld [vmem:[#allocation2 + $0x370] sm:$0xff] }
  0xdc   :  { %1407 = vmatpush2.msra.mxu0 %v624_v58  ;;  %1478 = vmatpush2.msra.mxu1 %v626_v59  ;;  %v117_v58 = vld [vmem:[#allocation2 + $0x268] sm:$0xff]  ;;  %v119_v59 = vld [vmem:[#allocation2 + $0x278] sm:$0xff] }
  0xdd   :  { %1408 = vmatprep.subr.mxu0 %v593_v60  ;;  %1479 = vmatprep.subr.mxu1 %v595_v61  ;;  %v116_v60 = vld [vmem:[#allocation2 + $0x260] sm:$0xff]  ;;  %v118_v61 = vld [vmem:[#allocation2 + $0x270] sm:$0xff] }
  0xde   :  { %1409 = vmatpush2.msra.mxu0 %v592_v62  ;;  %1480 = vmatpush2.msra.mxu1 %v594_v0  ;;  %v85_v62 = vld [vmem:[#allocation2 + $0x168] sm:$0xff]  ;;  %v87_v0 = vld [vmem:[#allocation2 + $0x178] sm:$0xff] }
  0xdf   :  { %1410 = vmatprep.subr.mxu0 %v561_v2  ;;  %1481 = vmatprep.subr.mxu1 %v563_v3  ;;  %v84_v2 = vld [vmem:[#allocation2 + $0x160] sm:$0xff]  ;;  %v86_v3 = vld [vmem:[#allocation2 + $0x170] sm:$0xff] }
  0xe0   :  { %1411 = vmatpush2.msra.mxu0 %v560_v4  ;;  %1412 = vmatprep.mubr.f32.mxu0 %v2363_v6  ;;  %v53_v4 = vld [vmem:[#allocation2 + $0x68] sm:$0xff] }
  0xe1   :  { %1482 = vmatpush2.msra.mxu1 %v562_v5  ;;  %1483 = vmatprep.mubr.f32.mxu1 %v2363_v6  ;;  %v55_v5 = vld [vmem:[#allocation2 + $0x78] sm:$0xff] }
  0xe2   :  { %1413 = vmatmul.mubr.f32.vlgmr.msra.gmra.mxu0 %v2367_v11  ;;  %1484 = vmatmul.mubr.f32.vlgmr.msra.gmra.mxu1 %v2367_v11 }
  0xe3   :  { %1490 = vmatprep.subr.mxu0 %v533_v7  ;;  %1561 = vmatprep.subr.mxu1 %v535_v8  ;;  %v52_v7 = vld [vmem:[#allocation2 + $0x60] sm:$0xff]  ;;  %v54_v8 = vld [vmem:[#allocation2 + $0x70] sm:$0xff] }
  0xe4   :  { %1491 = vmatpush1.msra.mxu0 %v532_v9  ;;  %1562 = vmatpush1.msra.mxu1 %v534_v10  ;;  %v1045_v9 = vld [vmem:[#allocation2 + $0x1f68] sm:$0xff]  ;;  %v1047_v10 = vld [vmem:[#allocation2 + $0x1f78] sm:$0xff] }
  0xe5   :  { %1492 = vmatprep.subr.mxu0 %v501_v12  ;;  %1563 = vmatprep.subr.mxu1 %v503_v13  ;;  %v1044_v12 = vld [vmem:[#allocation2 + $0x1f60] sm:$0xff]  ;;  %v1046_v13 = vld [vmem:[#allocation2 + $0x1f70] sm:$0xff] }
  0xe6   :  { %1493 = vmatpush1.msra.mxu0 %v500_v14  ;;  %1564 = vmatpush1.msra.mxu1 %v502_v15  ;;  %v1013_v14 = vld [vmem:[#allocation2 + $0x1e68] sm:$0xff]  ;;  %v1015_v15 = vld [vmem:[#allocation2 + $0x1e78] sm:$0xff] }
  0xe7   :  { %1494 = vmatprep.subr.mxu0 %v469_v16  ;;  %1565 = vmatprep.subr.mxu1 %v471_v63  ;;  %v1012_v16 = vld [vmem:[#allocation2 + $0x1e60] sm:$0xff]  ;;  %v1014_v63 = vld [vmem:[#allocation2 + $0x1e70] sm:$0xff] }
  0xe8   :  { %1495 = vmatpush1.msra.mxu0 %v468_v17  ;;  %1566 = vmatpush1.msra.mxu1 %v470_v18  ;;  %v981_v17 = vld [vmem:[#allocation2 + $0x1d68] sm:$0xff]  ;;  %v983_v18 = vld [vmem:[#allocation2 + $0x1d78] sm:$0xff] }
  0xe9   :  { %1496 = vmatprep.subr.mxu0 %v437_v1  ;;  %1567 = vmatprep.subr.mxu1 %v439_v19  ;;  %v980_v1 = vld [vmem:[#allocation2 + $0x1d60] sm:$0xff]  ;;  %v982_v19 = vld [vmem:[#allocation2 + $0x1d70] sm:$0xff] }
  0xea   :  { %1497 = vmatpush1.msra.mxu0 %v436_v20  ;;  %1568 = vmatpush1.msra.mxu1 %v438_v21  ;;  %v949_v20 = vld [vmem:[#allocation2 + $0x1c68] sm:$0xff]  ;;  %v951_v21 = vld [vmem:[#allocation2 + $0x1c78] sm:$0xff] }
  0xeb   :  { %1498 = vmatprep.subr.mxu0 %v405_v22  ;;  %1569 = vmatprep.subr.mxu1 %v407_v23  ;;  %v948_v22 = vld [vmem:[#allocation2 + $0x1c60] sm:$0xff]  ;;  %v950_v23 = vld [vmem:[#allocation2 + $0x1c70] sm:$0xff] }
  0xec   :  { %1499 = vmatpush1.msra.mxu0 %v404_v24  ;;  %1570 = vmatpush1.msra.mxu1 %v406_v25  ;;  %v917_v24 = vld [vmem:[#allocation2 + $0x1b68] sm:$0xff]  ;;  %v919_v25 = vld [vmem:[#allocation2 + $0x1b78] sm:$0xff] }
  0xed   :  { %1500 = vmatprep.subr.mxu0 %v373_v26  ;;  %1571 = vmatprep.subr.mxu1 %v375_v27  ;;  %v916_v26 = vld [vmem:[#allocation2 + $0x1b60] sm:$0xff]  ;;  %v918_v27 = vld [vmem:[#allocation2 + $0x1b70] sm:$0xff] }
  0xee   :  { %1501 = vmatpush1.msra.mxu0 %v372_v28  ;;  %1572 = vmatpush1.msra.mxu1 %v374_v29  ;;  %v885_v28 = vld [vmem:[#allocation2 + $0x1a68] sm:$0xff]  ;;  %v887_v29 = vld [vmem:[#allocation2 + $0x1a78] sm:$0xff] }
  0xef   :  { %1502 = vmatprep.subr.mxu0 %v341_v30  ;;  %1573 = vmatprep.subr.mxu1 %v343_v31  ;;  %v884_v30 = vld [vmem:[#allocation2 + $0x1a60] sm:$0xff]  ;;  %v886_v31 = vld [vmem:[#allocation2 + $0x1a70] sm:$0xff] }
  0xf0   :  { %1503 = vmatpush1.msra.mxu0 %v340_v32  ;;  %1574 = vmatpush1.msra.mxu1 %v342_v33  ;;  %v853_v32 = vld [vmem:[#allocation2 + $0x1968] sm:$0xff]  ;;  %v855_v33 = vld [vmem:[#allocation2 + $0x1978] sm:$0xff] }
  0xf1   :  { %1504 = vmatprep.subr.mxu0 %v309_v34  ;;  %1575 = vmatprep.subr.mxu1 %v311_v35  ;;  %v852_v34 = vld [vmem:[#allocation2 + $0x1960] sm:$0xff]  ;;  %v854_v35 = vld [vmem:[#allocation2 + $0x1970] sm:$0xff] }
  0xf2   :  { %1505 = vmatpush1.msra.mxu0 %v308_v36  ;;  %1576 = vmatpush1.msra.mxu1 %v310_v37  ;;  %v821_v36 = vld [vmem:[#allocation2 + $0x1868] sm:$0xff]  ;;  %v823_v37 = vld [vmem:[#allocation2 + $0x1878] sm:$0xff] }
  0xf3   :  { %1506 = vmatprep.subr.mxu0 %v277_v38  ;;  %1577 = vmatprep.subr.mxu1 %v279_v39  ;;  %v820_v38 = vld [vmem:[#allocation2 + $0x1860] sm:$0xff]  ;;  %v822_v39 = vld [vmem:[#allocation2 + $0x1870] sm:$0xff] }
  0xf4   :  { %1507 = vmatpush1.msra.mxu0 %v276_v40  ;;  %1578 = vmatpush1.msra.mxu1 %v278_v41  ;;  %v789_v40 = vld [vmem:[#allocation2 + $0x1768] sm:$0xff]  ;;  %v791_v41 = vld [vmem:[#allocation2 + $0x1778] sm:$0xff] }
  0xf5   :  { %1508 = vmatprep.subr.mxu0 %v245_v42  ;;  %1579 = vmatprep.subr.mxu1 %v247_v43  ;;  %v788_v42 = vld [vmem:[#allocation2 + $0x1760] sm:$0xff]  ;;  %v790_v43 = vld [vmem:[#allocation2 + $0x1770] sm:$0xff] }
  0xf6   :  { %1509 = vmatpush1.msra.mxu0 %v244_v44  ;;  %1580 = vmatpush1.msra.mxu1 %v246_v45  ;;  %v757_v44 = vld [vmem:[#allocation2 + $0x1668] sm:$0xff]  ;;  %v759_v45 = vld [vmem:[#allocation2 + $0x1678] sm:$0xff] }
  0xf7   :  { %1510 = vmatprep.subr.mxu0 %v213_v46  ;;  %1581 = vmatprep.subr.mxu1 %v215_v47  ;;  %v756_v46 = vld [vmem:[#allocation2 + $0x1660] sm:$0xff]  ;;  %v758_v47 = vld [vmem:[#allocation2 + $0x1670] sm:$0xff] }
  0xf8   :  { %1511 = vmatpush1.msra.mxu0 %v212_v48  ;;  %1582 = vmatpush1.msra.mxu1 %v214_v49  ;;  %v725_v48 = vld [vmem:[#allocation2 + $0x1568] sm:$0xff]  ;;  %v727_v49 = vld [vmem:[#allocation2 + $0x1578] sm:$0xff] }
  0xf9   :  { %1512 = vmatprep.subr.mxu0 %v181_v50  ;;  %1583 = vmatprep.subr.mxu1 %v183_v51  ;;  %v724_v50 = vld [vmem:[#allocation2 + $0x1560] sm:$0xff]  ;;  %v726_v51 = vld [vmem:[#allocation2 + $0x1570] sm:$0xff] }
  0xfa   :  { %1513 = vmatpush1.msra.mxu0 %v180_v52  ;;  %1584 = vmatpush1.msra.mxu1 %v182_v53  ;;  %v693_v52 = vld [vmem:[#allocation2 + $0x1468] sm:$0xff]  ;;  %v695_v53 = vld [vmem:[#allocation2 + $0x1478] sm:$0xff] }
  0xfb   :  { %1514 = vmatprep.subr.mxu0 %v149_v54  ;;  %1585 = vmatprep.subr.mxu1 %v151_v55  ;;  %v692_v54 = vld [vmem:[#allocation2 + $0x1460] sm:$0xff]  ;;  %v694_v55 = vld [vmem:[#allocation2 + $0x1470] sm:$0xff] }
  0xfc   :  { %1515 = vmatpush1.msra.mxu0 %v148_v56  ;;  %1586 = vmatpush1.msra.mxu1 %v150_v57  ;;  %v661_v56 = vld [vmem:[#allocation2 + $0x1368] sm:$0xff]  ;;  %v663_v57 = vld [vmem:[#allocation2 + $0x1378] sm:$0xff] }
  0xfd   :  { %1516 = vmatprep.subr.mxu0 %v117_v58  ;;  %1587 = vmatprep.subr.mxu1 %v119_v59  ;;  %v660_v58 = vld [vmem:[#allocation2 + $0x1360] sm:$0xff]  ;;  %v662_v59 = vld [vmem:[#allocation2 + $0x1370] sm:$0xff] }
  0xfe   :  { %1517 = vmatpush1.msra.mxu0 %v116_v60  ;;  %1588 = vmatpush1.msra.mxu1 %v118_v61  ;;  %v629_v60 = vld [vmem:[#allocation2 + $0x1268] sm:$0xff]  ;;  %v631_v61 = vld [vmem:[#allocation2 + $0x1278] sm:$0xff] }
  0xff   :  { %1518 = vmatprep.subr.mxu0 %v85_v62  ;;  %1589 = vmatprep.subr.mxu1 %v87_v0  ;;  %v628_v62 = vld [vmem:[#allocation2 + $0x1260] sm:$0xff]  ;;  %v630_v0 = vld [vmem:[#allocation2 + $0x1270] sm:$0xff] }
 0x100   :  { %1519 = vmatpush1.msra.mxu0 %v84_v2  ;;  %1590 = vmatpush1.msra.mxu1 %v86_v3  ;;  %v597_v2 = vld [vmem:[#allocation2 + $0x1168] sm:$0xff]  ;;  %v599_v3 = vld [vmem:[#allocation2 + $0x1178] sm:$0xff] }
 0x101   :  { %1520 = vmatprep.subr.mxu0 %v53_v4  ;;  %1591 = vmatprep.subr.mxu1 %v55_v5  ;;  %v596_v4 = vld [vmem:[#allocation2 + $0x1160] sm:$0xff]  ;;  %v598_v5 = vld [vmem:[#allocation2 + $0x1170] sm:$0xff] }
 0x102   :  { %1521 = vmatpush1.msra.mxu0 %v52_v7  ;;  %1592 = vmatpush1.msra.mxu1 %v54_v8  ;;  %v565_v7 = vld [vmem:[#allocation2 + $0x1068] sm:$0xff]  ;;  %v567_v8 = vld [vmem:[#allocation2 + $0x1078] sm:$0xff] }
 0x103   :  { %1522 = vmatprep.subr.mxu0 %v1045_v9  ;;  %1593 = vmatprep.subr.mxu1 %v1047_v10 }
 0x104   :  { %1523 = vmatpush2.msra.mxu0 %v1044_v12  ;;  %1594 = vmatpush2.msra.mxu1 %v1046_v13  ;;  %v564_v12 = vld [vmem:[#allocation2 + $0x1060] sm:$0xff]  ;;  %v566_v13 = vld [vmem:[#allocation2 + $0x1070] sm:$0xff] }
 0x105   :  { %1524 = vmatprep.subr.mxu0 %v1013_v14  ;;  %1595 = vmatprep.subr.mxu1 %v1015_v15 }
 0x106   :  { %1525 = vmatpush2.msra.mxu0 %v1012_v16  ;;  %1596 = vmatpush2.msra.mxu1 %v1014_v63  ;;  %v537_v16 = vld [vmem:[#allocation2 + $0xf88] sm:$0xff]  ;;  %v539_v63 = vld [vmem:[#allocation2 + $0xf98] sm:$0xff] }
 0x107   :  { %1526 = vmatprep.subr.mxu0 %v981_v17  ;;  %1597 = vmatprep.subr.mxu1 %v983_v18  ;;  %v536_v17 = vld [vmem:[#allocation2 + $0xf80] sm:$0xff]  ;;  %v538_v18 = vld [vmem:[#allocation2 + $0xf90] sm:$0xff] }
 0x108   :  { %1527 = vmatpush2.msra.mxu0 %v980_v1  ;;  %1598 = vmatpush2.msra.mxu1 %v982_v19  ;;  %v505_v1 = vld [vmem:[#allocation2 + $0xe88] sm:$0xff]  ;;  %v507_v19 = vld [vmem:[#allocation2 + $0xe98] sm:$0xff] }
 0x109   :  { %1528 = vmatprep.subr.mxu0 %v949_v20  ;;  %1599 = vmatprep.subr.mxu1 %v951_v21  ;;  %v504_v20 = vld [vmem:[#allocation2 + $0xe80] sm:$0xff]  ;;  %v506_v21 = vld [vmem:[#allocation2 + $0xe90] sm:$0xff] }
 0x10a   :  { %1529 = vmatpush2.msra.mxu0 %v948_v22  ;;  %1600 = vmatpush2.msra.mxu1 %v950_v23  ;;  %v473_v22 = vld [vmem:[#allocation2 + $0xd88] sm:$0xff]  ;;  %v475_v23 = vld [vmem:[#allocation2 + $0xd98] sm:$0xff] }
 0x10b   :  { %1530 = vmatprep.subr.mxu0 %v917_v24  ;;  %1601 = vmatprep.subr.mxu1 %v919_v25  ;;  %v472_v24 = vld [vmem:[#allocation2 + $0xd80] sm:$0xff]  ;;  %v441_v25 = vld [vmem:[#allocation2 + $0xc88] sm:$0xff] }
 0x10c   :  { %1531 = vmatpush2.msra.mxu0 %v916_v26  ;;  %1602 = vmatpush2.msra.mxu1 %v918_v27  ;;  %v443_v26 = vld [vmem:[#allocation2 + $0xc98] sm:$0xff]  ;;  %v442_v27 = vld [vmem:[#allocation2 + $0xc90] sm:$0xff] }
 0x10d   :  { %1532 = vmatprep.subr.mxu0 %v885_v28  ;;  %1603 = vmatprep.subr.mxu1 %v887_v29  ;;  %v409_v28 = vld [vmem:[#allocation2 + $0xb88] sm:$0xff]  ;;  %v411_v29 = vld [vmem:[#allocation2 + $0xb98] sm:$0xff] }
 0x10e   :  { %1533 = vmatpush2.msra.mxu0 %v884_v30  ;;  %1604 = vmatpush2.msra.mxu1 %v886_v31  ;;  %v408_v30 = vld [vmem:[#allocation2 + $0xb80] sm:$0xff]  ;;  %v410_v31 = vld [vmem:[#allocation2 + $0xb90] sm:$0xff] }
 0x10f   :  { %1534 = vmatprep.subr.mxu0 %v853_v32  ;;  %1605 = vmatprep.subr.mxu1 %v855_v33  ;;  %v377_v32 = vld [vmem:[#allocation2 + $0xa88] sm:$0xff]  ;;  %v379_v33 = vld [vmem:[#allocation2 + $0xa98] sm:$0xff] }
 0x110   :  { %1535 = vmatpush2.msra.mxu0 %v852_v34  ;;  %1606 = vmatpush2.msra.mxu1 %v854_v35  ;;  %v376_v34 = vld [vmem:[#allocation2 + $0xa80] sm:$0xff]  ;;  %v378_v35 = vld [vmem:[#allocation2 + $0xa90] sm:$0xff] }
 0x111   :  { %1536 = vmatprep.subr.mxu0 %v821_v36  ;;  %1607 = vmatprep.subr.mxu1 %v823_v37  ;;  %v345_v36 = vld [vmem:[#allocation2 + $0x988] sm:$0xff]  ;;  %v347_v37 = vld [vmem:[#allocation2 + $0x998] sm:$0xff] }
 0x112   :  { %1537 = vmatpush2.msra.mxu0 %v820_v38  ;;  %1608 = vmatpush2.msra.mxu1 %v822_v39  ;;  %v344_v38 = vld [vmem:[#allocation2 + $0x980] sm:$0xff]  ;;  %v346_v39 = vld [vmem:[#allocation2 + $0x990] sm:$0xff] }
 0x113   :  { %1538 = vmatprep.subr.mxu0 %v789_v40  ;;  %1609 = vmatprep.subr.mxu1 %v791_v41  ;;  %v313_v40 = vld [vmem:[#allocation2 + $0x888] sm:$0xff]  ;;  %v315_v41 = vld [vmem:[#allocation2 + $0x898] sm:$0xff] }
 0x114   :  { %1539 = vmatpush2.msra.mxu0 %v788_v42  ;;  %1610 = vmatpush2.msra.mxu1 %v790_v43  ;;  %v312_v42 = vld [vmem:[#allocation2 + $0x880] sm:$0xff]  ;;  %v314_v43 = vld [vmem:[#allocation2 + $0x890] sm:$0xff] }
 0x115   :  { %1540 = vmatprep.subr.mxu0 %v757_v44  ;;  %1611 = vmatprep.subr.mxu1 %v759_v45  ;;  %v281_v44 = vld [vmem:[#allocation2 + $0x788] sm:$0xff]  ;;  %v283_v45 = vld [vmem:[#allocation2 + $0x798] sm:$0xff] }
 0x116   :  { %1541 = vmatpush2.msra.mxu0 %v756_v46  ;;  %1612 = vmatpush2.msra.mxu1 %v758_v47  ;;  %v280_v46 = vld [vmem:[#allocation2 + $0x780] sm:$0xff]  ;;  %v282_v47 = vld [vmem:[#allocation2 + $0x790] sm:$0xff] }
 0x117   :  { %1542 = vmatprep.subr.mxu0 %v725_v48  ;;  %1613 = vmatprep.subr.mxu1 %v727_v49  ;;  %v249_v48 = vld [vmem:[#allocation2 + $0x688] sm:$0xff]  ;;  %v251_v49 = vld [vmem:[#allocation2 + $0x698] sm:$0xff] }
 0x118   :  { %1543 = vmatpush2.msra.mxu0 %v724_v50  ;;  %1614 = vmatpush2.msra.mxu1 %v726_v51  ;;  %v248_v50 = vld [vmem:[#allocation2 + $0x680] sm:$0xff]  ;;  %v250_v51 = vld [vmem:[#allocation2 + $0x690] sm:$0xff] }
 0x119   :  { %1544 = vmatprep.subr.mxu0 %v693_v52  ;;  %1615 = vmatprep.subr.mxu1 %v695_v53  ;;  %v217_v52 = vld [vmem:[#allocation2 + $0x588] sm:$0xff]  ;;  %v219_v53 = vld [vmem:[#allocation2 + $0x598] sm:$0xff] }
 0x11a   :  { %1545 = vmatpush2.msra.mxu0 %v692_v54  ;;  %1616 = vmatpush2.msra.mxu1 %v694_v55  ;;  %v216_v54 = vld [vmem:[#allocation2 + $0x580] sm:$0xff]  ;;  %v218_v55 = vld [vmem:[#allocation2 + $0x590] sm:$0xff] }
 0x11b   :  { %1546 = vmatprep.subr.mxu0 %v661_v56  ;;  %1617 = vmatprep.subr.mxu1 %v663_v57  ;;  %v185_v56 = vld [vmem:[#allocation2 + $0x488] sm:$0xff]  ;;  %v187_v57 = vld [vmem:[#allocation2 + $0x498] sm:$0xff] }
 0x11c   :  { %1547 = vmatpush2.msra.mxu0 %v660_v58  ;;  %1618 = vmatpush2.msra.mxu1 %v662_v59  ;;  %v184_v58 = vld [vmem:[#allocation2 + $0x480] sm:$0xff]  ;;  %v186_v59 = vld [vmem:[#allocation2 + $0x490] sm:$0xff] }
 0x11d   :  { %1548 = vmatprep.subr.mxu0 %v629_v60  ;;  %1619 = vmatprep.subr.mxu1 %v631_v61  ;;  %v153_v60 = vld [vmem:[#allocation2 + $0x388] sm:$0xff]  ;;  %v155_v61 = vld [vmem:[#allocation2 + $0x398] sm:$0xff] }
 0x11e   :  { %1549 = vmatpush2.msra.mxu0 %v628_v62  ;;  %1620 = vmatpush2.msra.mxu1 %v630_v0  ;;  %v1130_v9 = vpop.f32.mrf.mxu0  ;;  %v1201_v10 = vpop.f32.mrf.mxu1  ;;  %v152_v62 = vld [vmem:[#allocation2 + $0x380] sm:$0xff]  ;;  %v154_v0 = vld [vmem:[#allocation2 + $0x390] sm:$0xff] }
 0x11f   :  { %1550 = vmatprep.subr.mxu0 %v597_v2  ;;  %1621 = vmatprep.subr.mxu1 %v599_v3  ;;  %2200 = vst [vmem:[#allocation7] sm:$0xff] %v1130_v9  ;;  %2202 = vst [vmem:[#allocation7 + $0x10] sm:$0xff] %v1201_v10  ;;  %v121_v2 = vld [vmem:[#allocation2 + $0x288] sm:$0xff]  ;;  %v123_v3 = vld [vmem:[#allocation2 + $0x298] sm:$0xff] }
 0x120   :  { %1551 = vmatpush2.msra.mxu0 %v596_v4  ;;  %1622 = vmatpush2.msra.mxu1 %v598_v5  ;;  %v1132_v14 = vpop.f32.mrf.mxu0  ;;  %v1203_v15 = vpop.f32.mrf.mxu1  ;;  %v120_v4 = vld [vmem:[#allocation2 + $0x280] sm:$0xff]  ;;  %v122_v5 = vld [vmem:[#allocation2 + $0x290] sm:$0xff] }
 0x121   :  { %1552 = vmatprep.subr.mxu0 %v565_v7  ;;  %1623 = vmatprep.subr.mxu1 %v567_v8  ;;  %2201 = vst [vmem:[#allocation7 + $0x8] sm:$0xff] %v1132_v14  ;;  %2203 = vst [vmem:[#allocation7 + $0x18] sm:$0xff] %v1203_v15  ;;  %v89_v7 = vld [vmem:[#allocation2 + $0x188] sm:$0xff]  ;;  %v91_v8 = vld [vmem:[#allocation2 + $0x198] sm:$0xff] }
 0x122   :  { %1553 = vmatpush2.msra.mxu0 %v564_v12  ;;  %1554 = vmatprep.mubr.f32.mxu0 %v2363_v6  ;;  %v88_v9 = vld [vmem:[#allocation2 + $0x180] sm:$0xff]  ;;  %v90_v10 = vld [vmem:[#allocation2 + $0x190] sm:$0xff]  ;;  %v57_v12 = vld [vmem:[#allocation2 + $0x88] sm:$0xff] }
 0x123   :  { %1624 = vmatpush2.msra.mxu1 %v566_v13  ;;  %1625 = vmatprep.mubr.f32.mxu1 %v2363_v6  ;;  %v474_v6 = vld [vmem:[#allocation2 + $0xd90] sm:$0xff]  ;;  %v59_v13 = vld [vmem:[#allocation2 + $0x98] sm:$0xff]  ;;  %v56_v14 = vld [vmem:[#allocation2 + $0x80] sm:$0xff] }
 0x124   :  { %1555 = vmatmul.mubr.f32.vlgmr.msra.gmra.mxu0 %v2367_v11  ;;  %1626 = vmatmul.mubr.f32.vlgmr.msra.gmra.mxu1 %v2367_v11  ;;  %v440_v11 = vld [vmem:[#allocation2 + $0xc80] sm:$0xff]  ;;  %v58_v15 = vld [vmem:[#allocation2 + $0x90] sm:$0xff] }
 0x125   :  { %1632 = vmatprep.subr.mxu0 %v537_v16  ;;  %1703 = vmatprep.subr.mxu1 %v539_v63  ;;  %v1049_v16 = vld [vmem:[#allocation2 + $0x1f88] sm:$0xff]  ;;  %v1051_v63 = vld [vmem:[#allocation2 + $0x1f98] sm:$0xff] }
 0x126   :  { %1633 = vmatpush1.msra.mxu0 %v536_v17  ;;  %1704 = vmatpush1.msra.mxu1 %v538_v18  ;;  %v1048_v17 = vld [vmem:[#allocation2 + $0x1f80] sm:$0xff]  ;;  %v1050_v18 = vld [vmem:[#allocation2 + $0x1f90] sm:$0xff] }
 0x127   :  { %1634 = vmatprep.subr.mxu0 %v505_v1  ;;  %1705 = vmatprep.subr.mxu1 %v507_v19  ;;  %v1017_v1 = vld [vmem:[#allocation2 + $0x1e88] sm:$0xff]  ;;  %v1019_v19 = vld [vmem:[#allocation2 + $0x1e98] sm:$0xff] }
 0x128   :  { %1635 = vmatpush1.msra.mxu0 %v504_v20  ;;  %1706 = vmatpush1.msra.mxu1 %v506_v21  ;;  %v1016_v20 = vld [vmem:[#allocation2 + $0x1e80] sm:$0xff]  ;;  %v1018_v21 = vld [vmem:[#allocation2 + $0x1e90] sm:$0xff] }
 0x129   :  { %1636 = vmatprep.subr.mxu0 %v473_v22  ;;  %1707 = vmatprep.subr.mxu1 %v475_v23  ;;  %v985_v22 = vld [vmem:[#allocation2 + $0x1d88] sm:$0xff]  ;;  %v987_v23 = vld [vmem:[#allocation2 + $0x1d98] sm:$0xff] }
 0x12a   :  { %1637 = vmatpush1.msra.mxu0 %v472_v24  ;;  %1708 = vmatpush1.msra.mxu1 %v474_v6  ;;  %v984_v24 = vld [vmem:[#allocation2 + $0x1d80] sm:$0xff]  ;;  %v986_v6 = vld [vmem:[#allocation2 + $0x1d90] sm:$0xff] }
 0x12b   :  { %1638 = vmatprep.subr.mxu0 %v441_v25  ;;  %1709 = vmatprep.subr.mxu1 %v443_v26  ;;  %v953_v25 = vld [vmem:[#allocation2 + $0x1c88] sm:$0xff]  ;;  %v955_v26 = vld [vmem:[#allocation2 + $0x1c98] sm:$0xff] }
 0x12c   :  { %1639 = vmatpush1.msra.mxu0 %v440_v11  ;;  %1710 = vmatpush1.msra.mxu1 %v442_v27  ;;  %v952_v11 = vld [vmem:[#allocation2 + $0x1c80] sm:$0xff]  ;;  %v954_v27 = vld [vmem:[#allocation2 + $0x1c90] sm:$0xff] }
 0x12d   :  { %1640 = vmatprep.subr.mxu0 %v409_v28  ;;  %1711 = vmatprep.subr.mxu1 %v411_v29  ;;  %v921_v28 = vld [vmem:[#allocation2 + $0x1b88] sm:$0xff]  ;;  %v923_v29 = vld [vmem:[#allocation2 + $0x1b98] sm:$0xff] }
 0x12e   :  { %1641 = vmatpush1.msra.mxu0 %v408_v30  ;;  %1712 = vmatpush1.msra.mxu1 %v410_v31  ;;  %v920_v30 = vld [vmem:[#allocation2 + $0x1b80] sm:$0xff]  ;;  %v922_v31 = vld [vmem:[#allocation2 + $0x1b90] sm:$0xff] }
 0x12f   :  { %1642 = vmatprep.subr.mxu0 %v377_v32  ;;  %1713 = vmatprep.subr.mxu1 %v379_v33  ;;  %v889_v32 = vld [vmem:[#allocation2 + $0x1a88] sm:$0xff]  ;;  %v891_v33 = vld [vmem:[#allocation2 + $0x1a98] sm:$0xff] }
 0x130   :  { %1643 = vmatpush1.msra.mxu0 %v376_v34  ;;  %1714 = vmatpush1.msra.mxu1 %v378_v35  ;;  %v888_v34 = vld [vmem:[#allocation2 + $0x1a80] sm:$0xff]  ;;  %v890_v35 = vld [vmem:[#allocation2 + $0x1a90] sm:$0xff] }
 0x131   :  { %1644 = vmatprep.subr.mxu0 %v345_v36  ;;  %1715 = vmatprep.subr.mxu1 %v347_v37  ;;  %v857_v36 = vld [vmem:[#allocation2 + $0x1988] sm:$0xff]  ;;  %v859_v37 = vld [vmem:[#allocation2 + $0x1998] sm:$0xff] }
 0x132   :  { %1645 = vmatpush1.msra.mxu0 %v344_v38  ;;  %1716 = vmatpush1.msra.mxu1 %v346_v39  ;;  %v856_v38 = vld [vmem:[#allocation2 + $0x1980] sm:$0xff]  ;;  %v858_v39 = vld [vmem:[#allocation2 + $0x1990] sm:$0xff] }
 0x133   :  { %1646 = vmatprep.subr.mxu0 %v313_v40  ;;  %1717 = vmatprep.subr.mxu1 %v315_v41  ;;  %v825_v40 = vld [vmem:[#allocation2 + $0x1888] sm:$0xff]  ;;  %v827_v41 = vld [vmem:[#allocation2 + $0x1898] sm:$0xff] }
 0x134   :  { %1647 = vmatpush1.msra.mxu0 %v312_v42  ;;  %1718 = vmatpush1.msra.mxu1 %v314_v43  ;;  %v824_v42 = vld [vmem:[#allocation2 + $0x1880] sm:$0xff]  ;;  %v826_v43 = vld [vmem:[#allocation2 + $0x1890] sm:$0xff] }
 0x135   :  { %1648 = vmatprep.subr.mxu0 %v281_v44  ;;  %1719 = vmatprep.subr.mxu1 %v283_v45  ;;  %v793_v44 = vld [vmem:[#allocation2 + $0x1788] sm:$0xff]  ;;  %v795_v45 = vld [vmem:[#allocation2 + $0x1798] sm:$0xff] }
 0x136   :  { %1649 = vmatpush1.msra.mxu0 %v280_v46  ;;  %1720 = vmatpush1.msra.mxu1 %v282_v47  ;;  %v792_v46 = vld [vmem:[#allocation2 + $0x1780] sm:$0xff]  ;;  %v794_v47 = vld [vmem:[#allocation2 + $0x1790] sm:$0xff] }
 0x137   :  { %1650 = vmatprep.subr.mxu0 %v249_v48  ;;  %1721 = vmatprep.subr.mxu1 %v251_v49  ;;  %v761_v48 = vld [vmem:[#allocation2 + $0x1688] sm:$0xff]  ;;  %v763_v49 = vld [vmem:[#allocation2 + $0x1698] sm:$0xff] }
 0x138   :  { %1651 = vmatpush1.msra.mxu0 %v248_v50  ;;  %1722 = vmatpush1.msra.mxu1 %v250_v51  ;;  %v760_v50 = vld [vmem:[#allocation2 + $0x1680] sm:$0xff]  ;;  %v762_v51 = vld [vmem:[#allocation2 + $0x1690] sm:$0xff] }
 0x139   :  { %1652 = vmatprep.subr.mxu0 %v217_v52  ;;  %1723 = vmatprep.subr.mxu1 %v219_v53  ;;  %v729_v52 = vld [vmem:[#allocation2 + $0x1588] sm:$0xff]  ;;  %v731_v53 = vld [vmem:[#allocation2 + $0x1598] sm:$0xff] }
 0x13a   :  { %1653 = vmatpush1.msra.mxu0 %v216_v54  ;;  %1724 = vmatpush1.msra.mxu1 %v218_v55  ;;  %v728_v54 = vld [vmem:[#allocation2 + $0x1580] sm:$0xff]  ;;  %v730_v55 = vld [vmem:[#allocation2 + $0x1590] sm:$0xff] }
 0x13b   :  { %1654 = vmatprep.subr.mxu0 %v185_v56  ;;  %1725 = vmatprep.subr.mxu1 %v187_v57  ;;  %v697_v56 = vld [vmem:[#allocation2 + $0x1488] sm:$0xff]  ;;  %v699_v57 = vld [vmem:[#allocation2 + $0x1498] sm:$0xff] }
 0x13c   :  { %1655 = vmatpush1.msra.mxu0 %v184_v58  ;;  %1726 = vmatpush1.msra.mxu1 %v186_v59  ;;  %v696_v58 = vld [vmem:[#allocation2 + $0x1480] sm:$0xff]  ;;  %v698_v59 = vld [vmem:[#allocation2 + $0x1490] sm:$0xff] }
 0x13d   :  { %1656 = vmatprep.subr.mxu0 %v153_v60  ;;  %1727 = vmatprep.subr.mxu1 %v155_v61  ;;  %v665_v60 = vld [vmem:[#allocation2 + $0x1388] sm:$0xff]  ;;  %v667_v61 = vld [vmem:[#allocation2 + $0x1398] sm:$0xff] }
 0x13e   :  { %1657 = vmatpush1.msra.mxu0 %v152_v62  ;;  %1728 = vmatpush1.msra.mxu1 %v154_v0  ;;  %v664_v62 = vld [vmem:[#allocation2 + $0x1380] sm:$0xff]  ;;  %v666_v0 = vld [vmem:[#allocation2 + $0x1390] sm:$0xff] }
 0x13f   :  { %1658 = vmatprep.subr.mxu0 %v121_v2  ;;  %1729 = vmatprep.subr.mxu1 %v123_v3  ;;  %v633_v2 = vld [vmem:[#allocation2 + $0x1288] sm:$0xff]  ;;  %v635_v3 = vld [vmem:[#allocation2 + $0x1298] sm:$0xff] }
 0x140   :  { %1659 = vmatpush1.msra.mxu0 %v120_v4  ;;  %1730 = vmatpush1.msra.mxu1 %v122_v5  ;;  %v632_v4 = vld [vmem:[#allocation2 + $0x1280] sm:$0xff]  ;;  %v634_v5 = vld [vmem:[#allocation2 + $0x1290] sm:$0xff] }
 0x141   :  { %1660 = vmatprep.subr.mxu0 %v89_v7  ;;  %1731 = vmatprep.subr.mxu1 %v91_v8  ;;  %v601_v7 = vld [vmem:[#allocation2 + $0x1188] sm:$0xff]  ;;  %v603_v8 = vld [vmem:[#allocation2 + $0x1198] sm:$0xff] }
 0x142   :  { %1661 = vmatpush1.msra.mxu0 %v88_v9  ;;  %1732 = vmatpush1.msra.mxu1 %v90_v10  ;;  %v600_v9 = vld [vmem:[#allocation2 + $0x1180] sm:$0xff]  ;;  %v602_v10 = vld [vmem:[#allocation2 + $0x1190] sm:$0xff] }
 0x143   :  { %1662 = vmatprep.subr.mxu0 %v57_v12  ;;  %1733 = vmatprep.subr.mxu1 %v59_v13  ;;  %v569_v12 = vld [vmem:[#allocation2 + $0x1088] sm:$0xff]  ;;  %v571_v13 = vld [vmem:[#allocation2 + $0x1098] sm:$0xff] }
 0x144   :  { %1663 = vmatpush1.msra.mxu0 %v56_v14  ;;  %1734 = vmatpush1.msra.mxu1 %v58_v15 }
 0x145   :  { %1664 = vmatprep.subr.mxu0 %v1049_v16  ;;  %1735 = vmatprep.subr.mxu1 %v1051_v63  ;;  %v568_v16 = vld [vmem:[#allocation2 + $0x1080] sm:$0xff]  ;;  %v570_v63 = vld [vmem:[#allocation2 + $0x1090] sm:$0xff] }
 0x146   :  { %1665 = vmatpush2.msra.mxu0 %v1048_v17  ;;  %1736 = vmatpush2.msra.mxu1 %v1050_v18 }
 0x147   :  { %1666 = vmatprep.subr.mxu0 %v1017_v1  ;;  %1737 = vmatprep.subr.mxu1 %v1019_v19  ;;  %v2375_v1 = vld [vmem:[#allocation5 + $0x8] sm:$0xff] }
 0x148   :  { %1667 = vmatpush2.msra.mxu0 %v1016_v20  ;;  %1738 = vmatpush2.msra.mxu1 %v1018_v21  ;;  %v541_v19 = vld [vmem:[#allocation2 + $0xfa8] sm:$0xff]  ;;  %v543_v20 = vld [vmem:[#allocation2 + $0xfb8] sm:$0xff]  ;;  %v540_v21 = vld [vmem:[#allocation2 + $0xfa0] sm:$0xff] }
 0x149   :  { %1668 = vmatprep.subr.mxu0 %v985_v22  ;;  %1739 = vmatprep.subr.mxu1 %v987_v23  ;;  %v542_v22 = vld [vmem:[#allocation2 + $0xfb0] sm:$0xff]  ;;  %v2379_v23 = vld [vmem:[#allocation5] sm:$0xff] }
 0x14a   :  { %1669 = vmatpush2.msra.mxu0 %v984_v24  ;;  %1740 = vmatpush2.msra.mxu1 %v986_v6  ;;  %v509_v24 = vld [vmem:[#allocation2 + $0xea8] sm:$0xff]  ;;  %v511_v6 = vld [vmem:[#allocation2 + $0xeb8] sm:$0xff] }
 0x14b   :  { %1670 = vmatprep.subr.mxu0 %v953_v25  ;;  %1741 = vmatprep.subr.mxu1 %v955_v26  ;;  %v508_v25 = vld [vmem:[#allocation2 + $0xea0] sm:$0xff]  ;;  %v510_v26 = vld [vmem:[#allocation2 + $0xeb0] sm:$0xff] }
 0x14c   :  { %1671 = vmatpush2.msra.mxu0 %v952_v11  ;;  %1742 = vmatpush2.msra.mxu1 %v954_v27  ;;  %v477_v11 = vld [vmem:[#allocation2 + $0xda8] sm:$0xff]  ;;  %v479_v27 = vld [vmem:[#allocation2 + $0xdb8] sm:$0xff] }
 0x14d   :  { %1672 = vmatprep.subr.mxu0 %v921_v28  ;;  %1743 = vmatprep.subr.mxu1 %v923_v29  ;;  %v476_v28 = vld [vmem:[#allocation2 + $0xda0] sm:$0xff]  ;;  %v478_v29 = vld [vmem:[#allocation2 + $0xdb0] sm:$0xff] }
 0x14e   :  { %1673 = vmatpush2.msra.mxu0 %v920_v30  ;;  %1744 = vmatpush2.msra.mxu1 %v922_v31  ;;  %v445_v30 = vld [vmem:[#allocation2 + $0xca8] sm:$0xff]  ;;  %v447_v31 = vld [vmem:[#allocation2 + $0xcb8] sm:$0xff] }
 0x14f   :  { %1674 = vmatprep.subr.mxu0 %v889_v32  ;;  %1745 = vmatprep.subr.mxu1 %v891_v33  ;;  %v444_v32 = vld [vmem:[#allocation2 + $0xca0] sm:$0xff]  ;;  %v446_v33 = vld [vmem:[#allocation2 + $0xcb0] sm:$0xff] }
 0x150   :  { %1675 = vmatpush2.msra.mxu0 %v888_v34  ;;  %1746 = vmatpush2.msra.mxu1 %v890_v35  ;;  %v413_v34 = vld [vmem:[#allocation2 + $0xba8] sm:$0xff]  ;;  %v415_v35 = vld [vmem:[#allocation2 + $0xbb8] sm:$0xff] }
 0x151   :  { %1676 = vmatprep.subr.mxu0 %v857_v36  ;;  %1747 = vmatprep.subr.mxu1 %v859_v37  ;;  %v412_v36 = vld [vmem:[#allocation2 + $0xba0] sm:$0xff]  ;;  %v414_v37 = vld [vmem:[#allocation2 + $0xbb0] sm:$0xff] }
 0x152   :  { %1677 = vmatpush2.msra.mxu0 %v856_v38  ;;  %1748 = vmatpush2.msra.mxu1 %v858_v39  ;;  %v381_v38 = vld [vmem:[#allocation2 + $0xaa8] sm:$0xff]  ;;  %v383_v39 = vld [vmem:[#allocation2 + $0xab8] sm:$0xff] }
 0x153   :  { %1678 = vmatprep.subr.mxu0 %v825_v40  ;;  %1749 = vmatprep.subr.mxu1 %v827_v41  ;;  %v380_v40 = vld [vmem:[#allocation2 + $0xaa0] sm:$0xff]  ;;  %v382_v41 = vld [vmem:[#allocation2 + $0xab0] sm:$0xff] }
 0x154   :  { %1679 = vmatpush2.msra.mxu0 %v824_v42  ;;  %1750 = vmatpush2.msra.mxu1 %v826_v43  ;;  %v349_v42 = vld [vmem:[#allocation2 + $0x9a8] sm:$0xff]  ;;  %v351_v43 = vld [vmem:[#allocation2 + $0x9b8] sm:$0xff] }
 0x155   :  { %1680 = vmatprep.subr.mxu0 %v793_v44  ;;  %1751 = vmatprep.subr.mxu1 %v795_v45  ;;  %v348_v44 = vld [vmem:[#allocation2 + $0x9a0] sm:$0xff]  ;;  %v350_v45 = vld [vmem:[#allocation2 + $0x9b0] sm:$0xff] }
 0x156   :  { %1681 = vmatpush2.msra.mxu0 %v792_v46  ;;  %1752 = vmatpush2.msra.mxu1 %v794_v47  ;;  %v317_v46 = vld [vmem:[#allocation2 + $0x8a8] sm:$0xff]  ;;  %v319_v47 = vld [vmem:[#allocation2 + $0x8b8] sm:$0xff] }
 0x157   :  { %1682 = vmatprep.subr.mxu0 %v761_v48  ;;  %1753 = vmatprep.subr.mxu1 %v763_v49  ;;  %v316_v48 = vld [vmem:[#allocation2 + $0x8a0] sm:$0xff]  ;;  %v318_v49 = vld [vmem:[#allocation2 + $0x8b0] sm:$0xff] }
 0x158   :  { %1683 = vmatpush2.msra.mxu0 %v760_v50  ;;  %1754 = vmatpush2.msra.mxu1 %v762_v51  ;;  %v285_v50 = vld [vmem:[#allocation2 + $0x7a8] sm:$0xff]  ;;  %v287_v51 = vld [vmem:[#allocation2 + $0x7b8] sm:$0xff] }
 0x159   :  { %1684 = vmatprep.subr.mxu0 %v729_v52  ;;  %1755 = vmatprep.subr.mxu1 %v731_v53  ;;  %v284_v52 = vld [vmem:[#allocation2 + $0x7a0] sm:$0xff]  ;;  %v286_v53 = vld [vmem:[#allocation2 + $0x7b0] sm:$0xff] }
 0x15a   :  { %1685 = vmatpush2.msra.mxu0 %v728_v54  ;;  %1756 = vmatpush2.msra.mxu1 %v730_v55  ;;  %v253_v54 = vld [vmem:[#allocation2 + $0x6a8] sm:$0xff]  ;;  %v255_v55 = vld [vmem:[#allocation2 + $0x6b8] sm:$0xff] }
 0x15b   :  { %1686 = vmatprep.subr.mxu0 %v697_v56  ;;  %1757 = vmatprep.subr.mxu1 %v699_v57  ;;  %v252_v56 = vld [vmem:[#allocation2 + $0x6a0] sm:$0xff]  ;;  %v254_v57 = vld [vmem:[#allocation2 + $0x6b0] sm:$0xff] }
 0x15c   :  { %1687 = vmatpush2.msra.mxu0 %v696_v58  ;;  %1758 = vmatpush2.msra.mxu1 %v698_v59  ;;  %v221_v58 = vld [vmem:[#allocation2 + $0x5a8] sm:$0xff]  ;;  %v223_v59 = vld [vmem:[#allocation2 + $0x5b8] sm:$0xff] }
 0x15d   :  { %1688 = vmatprep.subr.mxu0 %v665_v60  ;;  %1759 = vmatprep.subr.mxu1 %v667_v61  ;;  %v220_v60 = vld [vmem:[#allocation2 + $0x5a0] sm:$0xff]  ;;  %v222_v61 = vld [vmem:[#allocation2 + $0x5b0] sm:$0xff] }
 0x15e   :  { %1689 = vmatpush2.msra.mxu0 %v664_v62  ;;  %1760 = vmatpush2.msra.mxu1 %v666_v0  ;;  %v189_v62 = vld [vmem:[#allocation2 + $0x4a8] sm:$0xff]  ;;  %v191_v0 = vld [vmem:[#allocation2 + $0x4b8] sm:$0xff] }
 0x15f   :  { %1690 = vmatprep.subr.mxu0 %v633_v2  ;;  %1761 = vmatprep.subr.mxu1 %v635_v3  ;;  %v188_v2 = vld [vmem:[#allocation2 + $0x4a0] sm:$0xff]  ;;  %v190_v3 = vld [vmem:[#allocation2 + $0x4b0] sm:$0xff] }
 0x160   :  { %1691 = vmatpush2.msra.mxu0 %v632_v4  ;;  %1762 = vmatpush2.msra.mxu1 %v634_v5  ;;  %v1272_v14 = vpop.f32.mrf.mxu0  ;;  %v1343_v15 = vpop.f32.mrf.mxu1  ;;  %v157_v4 = vld [vmem:[#allocation2 + $0x3a8] sm:$0xff]  ;;  %v159_v5 = vld [vmem:[#allocation2 + $0x3b8] sm:$0xff] }
 0x161   :  { %1692 = vmatprep.subr.mxu0 %v601_v7  ;;  %1763 = vmatprep.subr.mxu1 %v603_v8  ;;  %2204 = vst [vmem:[#allocation7 + $0x20] sm:$0xff] %v1272_v14  ;;  %2206 = vst [vmem:[#allocation7 + $0x30] sm:$0xff] %v1343_v15  ;;  %v156_v7 = vld [vmem:[#allocation2 + $0x3a0] sm:$0xff]  ;;  %v158_v8 = vld [vmem:[#allocation2 + $0x3b0] sm:$0xff] }
 0x162   :  { %1693 = vmatpush2.msra.mxu0 %v600_v9  ;;  %1764 = vmatpush2.msra.mxu1 %v602_v10  ;;  %v1274_v17 = vpop.f32.mrf.mxu0  ;;  %v1345_v18 = vpop.f32.mrf.mxu1  ;;  %v125_v9 = vld [vmem:[#allocation2 + $0x2a8] sm:$0xff]  ;;  %v127_v10 = vld [vmem:[#allocation2 + $0x2b8] sm:$0xff] }
 0x163   :  { %1694 = vmatprep.subr.mxu0 %v569_v12  ;;  %1765 = vmatprep.subr.mxu1 %v571_v13  ;;  %2205 = vst [vmem:[#allocation7 + $0x28] sm:$0xff] %v1274_v17  ;;  %2207 = vst [vmem:[#allocation7 + $0x38] sm:$0xff] %v1345_v18  ;;  %v124_v12 = vld [vmem:[#allocation2 + $0x2a0] sm:$0xff]  ;;  %v126_v13 = vld [vmem:[#allocation2 + $0x2b0] sm:$0xff] }
 0x164   :  { %1695 = vmatpush2.msra.mxu0 %v568_v16  ;;  %1696 = vmatprep.mubr.f32.mxu0 %v2375_v1  ;;  %v93_v14 = vld [vmem:[#allocation2 + $0x1a8] sm:$0xff]  ;;  %v95_v15 = vld [vmem:[#allocation2 + $0x1b8] sm:$0xff]  ;;  %v92_v16 = vld [vmem:[#allocation2 + $0x1a0] sm:$0xff] }
 0x165   :  { %1766 = vmatpush2.msra.mxu1 %v570_v63  ;;  %1767 = vmatprep.mubr.f32.mxu1 %v2375_v1  ;;  %v94_v63 = vld [vmem:[#allocation2 + $0x1b0] sm:$0xff]  ;;  %v61_v17 = vld [vmem:[#allocation2 + $0xa8] sm:$0xff]  ;;  %v63_v18 = vld [vmem:[#allocation2 + $0xb8] sm:$0xff] }
 0x166   :  { %1697 = vmatmul.mubr.f32.vlgmr.msra.gmra.mxu0 %v2379_v23  ;;  %1768 = vmatmul.mubr.f32.vlgmr.msra.gmra.mxu1 %v2379_v23 }
 0x167   :  { %1774 = vmatprep.subr.mxu0 %v541_v19  ;;  %1845 = vmatprep.subr.mxu1 %v543_v20  ;;  %v60_v19 = vld [vmem:[#allocation2 + $0xa0] sm:$0xff]  ;;  %v62_v20 = vld [vmem:[#allocation2 + $0xb0] sm:$0xff] }
 0x168   :  { %1775 = vmatpush1.msra.mxu0 %v540_v21  ;;  %1846 = vmatpush1.msra.mxu1 %v542_v22  ;;  %v1053_v21 = vld [vmem:[#allocation2 + $0x1fa8] sm:$0xff]  ;;  %v1055_v22 = vld [vmem:[#allocation2 + $0x1fb8] sm:$0xff] }
 0x169   :  { %1776 = vmatprep.subr.mxu0 %v509_v24  ;;  %1847 = vmatprep.subr.mxu1 %v511_v6  ;;  %v1052_v24 = vld [vmem:[#allocation2 + $0x1fa0] sm:$0xff]  ;;  %v1054_v6 = vld [vmem:[#allocation2 + $0x1fb0] sm:$0xff] }
 0x16a   :  { %1777 = vmatpush1.msra.mxu0 %v508_v25  ;;  %1848 = vmatpush1.msra.mxu1 %v510_v26  ;;  %v1021_v25 = vld [vmem:[#allocation2 + $0x1ea8] sm:$0xff]  ;;  %v1023_v26 = vld [vmem:[#allocation2 + $0x1eb8] sm:$0xff] }
 0x16b   :  { %1778 = vmatprep.subr.mxu0 %v477_v11  ;;  %1849 = vmatprep.subr.mxu1 %v479_v27  ;;  %v1020_v11 = vld [vmem:[#allocation2 + $0x1ea0] sm:$0xff]  ;;  %v1022_v27 = vld [vmem:[#allocation2 + $0x1eb0] sm:$0xff] }
 0x16c   :  { %1779 = vmatpush1.msra.mxu0 %v476_v28  ;;  %1850 = vmatpush1.msra.mxu1 %v478_v29  ;;  %v989_v28 = vld [vmem:[#allocation2 + $0x1da8] sm:$0xff]  ;;  %v991_v29 = vld [vmem:[#allocation2 + $0x1db8] sm:$0xff] }
 0x16d   :  { %1780 = vmatprep.subr.mxu0 %v445_v30  ;;  %1851 = vmatprep.subr.mxu1 %v447_v31  ;;  %v988_v30 = vld [vmem:[#allocation2 + $0x1da0] sm:$0xff]  ;;  %v990_v31 = vld [vmem:[#allocation2 + $0x1db0] sm:$0xff] }
 0x16e   :  { %1781 = vmatpush1.msra.mxu0 %v444_v32  ;;  %1852 = vmatpush1.msra.mxu1 %v446_v33  ;;  %v957_v32 = vld [vmem:[#allocation2 + $0x1ca8] sm:$0xff]  ;;  %v959_v33 = vld [vmem:[#allocation2 + $0x1cb8] sm:$0xff] }
 0x16f   :  { %1782 = vmatprep.subr.mxu0 %v413_v34  ;;  %1853 = vmatprep.subr.mxu1 %v415_v35  ;;  %v956_v34 = vld [vmem:[#allocation2 + $0x1ca0] sm:$0xff]  ;;  %v958_v35 = vld [vmem:[#allocation2 + $0x1cb0] sm:$0xff] }
 0x170   :  { %1783 = vmatpush1.msra.mxu0 %v412_v36  ;;  %1854 = vmatpush1.msra.mxu1 %v414_v37  ;;  %v925_v36 = vld [vmem:[#allocation2 + $0x1ba8] sm:$0xff]  ;;  %v927_v37 = vld [vmem:[#allocation2 + $0x1bb8] sm:$0xff] }
 0x171   :  { %1784 = vmatprep.subr.mxu0 %v381_v38  ;;  %1855 = vmatprep.subr.mxu1 %v383_v39  ;;  %v924_v38 = vld [vmem:[#allocation2 + $0x1ba0] sm:$0xff]  ;;  %v926_v39 = vld [vmem:[#allocation2 + $0x1bb0] sm:$0xff] }
 0x172   :  { %1785 = vmatpush1.msra.mxu0 %v380_v40  ;;  %1856 = vmatpush1.msra.mxu1 %v382_v41  ;;  %v893_v40 = vld [vmem:[#allocation2 + $0x1aa8] sm:$0xff]  ;;  %v895_v41 = vld [vmem:[#allocation2 + $0x1ab8] sm:$0xff] }
 0x173   :  { %1786 = vmatprep.subr.mxu0 %v349_v42  ;;  %1857 = vmatprep.subr.mxu1 %v351_v43  ;;  %v892_v42 = vld [vmem:[#allocation2 + $0x1aa0] sm:$0xff]  ;;  %v894_v43 = vld [vmem:[#allocation2 + $0x1ab0] sm:$0xff] }
 0x174   :  { %1787 = vmatpush1.msra.mxu0 %v348_v44  ;;  %1858 = vmatpush1.msra.mxu1 %v350_v45  ;;  %v861_v44 = vld [vmem:[#allocation2 + $0x19a8] sm:$0xff]  ;;  %v863_v45 = vld [vmem:[#allocation2 + $0x19b8] sm:$0xff] }
 0x175   :  { %1788 = vmatprep.subr.mxu0 %v317_v46  ;;  %1859 = vmatprep.subr.mxu1 %v319_v47  ;;  %v860_v46 = vld [vmem:[#allocation2 + $0x19a0] sm:$0xff]  ;;  %v862_v47 = vld [vmem:[#allocation2 + $0x19b0] sm:$0xff] }
 0x176   :  { %1789 = vmatpush1.msra.mxu0 %v316_v48  ;;  %1860 = vmatpush1.msra.mxu1 %v318_v49  ;;  %v829_v48 = vld [vmem:[#allocation2 + $0x18a8] sm:$0xff]  ;;  %v831_v49 = vld [vmem:[#allocation2 + $0x18b8] sm:$0xff] }
 0x177   :  { %1790 = vmatprep.subr.mxu0 %v285_v50  ;;  %1861 = vmatprep.subr.mxu1 %v287_v51  ;;  %v828_v50 = vld [vmem:[#allocation2 + $0x18a0] sm:$0xff]  ;;  %v830_v51 = vld [vmem:[#allocation2 + $0x18b0] sm:$0xff] }
 0x178   :  { %1791 = vmatpush1.msra.mxu0 %v284_v52  ;;  %1862 = vmatpush1.msra.mxu1 %v286_v53  ;;  %v797_v52 = vld [vmem:[#allocation2 + $0x17a8] sm:$0xff]  ;;  %v799_v53 = vld [vmem:[#allocation2 + $0x17b8] sm:$0xff] }
 0x179   :  { %1792 = vmatprep.subr.mxu0 %v253_v54  ;;  %1863 = vmatprep.subr.mxu1 %v255_v55  ;;  %v796_v54 = vld [vmem:[#allocation2 + $0x17a0] sm:$0xff]  ;;  %v798_v55 = vld [vmem:[#allocation2 + $0x17b0] sm:$0xff] }
 0x17a   :  { %1793 = vmatpush1.msra.mxu0 %v252_v56  ;;  %1864 = vmatpush1.msra.mxu1 %v254_v57  ;;  %v765_v56 = vld [vmem:[#allocation2 + $0x16a8] sm:$0xff]  ;;  %v767_v57 = vld [vmem:[#allocation2 + $0x16b8] sm:$0xff] }
 0x17b   :  { %1794 = vmatprep.subr.mxu0 %v221_v58  ;;  %1865 = vmatprep.subr.mxu1 %v223_v59  ;;  %v764_v58 = vld [vmem:[#allocation2 + $0x16a0] sm:$0xff]  ;;  %v766_v59 = vld [vmem:[#allocation2 + $0x16b0] sm:$0xff] }
 0x17c   :  { %1795 = vmatpush1.msra.mxu0 %v220_v60  ;;  %1866 = vmatpush1.msra.mxu1 %v222_v61  ;;  %v733_v60 = vld [vmem:[#allocation2 + $0x15a8] sm:$0xff]  ;;  %v735_v61 = vld [vmem:[#allocation2 + $0x15b8] sm:$0xff] }
 0x17d   :  { %1796 = vmatprep.subr.mxu0 %v189_v62  ;;  %1867 = vmatprep.subr.mxu1 %v191_v0  ;;  %v732_v62 = vld [vmem:[#allocation2 + $0x15a0] sm:$0xff]  ;;  %v734_v0 = vld [vmem:[#allocation2 + $0x15b0] sm:$0xff] }
 0x17e   :  { %1797 = vmatpush1.msra.mxu0 %v188_v2  ;;  %1868 = vmatpush1.msra.mxu1 %v190_v3  ;;  %v701_v2 = vld [vmem:[#allocation2 + $0x14a8] sm:$0xff]  ;;  %v703_v3 = vld [vmem:[#allocation2 + $0x14b8] sm:$0xff] }
 0x17f   :  { %1798 = vmatprep.subr.mxu0 %v157_v4  ;;  %1869 = vmatprep.subr.mxu1 %v159_v5  ;;  %v700_v4 = vld [vmem:[#allocation2 + $0x14a0] sm:$0xff]  ;;  %v702_v5 = vld [vmem:[#allocation2 + $0x14b0] sm:$0xff] }
 0x180   :  { %1799 = vmatpush1.msra.mxu0 %v156_v7  ;;  %1870 = vmatpush1.msra.mxu1 %v158_v8  ;;  %v669_v7 = vld [vmem:[#allocation2 + $0x13a8] sm:$0xff]  ;;  %v671_v8 = vld [vmem:[#allocation2 + $0x13b8] sm:$0xff] }
 0x181   :  { %1800 = vmatprep.subr.mxu0 %v125_v9  ;;  %1871 = vmatprep.subr.mxu1 %v127_v10  ;;  %v668_v9 = vld [vmem:[#allocation2 + $0x13a0] sm:$0xff]  ;;  %v670_v10 = vld [vmem:[#allocation2 + $0x13b0] sm:$0xff] }
 0x182   :  { %1801 = vmatpush1.msra.mxu0 %v124_v12  ;;  %1872 = vmatpush1.msra.mxu1 %v126_v13  ;;  %v637_v12 = vld [vmem:[#allocation2 + $0x12a8] sm:$0xff]  ;;  %v639_v13 = vld [vmem:[#allocation2 + $0x12b8] sm:$0xff] }
 0x183   :  { %1802 = vmatprep.subr.mxu0 %v93_v14  ;;  %1873 = vmatprep.subr.mxu1 %v95_v15  ;;  %v636_v14 = vld [vmem:[#allocation2 + $0x12a0] sm:$0xff]  ;;  %v638_v15 = vld [vmem:[#allocation2 + $0x12b0] sm:$0xff] }
 0x184   :  { %1803 = vmatpush1.msra.mxu0 %v92_v16  ;;  %1874 = vmatpush1.msra.mxu1 %v94_v63  ;;  %v605_v16 = vld [vmem:[#allocation2 + $0x11a8] sm:$0xff]  ;;  %v607_v63 = vld [vmem:[#allocation2 + $0x11b8] sm:$0xff] }
 0x185   :  { %1804 = vmatprep.subr.mxu0 %v61_v17  ;;  %1875 = vmatprep.subr.mxu1 %v63_v18  ;;  %v604_v17 = vld [vmem:[#allocation2 + $0x11a0] sm:$0xff]  ;;  %v606_v18 = vld [vmem:[#allocation2 + $0x11b0] sm:$0xff] }
 0x186   :  { %1805 = vmatpush1.msra.mxu0 %v60_v19  ;;  %1876 = vmatpush1.msra.mxu1 %v62_v20  ;;  %v573_v19 = vld [vmem:[#allocation2 + $0x10a8] sm:$0xff]  ;;  %v575_v20 = vld [vmem:[#allocation2 + $0x10b8] sm:$0xff] }
 0x187   :  { %1806 = vmatprep.subr.mxu0 %v1053_v21  ;;  %1877 = vmatprep.subr.mxu1 %v1055_v22 }
 0x188   :  { %1807 = vmatpush2.msra.mxu0 %v1052_v24  ;;  %1878 = vmatpush2.msra.mxu1 %v1054_v6  ;;  %v572_v24 = vld [vmem:[#allocation2 + $0x10a0] sm:$0xff]  ;;  %v574_v6 = vld [vmem:[#allocation2 + $0x10b0] sm:$0xff] }
 0x189   :  { %1808 = vmatprep.subr.mxu0 %v1021_v25  ;;  %1879 = vmatprep.subr.mxu1 %v1023_v26 }
 0x18a   :  { %1809 = vmatpush2.msra.mxu0 %v1020_v11  ;;  %1880 = vmatpush2.msra.mxu1 %v1022_v27  ;;  %v545_v11 = vld [vmem:[#allocation2 + $0xfc8] sm:$0xff]  ;;  %v547_v27 = vld [vmem:[#allocation2 + $0xfd8] sm:$0xff] }
 0x18b   :  { %1810 = vmatprep.subr.mxu0 %v989_v28  ;;  %1881 = vmatprep.subr.mxu1 %v991_v29  ;;  %v544_v28 = vld [vmem:[#allocation2 + $0xfc0] sm:$0xff]  ;;  %v546_v29 = vld [vmem:[#allocation2 + $0xfd0] sm:$0xff] }
 0x18c   :  { %1811 = vmatpush2.msra.mxu0 %v988_v30  ;;  %1882 = vmatpush2.msra.mxu1 %v990_v31  ;;  %v513_v30 = vld [vmem:[#allocation2 + $0xec8] sm:$0xff]  ;;  %v515_v31 = vld [vmem:[#allocation2 + $0xed8] sm:$0xff] }
 0x18d   :  { %1812 = vmatprep.subr.mxu0 %v957_v32  ;;  %1883 = vmatprep.subr.mxu1 %v959_v33  ;;  %v512_v32 = vld [vmem:[#allocation2 + $0xec0] sm:$0xff]  ;;  %v514_v33 = vld [vmem:[#allocation2 + $0xed0] sm:$0xff] }
 0x18e   :  { %1813 = vmatpush2.msra.mxu0 %v956_v34  ;;  %1884 = vmatpush2.msra.mxu1 %v958_v35  ;;  %v481_v34 = vld [vmem:[#allocation2 + $0xdc8] sm:$0xff]  ;;  %v483_v35 = vld [vmem:[#allocation2 + $0xdd8] sm:$0xff] }
 0x18f   :  { %1814 = vmatprep.subr.mxu0 %v925_v36  ;;  %1885 = vmatprep.subr.mxu1 %v927_v37  ;;  %v480_v36 = vld [vmem:[#allocation2 + $0xdc0] sm:$0xff]  ;;  %v449_v37 = vld [vmem:[#allocation2 + $0xcc8] sm:$0xff] }
 0x190   :  { %1815 = vmatpush2.msra.mxu0 %v924_v38  ;;  %1886 = vmatpush2.msra.mxu1 %v926_v39  ;;  %v451_v38 = vld [vmem:[#allocation2 + $0xcd8] sm:$0xff]  ;;  %v450_v39 = vld [vmem:[#allocation2 + $0xcd0] sm:$0xff] }
 0x191   :  { %1816 = vmatprep.subr.mxu0 %v893_v40  ;;  %1887 = vmatprep.subr.mxu1 %v895_v41  ;;  %v417_v40 = vld [vmem:[#allocation2 + $0xbc8] sm:$0xff]  ;;  %v419_v41 = vld [vmem:[#allocation2 + $0xbd8] sm:$0xff] }
 0x192   :  { %1817 = vmatpush2.msra.mxu0 %v892_v42  ;;  %1888 = vmatpush2.msra.mxu1 %v894_v43  ;;  %v416_v42 = vld [vmem:[#allocation2 + $0xbc0] sm:$0xff]  ;;  %v418_v43 = vld [vmem:[#allocation2 + $0xbd0] sm:$0xff] }
 0x193   :  { %1818 = vmatprep.subr.mxu0 %v861_v44  ;;  %1889 = vmatprep.subr.mxu1 %v863_v45  ;;  %v385_v44 = vld [vmem:[#allocation2 + $0xac8] sm:$0xff]  ;;  %v387_v45 = vld [vmem:[#allocation2 + $0xad8] sm:$0xff] }
 0x194   :  { %1819 = vmatpush2.msra.mxu0 %v860_v46  ;;  %1890 = vmatpush2.msra.mxu1 %v862_v47  ;;  %v384_v46 = vld [vmem:[#allocation2 + $0xac0] sm:$0xff]  ;;  %v386_v47 = vld [vmem:[#allocation2 + $0xad0] sm:$0xff] }
 0x195   :  { %1820 = vmatprep.subr.mxu0 %v829_v48  ;;  %1891 = vmatprep.subr.mxu1 %v831_v49  ;;  %v353_v48 = vld [vmem:[#allocation2 + $0x9c8] sm:$0xff]  ;;  %v355_v49 = vld [vmem:[#allocation2 + $0x9d8] sm:$0xff] }
 0x196   :  { %1821 = vmatpush2.msra.mxu0 %v828_v50  ;;  %1892 = vmatpush2.msra.mxu1 %v830_v51  ;;  %v352_v50 = vld [vmem:[#allocation2 + $0x9c0] sm:$0xff]  ;;  %v354_v51 = vld [vmem:[#allocation2 + $0x9d0] sm:$0xff] }
 0x197   :  { %1822 = vmatprep.subr.mxu0 %v797_v52  ;;  %1893 = vmatprep.subr.mxu1 %v799_v53  ;;  %v321_v52 = vld [vmem:[#allocation2 + $0x8c8] sm:$0xff]  ;;  %v323_v53 = vld [vmem:[#allocation2 + $0x8d8] sm:$0xff] }
 0x198   :  { %1823 = vmatpush2.msra.mxu0 %v796_v54  ;;  %1894 = vmatpush2.msra.mxu1 %v798_v55  ;;  %v320_v54 = vld [vmem:[#allocation2 + $0x8c0] sm:$0xff]  ;;  %v322_v55 = vld [vmem:[#allocation2 + $0x8d0] sm:$0xff] }
 0x199   :  { %1824 = vmatprep.subr.mxu0 %v765_v56  ;;  %1895 = vmatprep.subr.mxu1 %v767_v57  ;;  %v289_v56 = vld [vmem:[#allocation2 + $0x7c8] sm:$0xff]  ;;  %v291_v57 = vld [vmem:[#allocation2 + $0x7d8] sm:$0xff] }
 0x19a   :  { %1825 = vmatpush2.msra.mxu0 %v764_v58  ;;  %1896 = vmatpush2.msra.mxu1 %v766_v59  ;;  %v288_v58 = vld [vmem:[#allocation2 + $0x7c0] sm:$0xff]  ;;  %v290_v59 = vld [vmem:[#allocation2 + $0x7d0] sm:$0xff] }
 0x19b   :  { %1826 = vmatprep.subr.mxu0 %v733_v60  ;;  %1897 = vmatprep.subr.mxu1 %v735_v61  ;;  %v257_v60 = vld [vmem:[#allocation2 + $0x6c8] sm:$0xff]  ;;  %v259_v61 = vld [vmem:[#allocation2 + $0x6d8] sm:$0xff] }
 0x19c   :  { %1827 = vmatpush2.msra.mxu0 %v732_v62  ;;  %1898 = vmatpush2.msra.mxu1 %v734_v0  ;;  %v256_v62 = vld [vmem:[#allocation2 + $0x6c0] sm:$0xff]  ;;  %v258_v0 = vld [vmem:[#allocation2 + $0x6d0] sm:$0xff] }
 0x19d   :  { %1828 = vmatprep.subr.mxu0 %v701_v2  ;;  %1899 = vmatprep.subr.mxu1 %v703_v3  ;;  %v225_v2 = vld [vmem:[#allocation2 + $0x5c8] sm:$0xff]  ;;  %v227_v3 = vld [vmem:[#allocation2 + $0x5d8] sm:$0xff] }
 0x19e   :  { %1829 = vmatpush2.msra.mxu0 %v700_v4  ;;  %1900 = vmatpush2.msra.mxu1 %v702_v5  ;;  %v224_v4 = vld [vmem:[#allocation2 + $0x5c0] sm:$0xff]  ;;  %v226_v5 = vld [vmem:[#allocation2 + $0x5d0] sm:$0xff] }
 0x19f   :  { %1830 = vmatprep.subr.mxu0 %v669_v7  ;;  %1901 = vmatprep.subr.mxu1 %v671_v8  ;;  %v193_v7 = vld [vmem:[#allocation2 + $0x4c8] sm:$0xff]  ;;  %v195_v8 = vld [vmem:[#allocation2 + $0x4d8] sm:$0xff] }
 0x1a0   :  { %1831 = vmatpush2.msra.mxu0 %v668_v9  ;;  %1902 = vmatpush2.msra.mxu1 %v670_v10  ;;  %v192_v9 = vld [vmem:[#allocation2 + $0x4c0] sm:$0xff]  ;;  %v194_v10 = vld [vmem:[#allocation2 + $0x4d0] sm:$0xff] }
 0x1a1   :  { %1832 = vmatprep.subr.mxu0 %v637_v12  ;;  %1903 = vmatprep.subr.mxu1 %v639_v13  ;;  %v161_v12 = vld [vmem:[#allocation2 + $0x3c8] sm:$0xff]  ;;  %v163_v13 = vld [vmem:[#allocation2 + $0x3d8] sm:$0xff] }
 0x1a2   :  { %1833 = vmatpush2.msra.mxu0 %v636_v14  ;;  %1904 = vmatpush2.msra.mxu1 %v638_v15  ;;  %v1414_v21 = vpop.f32.mrf.mxu0  ;;  %v1485_v22 = vpop.f32.mrf.mxu1  ;;  %v160_v14 = vld [vmem:[#allocation2 + $0x3c0] sm:$0xff]  ;;  %v162_v15 = vld [vmem:[#allocation2 + $0x3d0] sm:$0xff] }
 0x1a3   :  { %1834 = vmatprep.subr.mxu0 %v605_v16  ;;  %1905 = vmatprep.subr.mxu1 %v607_v63  ;;  %2208 = vst [vmem:[#allocation7 + $0x40] sm:$0xff] %v1414_v21  ;;  %2210 = vst [vmem:[#allocation7 + $0x50] sm:$0xff] %v1485_v22  ;;  %v129_v16 = vld [vmem:[#allocation2 + $0x2c8] sm:$0xff]  ;;  %v131_v63 = vld [vmem:[#allocation2 + $0x2d8] sm:$0xff] }
 0x1a4   :  { %1835 = vmatpush2.msra.mxu0 %v604_v17  ;;  %1906 = vmatpush2.msra.mxu1 %v606_v18  ;;  %v1416_v25 = vpop.f32.mrf.mxu0  ;;  %v1487_v26 = vpop.f32.mrf.mxu1  ;;  %v128_v17 = vld [vmem:[#allocation2 + $0x2c0] sm:$0xff]  ;;  %v130_v18 = vld [vmem:[#allocation2 + $0x2d0] sm:$0xff] }
 0x1a5   :  { %1836 = vmatprep.subr.mxu0 %v573_v19  ;;  %1907 = vmatprep.subr.mxu1 %v575_v20  ;;  %2209 = vst [vmem:[#allocation7 + $0x48] sm:$0xff] %v1416_v25  ;;  %2211 = vst [vmem:[#allocation7 + $0x58] sm:$0xff] %v1487_v26  ;;  %v97_v19 = vld [vmem:[#allocation2 + $0x1c8] sm:$0xff]  ;;  %v99_v20 = vld [vmem:[#allocation2 + $0x1d8] sm:$0xff] }
 0x1a6   :  { %1837 = vmatpush2.msra.mxu0 %v572_v24  ;;  %1838 = vmatprep.mubr.f32.mxu0 %v2375_v1  ;;  %v96_v21 = vld [vmem:[#allocation2 + $0x1c0] sm:$0xff]  ;;  %v98_v22 = vld [vmem:[#allocation2 + $0x1d0] sm:$0xff]  ;;  %v65_v24 = vld [vmem:[#allocation2 + $0xc8] sm:$0xff] }
 0x1a7   :  { %1908 = vmatpush2.msra.mxu1 %v574_v6  ;;  %1909 = vmatprep.mubr.f32.mxu1 %v2375_v1  ;;  %v482_v1 = vld [vmem:[#allocation2 + $0xdd0] sm:$0xff]  ;;  %v67_v6 = vld [vmem:[#allocation2 + $0xd8] sm:$0xff]  ;;  %v64_v25 = vld [vmem:[#allocation2 + $0xc0] sm:$0xff] }
 0x1a8   :  { %1839 = vmatmul.mubr.f32.vlgmr.msra.gmra.mxu0 %v2379_v23  ;;  %1910 = vmatmul.mubr.f32.vlgmr.msra.gmra.mxu1 %v2379_v23  ;;  %v448_v23 = vld [vmem:[#allocation2 + $0xcc0] sm:$0xff]  ;;  %v66_v26 = vld [vmem:[#allocation2 + $0xd0] sm:$0xff] }
 0x1a9   :  { %1916 = vmatprep.subr.mxu0 %v545_v11  ;;  %1987 = vmatprep.subr.mxu1 %v547_v27  ;;  %v1057_v11 = vld [vmem:[#allocation2 + $0x1fc8] sm:$0xff]  ;;  %v1059_v27 = vld [vmem:[#allocation2 + $0x1fd8] sm:$0xff] }
 0x1aa   :  { %1917 = vmatpush1.msra.mxu0 %v544_v28  ;;  %1988 = vmatpush1.msra.mxu1 %v546_v29  ;;  %v1056_v28 = vld [vmem:[#allocation2 + $0x1fc0] sm:$0xff]  ;;  %v1058_v29 = vld [vmem:[#allocation2 + $0x1fd0] sm:$0xff] }
 0x1ab   :  { %1918 = vmatprep.subr.mxu0 %v513_v30  ;;  %1989 = vmatprep.subr.mxu1 %v515_v31  ;;  %v1025_v30 = vld [vmem:[#allocation2 + $0x1ec8] sm:$0xff]  ;;  %v1027_v31 = vld [vmem:[#allocation2 + $0x1ed8] sm:$0xff] }
 0x1ac   :  { %1919 = vmatpush1.msra.mxu0 %v512_v32  ;;  %1990 = vmatpush1.msra.mxu1 %v514_v33  ;;  %v1024_v32 = vld [vmem:[#allocation2 + $0x1ec0] sm:$0xff]  ;;  %v1026_v33 = vld [vmem:[#allocation2 + $0x1ed0] sm:$0xff] }
 0x1ad   :  { %1920 = vmatprep.subr.mxu0 %v481_v34  ;;  %1991 = vmatprep.subr.mxu1 %v483_v35  ;;  %v993_v34 = vld [vmem:[#allocation2 + $0x1dc8] sm:$0xff]  ;;  %v995_v35 = vld [vmem:[#allocation2 + $0x1dd8] sm:$0xff] }
 0x1ae   :  { %1921 = vmatpush1.msra.mxu0 %v480_v36  ;;  %1992 = vmatpush1.msra.mxu1 %v482_v1  ;;  %v992_v36 = vld [vmem:[#allocation2 + $0x1dc0] sm:$0xff]  ;;  %v994_v1 = vld [vmem:[#allocation2 + $0x1dd0] sm:$0xff] }
 0x1af   :  { %1922 = vmatprep.subr.mxu0 %v449_v37  ;;  %1993 = vmatprep.subr.mxu1 %v451_v38  ;;  %v961_v37 = vld [vmem:[#allocation2 + $0x1cc8] sm:$0xff]  ;;  %v963_v38 = vld [vmem:[#allocation2 + $0x1cd8] sm:$0xff] }
 0x1b0   :  { %1923 = vmatpush1.msra.mxu0 %v448_v23  ;;  %1994 = vmatpush1.msra.mxu1 %v450_v39  ;;  %v960_v23 = vld [vmem:[#allocation2 + $0x1cc0] sm:$0xff]  ;;  %v962_v39 = vld [vmem:[#allocation2 + $0x1cd0] sm:$0xff] }
 0x1b1   :  { %1924 = vmatprep.subr.mxu0 %v417_v40  ;;  %1995 = vmatprep.subr.mxu1 %v419_v41  ;;  %v929_v40 = vld [vmem:[#allocation2 + $0x1bc8] sm:$0xff]  ;;  %v931_v41 = vld [vmem:[#allocation2 + $0x1bd8] sm:$0xff] }
 0x1b2   :  { %1925 = vmatpush1.msra.mxu0 %v416_v42  ;;  %1996 = vmatpush1.msra.mxu1 %v418_v43  ;;  %v928_v42 = vld [vmem:[#allocation2 + $0x1bc0] sm:$0xff]  ;;  %v930_v43 = vld [vmem:[#allocation2 + $0x1bd0] sm:$0xff] }
 0x1b3   :  { %1926 = vmatprep.subr.mxu0 %v385_v44  ;;  %1997 = vmatprep.subr.mxu1 %v387_v45  ;;  %v897_v44 = vld [vmem:[#allocation2 + $0x1ac8] sm:$0xff]  ;;  %v899_v45 = vld [vmem:[#allocation2 + $0x1ad8] sm:$0xff] }
 0x1b4   :  { %1927 = vmatpush1.msra.mxu0 %v384_v46  ;;  %1998 = vmatpush1.msra.mxu1 %v386_v47  ;;  %v896_v46 = vld [vmem:[#allocation2 + $0x1ac0] sm:$0xff]  ;;  %v898_v47 = vld [vmem:[#allocation2 + $0x1ad0] sm:$0xff] }
 0x1b5   :  { %1928 = vmatprep.subr.mxu0 %v353_v48  ;;  %1999 = vmatprep.subr.mxu1 %v355_v49  ;;  %v865_v48 = vld [vmem:[#allocation2 + $0x19c8] sm:$0xff]  ;;  %v867_v49 = vld [vmem:[#allocation2 + $0x19d8] sm:$0xff] }
 0x1b6   :  { %1929 = vmatpush1.msra.mxu0 %v352_v50  ;;  %2000 = vmatpush1.msra.mxu1 %v354_v51  ;;  %v864_v50 = vld [vmem:[#allocation2 + $0x19c0] sm:$0xff]  ;;  %v866_v51 = vld [vmem:[#allocation2 + $0x19d0] sm:$0xff] }
 0x1b7   :  { %1930 = vmatprep.subr.mxu0 %v321_v52  ;;  %2001 = vmatprep.subr.mxu1 %v323_v53  ;;  %v833_v52 = vld [vmem:[#allocation2 + $0x18c8] sm:$0xff]  ;;  %v835_v53 = vld [vmem:[#allocation2 + $0x18d8] sm:$0xff] }
 0x1b8   :  { %1931 = vmatpush1.msra.mxu0 %v320_v54  ;;  %2002 = vmatpush1.msra.mxu1 %v322_v55  ;;  %v832_v54 = vld [vmem:[#allocation2 + $0x18c0] sm:$0xff]  ;;  %v834_v55 = vld [vmem:[#allocation2 + $0x18d0] sm:$0xff] }
 0x1b9   :  { %1932 = vmatprep.subr.mxu0 %v289_v56  ;;  %2003 = vmatprep.subr.mxu1 %v291_v57  ;;  %v801_v56 = vld [vmem:[#allocation2 + $0x17c8] sm:$0xff]  ;;  %v803_v57 = vld [vmem:[#allocation2 + $0x17d8] sm:$0xff] }
 0x1ba   :  { %1933 = vmatpush1.msra.mxu0 %v288_v58  ;;  %2004 = vmatpush1.msra.mxu1 %v290_v59  ;;  %v800_v58 = vld [vmem:[#allocation2 + $0x17c0] sm:$0xff]  ;;  %v802_v59 = vld [vmem:[#allocation2 + $0x17d0] sm:$0xff] }
 0x1bb   :  { %1934 = vmatprep.subr.mxu0 %v257_v60  ;;  %2005 = vmatprep.subr.mxu1 %v259_v61  ;;  %v769_v60 = vld [vmem:[#allocation2 + $0x16c8] sm:$0xff]  ;;  %v771_v61 = vld [vmem:[#allocation2 + $0x16d8] sm:$0xff] }
 0x1bc   :  { %1935 = vmatpush1.msra.mxu0 %v256_v62  ;;  %2006 = vmatpush1.msra.mxu1 %v258_v0  ;;  %v768_v62 = vld [vmem:[#allocation2 + $0x16c0] sm:$0xff]  ;;  %v770_v0 = vld [vmem:[#allocation2 + $0x16d0] sm:$0xff] }
 0x1bd   :  { %1936 = vmatprep.subr.mxu0 %v225_v2  ;;  %2007 = vmatprep.subr.mxu1 %v227_v3  ;;  %v737_v2 = vld [vmem:[#allocation2 + $0x15c8] sm:$0xff]  ;;  %v739_v3 = vld [vmem:[#allocation2 + $0x15d8] sm:$0xff] }
 0x1be   :  { %1937 = vmatpush1.msra.mxu0 %v224_v4  ;;  %2008 = vmatpush1.msra.mxu1 %v226_v5  ;;  %v736_v4 = vld [vmem:[#allocation2 + $0x15c0] sm:$0xff]  ;;  %v738_v5 = vld [vmem:[#allocation2 + $0x15d0] sm:$0xff] }
 0x1bf   :  { %1938 = vmatprep.subr.mxu0 %v193_v7  ;;  %2009 = vmatprep.subr.mxu1 %v195_v8  ;;  %v705_v7 = vld [vmem:[#allocation2 + $0x14c8] sm:$0xff]  ;;  %v707_v8 = vld [vmem:[#allocation2 + $0x14d8] sm:$0xff] }
 0x1c0   :  { %1939 = vmatpush1.msra.mxu0 %v192_v9  ;;  %2010 = vmatpush1.msra.mxu1 %v194_v10  ;;  %v704_v9 = vld [vmem:[#allocation2 + $0x14c0] sm:$0xff]  ;;  %v706_v10 = vld [vmem:[#allocation2 + $0x14d0] sm:$0xff] }
 0x1c1   :  { %1940 = vmatprep.subr.mxu0 %v161_v12  ;;  %2011 = vmatprep.subr.mxu1 %v163_v13  ;;  %v673_v12 = vld [vmem:[#allocation2 + $0x13c8] sm:$0xff]  ;;  %v675_v13 = vld [vmem:[#allocation2 + $0x13d8] sm:$0xff] }
 0x1c2   :  { %1941 = vmatpush1.msra.mxu0 %v160_v14  ;;  %2012 = vmatpush1.msra.mxu1 %v162_v15  ;;  %v672_v14 = vld [vmem:[#allocation2 + $0x13c0] sm:$0xff]  ;;  %v674_v15 = vld [vmem:[#allocation2 + $0x13d0] sm:$0xff] }
 0x1c3   :  { %1942 = vmatprep.subr.mxu0 %v129_v16  ;;  %2013 = vmatprep.subr.mxu1 %v131_v63  ;;  %v641_v16 = vld [vmem:[#allocation2 + $0x12c8] sm:$0xff]  ;;  %v643_v63 = vld [vmem:[#allocation2 + $0x12d8] sm:$0xff] }
 0x1c4   :  { %1943 = vmatpush1.msra.mxu0 %v128_v17  ;;  %2014 = vmatpush1.msra.mxu1 %v130_v18  ;;  %v640_v17 = vld [vmem:[#allocation2 + $0x12c0] sm:$0xff]  ;;  %v642_v18 = vld [vmem:[#allocation2 + $0x12d0] sm:$0xff] }
 0x1c5   :  { %1944 = vmatprep.subr.mxu0 %v97_v19  ;;  %2015 = vmatprep.subr.mxu1 %v99_v20  ;;  %v609_v19 = vld [vmem:[#allocation2 + $0x11c8] sm:$0xff]  ;;  %v611_v20 = vld [vmem:[#allocation2 + $0x11d8] sm:$0xff] }
 0x1c6   :  { %1945 = vmatpush1.msra.mxu0 %v96_v21  ;;  %2016 = vmatpush1.msra.mxu1 %v98_v22  ;;  %v608_v21 = vld [vmem:[#allocation2 + $0x11c0] sm:$0xff]  ;;  %v610_v22 = vld [vmem:[#allocation2 + $0x11d0] sm:$0xff] }
 0x1c7   :  { %1946 = vmatprep.subr.mxu0 %v65_v24  ;;  %2017 = vmatprep.subr.mxu1 %v67_v6  ;;  %v577_v24 = vld [vmem:[#allocation2 + $0x10c8] sm:$0xff]  ;;  %v579_v6 = vld [vmem:[#allocation2 + $0x10d8] sm:$0xff] }
 0x1c8   :  { %1947 = vmatpush1.msra.mxu0 %v64_v25  ;;  %2018 = vmatpush1.msra.mxu1 %v66_v26 }
 0x1c9   :  { %1948 = vmatprep.subr.mxu0 %v1057_v11  ;;  %2019 = vmatprep.subr.mxu1 %v1059_v27  ;;  %v576_v11 = vld [vmem:[#allocation2 + $0x10c0] sm:$0xff]  ;;  %v578_v27 = vld [vmem:[#allocation2 + $0x10d0] sm:$0xff] }
 0x1ca   :  { %1949 = vmatpush2.msra.mxu0 %v1056_v28  ;;  %2020 = vmatpush2.msra.mxu1 %v1058_v29 }
 0x1cb   :  { %1950 = vmatprep.subr.mxu0 %v1025_v30  ;;  %2021 = vmatprep.subr.mxu1 %v1027_v31  ;;  %v2387_v30 = vld [vmem:[#allocation5 + $0x8] sm:$0xff] }
 0x1cc   :  { %1951 = vmatpush2.msra.mxu0 %v1024_v32  ;;  %2022 = vmatpush2.msra.mxu1 %v1026_v33  ;;  %v549_v31 = vld [vmem:[#allocation2 + $0xfe8] sm:$0xff]  ;;  %v551_v32 = vld [vmem:[#allocation2 + $0xff8] sm:$0xff]  ;;  %v548_v33 = vld [vmem:[#allocation2 + $0xfe0] sm:$0xff] }
 0x1cd   :  { %1952 = vmatprep.subr.mxu0 %v993_v34  ;;  %2023 = vmatprep.subr.mxu1 %v995_v35  ;;  %v550_v34 = vld [vmem:[#allocation2 + $0xff0] sm:$0xff]  ;;  %v2391_v35 = vld [vmem:[#allocation5] sm:$0xff] }
 0x1ce   :  { %1953 = vmatpush2.msra.mxu0 %v992_v36  ;;  %2024 = vmatpush2.msra.mxu1 %v994_v1  ;;  %v517_v36 = vld [vmem:[#allocation2 + $0xee8] sm:$0xff]  ;;  %v519_v1 = vld [vmem:[#allocation2 + $0xef8] sm:$0xff] }
 0x1cf   :  { %1954 = vmatprep.subr.mxu0 %v961_v37  ;;  %2025 = vmatprep.subr.mxu1 %v963_v38  ;;  %v516_v37 = vld [vmem:[#allocation2 + $0xee0] sm:$0xff]  ;;  %v518_v38 = vld [vmem:[#allocation2 + $0xef0] sm:$0xff] }
 0x1d0   :  { %1955 = vmatpush2.msra.mxu0 %v960_v23  ;;  %2026 = vmatpush2.msra.mxu1 %v962_v39  ;;  %v485_v23 = vld [vmem:[#allocation2 + $0xde8] sm:$0xff]  ;;  %v487_v39 = vld [vmem:[#allocation2 + $0xdf8] sm:$0xff] }
 0x1d1   :  { %1956 = vmatprep.subr.mxu0 %v929_v40  ;;  %2027 = vmatprep.subr.mxu1 %v931_v41  ;;  %v484_v40 = vld [vmem:[#allocation2 + $0xde0] sm:$0xff]  ;;  %v486_v41 = vld [vmem:[#allocation2 + $0xdf0] sm:$0xff] }
 0x1d2   :  { %1957 = vmatpush2.msra.mxu0 %v928_v42  ;;  %2028 = vmatpush2.msra.mxu1 %v930_v43  ;;  %v453_v42 = vld [vmem:[#allocation2 + $0xce8] sm:$0xff]  ;;  %v455_v43 = vld [vmem:[#allocation2 + $0xcf8] sm:$0xff] }
 0x1d3   :  { %1958 = vmatprep.subr.mxu0 %v897_v44  ;;  %2029 = vmatprep.subr.mxu1 %v899_v45  ;;  %v452_v44 = vld [vmem:[#allocation2 + $0xce0] sm:$0xff]  ;;  %v454_v45 = vld [vmem:[#allocation2 + $0xcf0] sm:$0xff] }
 0x1d4   :  { %1959 = vmatpush2.msra.mxu0 %v896_v46  ;;  %2030 = vmatpush2.msra.mxu1 %v898_v47  ;;  %v421_v46 = vld [vmem:[#allocation2 + $0xbe8] sm:$0xff]  ;;  %v423_v47 = vld [vmem:[#allocation2 + $0xbf8] sm:$0xff] }
 0x1d5   :  { %1960 = vmatprep.subr.mxu0 %v865_v48  ;;  %2031 = vmatprep.subr.mxu1 %v867_v49  ;;  %v420_v48 = vld [vmem:[#allocation2 + $0xbe0] sm:$0xff]  ;;  %v422_v49 = vld [vmem:[#allocation2 + $0xbf0] sm:$0xff] }
 0x1d6   :  { %1961 = vmatpush2.msra.mxu0 %v864_v50  ;;  %2032 = vmatpush2.msra.mxu1 %v866_v51  ;;  %v389_v50 = vld [vmem:[#allocation2 + $0xae8] sm:$0xff]  ;;  %v391_v51 = vld [vmem:[#allocation2 + $0xaf8] sm:$0xff] }
 0x1d7   :  { %1962 = vmatprep.subr.mxu0 %v833_v52  ;;  %2033 = vmatprep.subr.mxu1 %v835_v53  ;;  %v388_v52 = vld [vmem:[#allocation2 + $0xae0] sm:$0xff]  ;;  %v390_v53 = vld [vmem:[#allocation2 + $0xaf0] sm:$0xff] }
 0x1d8   :  { %1963 = vmatpush2.msra.mxu0 %v832_v54  ;;  %2034 = vmatpush2.msra.mxu1 %v834_v55  ;;  %v357_v54 = vld [vmem:[#allocation2 + $0x9e8] sm:$0xff]  ;;  %v359_v55 = vld [vmem:[#allocation2 + $0x9f8] sm:$0xff] }
 0x1d9   :  { %1964 = vmatprep.subr.mxu0 %v801_v56  ;;  %2035 = vmatprep.subr.mxu1 %v803_v57  ;;  %v356_v56 = vld [vmem:[#allocation2 + $0x9e0] sm:$0xff]  ;;  %v358_v57 = vld [vmem:[#allocation2 + $0x9f0] sm:$0xff] }
 0x1da   :  { %1965 = vmatpush2.msra.mxu0 %v800_v58  ;;  %2036 = vmatpush2.msra.mxu1 %v802_v59  ;;  %v325_v58 = vld [vmem:[#allocation2 + $0x8e8] sm:$0xff]  ;;  %v327_v59 = vld [vmem:[#allocation2 + $0x8f8] sm:$0xff] }
 0x1db   :  { %1966 = vmatprep.subr.mxu0 %v769_v60  ;;  %2037 = vmatprep.subr.mxu1 %v771_v61  ;;  %v324_v60 = vld [vmem:[#allocation2 + $0x8e0] sm:$0xff]  ;;  %v326_v61 = vld [vmem:[#allocation2 + $0x8f0] sm:$0xff] }
 0x1dc   :  { %1967 = vmatpush2.msra.mxu0 %v768_v62  ;;  %2038 = vmatpush2.msra.mxu1 %v770_v0  ;;  %v293_v62 = vld [vmem:[#allocation2 + $0x7e8] sm:$0xff]  ;;  %v295_v0 = vld [vmem:[#allocation2 + $0x7f8] sm:$0xff] }
 0x1dd   :  { %1968 = vmatprep.subr.mxu0 %v737_v2  ;;  %2039 = vmatprep.subr.mxu1 %v739_v3  ;;  %v292_v2 = vld [vmem:[#allocation2 + $0x7e0] sm:$0xff]  ;;  %v294_v3 = vld [vmem:[#allocation2 + $0x7f0] sm:$0xff] }
 0x1de   :  { %1969 = vmatpush2.msra.mxu0 %v736_v4  ;;  %2040 = vmatpush2.msra.mxu1 %v738_v5  ;;  %v261_v4 = vld [vmem:[#allocation2 + $0x6e8] sm:$0xff]  ;;  %v263_v5 = vld [vmem:[#allocation2 + $0x6f8] sm:$0xff] }
 0x1df   :  { %1970 = vmatprep.subr.mxu0 %v705_v7  ;;  %2041 = vmatprep.subr.mxu1 %v707_v8  ;;  %v260_v7 = vld [vmem:[#allocation2 + $0x6e0] sm:$0xff]  ;;  %v262_v8 = vld [vmem:[#allocation2 + $0x6f0] sm:$0xff] }
 0x1e0   :  { %1971 = vmatpush2.msra.mxu0 %v704_v9  ;;  %2042 = vmatpush2.msra.mxu1 %v706_v10  ;;  %v229_v9 = vld [vmem:[#allocation2 + $0x5e8] sm:$0xff]  ;;  %v231_v10 = vld [vmem:[#allocation2 + $0x5f8] sm:$0xff] }
 0x1e1   :  { %1972 = vmatprep.subr.mxu0 %v673_v12  ;;  %2043 = vmatprep.subr.mxu1 %v675_v13  ;;  %v228_v12 = vld [vmem:[#allocation2 + $0x5e0] sm:$0xff]  ;;  %v230_v13 = vld [vmem:[#allocation2 + $0x5f0] sm:$0xff] }
 0x1e2   :  { %1973 = vmatpush2.msra.mxu0 %v672_v14  ;;  %2044 = vmatpush2.msra.mxu1 %v674_v15  ;;  %v197_v14 = vld [vmem:[#allocation2 + $0x4e8] sm:$0xff]  ;;  %v199_v15 = vld [vmem:[#allocation2 + $0x4f8] sm:$0xff] }
 0x1e3   :  { %1974 = vmatprep.subr.mxu0 %v641_v16  ;;  %2045 = vmatprep.subr.mxu1 %v643_v63  ;;  %v196_v16 = vld [vmem:[#allocation2 + $0x4e0] sm:$0xff]  ;;  %v198_v63 = vld [vmem:[#allocation2 + $0x4f0] sm:$0xff] }
 0x1e4   :  { %1975 = vmatpush2.msra.mxu0 %v640_v17  ;;  %2046 = vmatpush2.msra.mxu1 %v642_v18  ;;  %v1556_v25 = vpop.f32.mrf.mxu0  ;;  %v1627_v26 = vpop.f32.mrf.mxu1  ;;  %v165_v17 = vld [vmem:[#allocation2 + $0x3e8] sm:$0xff]  ;;  %v167_v18 = vld [vmem:[#allocation2 + $0x3f8] sm:$0xff] }
 0x1e5   :  { %1976 = vmatprep.subr.mxu0 %v609_v19  ;;  %2047 = vmatprep.subr.mxu1 %v611_v20  ;;  %2212 = vst [vmem:[#allocation7 + $0x60] sm:$0xff] %v1556_v25  ;;  %2214 = vst [vmem:[#allocation7 + $0x70] sm:$0xff] %v1627_v26  ;;  %v164_v19 = vld [vmem:[#allocation2 + $0x3e0] sm:$0xff]  ;;  %v166_v20 = vld [vmem:[#allocation2 + $0x3f0] sm:$0xff] }
 0x1e6   :  { %1977 = vmatpush2.msra.mxu0 %v608_v21  ;;  %2048 = vmatpush2.msra.mxu1 %v610_v22  ;;  %v1558_v28 = vpop.f32.mrf.mxu0  ;;  %v1629_v29 = vpop.f32.mrf.mxu1  ;;  %v133_v21 = vld [vmem:[#allocation2 + $0x2e8] sm:$0xff]  ;;  %v135_v22 = vld [vmem:[#allocation2 + $0x2f8] sm:$0xff] }
 0x1e7   :  { %1978 = vmatprep.subr.mxu0 %v577_v24  ;;  %2049 = vmatprep.subr.mxu1 %v579_v6  ;;  %2213 = vst [vmem:[#allocation7 + $0x68] sm:$0xff] %v1558_v28  ;;  %2215 = vst [vmem:[#allocation7 + $0x78] sm:$0xff] %v1629_v29  ;;  %v132_v24 = vld [vmem:[#allocation2 + $0x2e0] sm:$0xff]  ;;  %v134_v6 = vld [vmem:[#allocation2 + $0x2f0] sm:$0xff] }
 0x1e8   :  { %1979 = vmatpush2.msra.mxu0 %v576_v11  ;;  %1980 = vmatprep.mubr.f32.mxu0 %v2387_v30  ;;  %v101_v25 = vld [vmem:[#allocation2 + $0x1e8] sm:$0xff]  ;;  %v103_v26 = vld [vmem:[#allocation2 + $0x1f8] sm:$0xff]  ;;  %v100_v11 = vld [vmem:[#allocation2 + $0x1e0] sm:$0xff] }
 0x1e9   :  { %2050 = vmatpush2.msra.mxu1 %v578_v27  ;;  %2051 = vmatprep.mubr.f32.mxu1 %v2387_v30  ;;  %v102_v27 = vld [vmem:[#allocation2 + $0x1f0] sm:$0xff]  ;;  %v69_v28 = vld [vmem:[#allocation2 + $0xe8] sm:$0xff]  ;;  %v71_v29 = vld [vmem:[#allocation2 + $0xf8] sm:$0xff] }
 0x1ea   :  { %1981 = vmatmul.mubr.f32.vlgmr.msra.gmra.mxu0 %v2391_v35  ;;  %2052 = vmatmul.mubr.f32.vlgmr.msra.gmra.mxu1 %v2391_v35 }
 0x1eb   :  { %2058 = vmatprep.subr.mxu0 %v549_v31  ;;  %2129 = vmatprep.subr.mxu1 %v551_v32  ;;  %v68_v31 = vld [vmem:[#allocation2 + $0xe0] sm:$0xff]  ;;  %v70_v32 = vld [vmem:[#allocation2 + $0xf0] sm:$0xff] }
 0x1ec   :  { %2059 = vmatpush1.msra.mxu0 %v548_v33  ;;  %2130 = vmatpush1.msra.mxu1 %v550_v34  ;;  %v1061_v33 = vld [vmem:[#allocation2 + $0x1fe8] sm:$0xff]  ;;  %v1063_v34 = vld [vmem:[#allocation2 + $0x1ff8] sm:$0xff] }
 0x1ed   :  { %2060 = vmatprep.subr.mxu0 %v517_v36  ;;  %2131 = vmatprep.subr.mxu1 %v519_v1  ;;  %v1060_v36 = vld [vmem:[#allocation2 + $0x1fe0] sm:$0xff]  ;;  %v1062_v1 = vld [vmem:[#allocation2 + $0x1ff0] sm:$0xff] }
 0x1ee   :  { %2061 = vmatpush1.msra.mxu0 %v516_v37  ;;  %2132 = vmatpush1.msra.mxu1 %v518_v38  ;;  %v1029_v37 = vld [vmem:[#allocation2 + $0x1ee8] sm:$0xff]  ;;  %v1031_v38 = vld [vmem:[#allocation2 + $0x1ef8] sm:$0xff] }
 0x1ef   :  { %2062 = vmatprep.subr.mxu0 %v485_v23  ;;  %2133 = vmatprep.subr.mxu1 %v487_v39  ;;  %v1028_v23 = vld [vmem:[#allocation2 + $0x1ee0] sm:$0xff]  ;;  %v1030_v39 = vld [vmem:[#allocation2 + $0x1ef0] sm:$0xff] }
 0x1f0   :  { %2063 = vmatpush1.msra.mxu0 %v484_v40  ;;  %2134 = vmatpush1.msra.mxu1 %v486_v41  ;;  %v997_v40 = vld [vmem:[#allocation2 + $0x1de8] sm:$0xff]  ;;  %v999_v41 = vld [vmem:[#allocation2 + $0x1df8] sm:$0xff] }
 0x1f1   :  { %2064 = vmatprep.subr.mxu0 %v453_v42  ;;  %2135 = vmatprep.subr.mxu1 %v455_v43  ;;  %v996_v42 = vld [vmem:[#allocation2 + $0x1de0] sm:$0xff]  ;;  %v998_v43 = vld [vmem:[#allocation2 + $0x1df0] sm:$0xff] }
 0x1f2   :  { %2065 = vmatpush1.msra.mxu0 %v452_v44  ;;  %2136 = vmatpush1.msra.mxu1 %v454_v45  ;;  %v965_v44 = vld [vmem:[#allocation2 + $0x1ce8] sm:$0xff]  ;;  %v967_v45 = vld [vmem:[#allocation2 + $0x1cf8] sm:$0xff] }
 0x1f3   :  { %2066 = vmatprep.subr.mxu0 %v421_v46  ;;  %2137 = vmatprep.subr.mxu1 %v423_v47  ;;  %v964_v46 = vld [vmem:[#allocation2 + $0x1ce0] sm:$0xff]  ;;  %v966_v47 = vld [vmem:[#allocation2 + $0x1cf0] sm:$0xff] }
 0x1f4   :  { %2067 = vmatpush1.msra.mxu0 %v420_v48  ;;  %2138 = vmatpush1.msra.mxu1 %v422_v49  ;;  %v933_v48 = vld [vmem:[#allocation2 + $0x1be8] sm:$0xff]  ;;  %v935_v49 = vld [vmem:[#allocation2 + $0x1bf8] sm:$0xff] }
 0x1f5   :  { %2068 = vmatprep.subr.mxu0 %v389_v50  ;;  %2139 = vmatprep.subr.mxu1 %v391_v51  ;;  %v932_v50 = vld [vmem:[#allocation2 + $0x1be0] sm:$0xff]  ;;  %v934_v51 = vld [vmem:[#allocation2 + $0x1bf0] sm:$0xff] }
 0x1f6   :  { %2069 = vmatpush1.msra.mxu0 %v388_v52  ;;  %2140 = vmatpush1.msra.mxu1 %v390_v53  ;;  %v901_v52 = vld [vmem:[#allocation2 + $0x1ae8] sm:$0xff]  ;;  %v903_v53 = vld [vmem:[#allocation2 + $0x1af8] sm:$0xff] }
 0x1f7   :  { %2070 = vmatprep.subr.mxu0 %v357_v54  ;;  %2141 = vmatprep.subr.mxu1 %v359_v55  ;;  %v900_v54 = vld [vmem:[#allocation2 + $0x1ae0] sm:$0xff]  ;;  %v902_v55 = vld [vmem:[#allocation2 + $0x1af0] sm:$0xff] }
 0x1f8   :  { %2071 = vmatpush1.msra.mxu0 %v356_v56  ;;  %2142 = vmatpush1.msra.mxu1 %v358_v57  ;;  %v869_v56 = vld [vmem:[#allocation2 + $0x19e8] sm:$0xff]  ;;  %v871_v57 = vld [vmem:[#allocation2 + $0x19f8] sm:$0xff] }
 0x1f9   :  { %2072 = vmatprep.subr.mxu0 %v325_v58  ;;  %2143 = vmatprep.subr.mxu1 %v327_v59  ;;  %v868_v58 = vld [vmem:[#allocation2 + $0x19e0] sm:$0xff]  ;;  %v870_v59 = vld [vmem:[#allocation2 + $0x19f0] sm:$0xff] }
 0x1fa   :  { %2073 = vmatpush1.msra.mxu0 %v324_v60  ;;  %2144 = vmatpush1.msra.mxu1 %v326_v61  ;;  %v837_v60 = vld [vmem:[#allocation2 + $0x18e8] sm:$0xff]  ;;  %v839_v61 = vld [vmem:[#allocation2 + $0x18f8] sm:$0xff] }
 0x1fb   :  { %2074 = vmatprep.subr.mxu0 %v293_v62  ;;  %2145 = vmatprep.subr.mxu1 %v295_v0  ;;  %v836_v62 = vld [vmem:[#allocation2 + $0x18e0] sm:$0xff]  ;;  %v838_v0 = vld [vmem:[#allocation2 + $0x18f0] sm:$0xff] }
 0x1fc   :  { %2075 = vmatpush1.msra.mxu0 %v292_v2  ;;  %2146 = vmatpush1.msra.mxu1 %v294_v3  ;;  %v805_v2 = vld [vmem:[#allocation2 + $0x17e8] sm:$0xff]  ;;  %v807_v3 = vld [vmem:[#allocation2 + $0x17f8] sm:$0xff] }
 0x1fd   :  { %2076 = vmatprep.subr.mxu0 %v261_v4  ;;  %2147 = vmatprep.subr.mxu1 %v263_v5  ;;  %v804_v4 = vld [vmem:[#allocation2 + $0x17e0] sm:$0xff]  ;;  %v806_v5 = vld [vmem:[#allocation2 + $0x17f0] sm:$0xff] }
 0x1fe   :  { %2077 = vmatpush1.msra.mxu0 %v260_v7  ;;  %2148 = vmatpush1.msra.mxu1 %v262_v8  ;;  %v773_v7 = vld [vmem:[#allocation2 + $0x16e8] sm:$0xff]  ;;  %v775_v8 = vld [vmem:[#allocation2 + $0x16f8] sm:$0xff] }
 0x1ff   :  { %2078 = vmatprep.subr.mxu0 %v229_v9  ;;  %2149 = vmatprep.subr.mxu1 %v231_v10  ;;  %v772_v9 = vld [vmem:[#allocation2 + $0x16e0] sm:$0xff]  ;;  %v774_v10 = vld [vmem:[#allocation2 + $0x16f0] sm:$0xff] }
 0x200   :  { %2079 = vmatpush1.msra.mxu0 %v228_v12  ;;  %2150 = vmatpush1.msra.mxu1 %v230_v13  ;;  %v741_v12 = vld [vmem:[#allocation2 + $0x15e8] sm:$0xff]  ;;  %v743_v13 = vld [vmem:[#allocation2 + $0x15f8] sm:$0xff] }
 0x201   :  { %2080 = vmatprep.subr.mxu0 %v197_v14  ;;  %2151 = vmatprep.subr.mxu1 %v199_v15  ;;  %v740_v14 = vld [vmem:[#allocation2 + $0x15e0] sm:$0xff]  ;;  %v742_v15 = vld [vmem:[#allocation2 + $0x15f0] sm:$0xff] }
 0x202   :  { %2081 = vmatpush1.msra.mxu0 %v196_v16  ;;  %2152 = vmatpush1.msra.mxu1 %v198_v63  ;;  %v709_v16 = vld [vmem:[#allocation2 + $0x14e8] sm:$0xff]  ;;  %v711_v63 = vld [vmem:[#allocation2 + $0x14f8] sm:$0xff] }
 0x203   :  { %2082 = vmatprep.subr.mxu0 %v165_v17  ;;  %2153 = vmatprep.subr.mxu1 %v167_v18  ;;  %v708_v17 = vld [vmem:[#allocation2 + $0x14e0] sm:$0xff]  ;;  %v710_v18 = vld [vmem:[#allocation2 + $0x14f0] sm:$0xff] }
 0x204   :  { %2083 = vmatpush1.msra.mxu0 %v164_v19  ;;  %2154 = vmatpush1.msra.mxu1 %v166_v20  ;;  %v677_v19 = vld [vmem:[#allocation2 + $0x13e8] sm:$0xff]  ;;  %v679_v20 = vld [vmem:[#allocation2 + $0x13f8] sm:$0xff] }
 0x205   :  { %2084 = vmatprep.subr.mxu0 %v133_v21  ;;  %2155 = vmatprep.subr.mxu1 %v135_v22  ;;  %v676_v21 = vld [vmem:[#allocation2 + $0x13e0] sm:$0xff]  ;;  %v678_v22 = vld [vmem:[#allocation2 + $0x13f0] sm:$0xff] }
 0x206   :  { %2085 = vmatpush1.msra.mxu0 %v132_v24  ;;  %2156 = vmatpush1.msra.mxu1 %v134_v6  ;;  %v645_v24 = vld [vmem:[#allocation2 + $0x12e8] sm:$0xff]  ;;  %v647_v6 = vld [vmem:[#allocation2 + $0x12f8] sm:$0xff] }
 0x207   :  { %2086 = vmatprep.subr.mxu0 %v101_v25  ;;  %2157 = vmatprep.subr.mxu1 %v103_v26  ;;  %v644_v25 = vld [vmem:[#allocation2 + $0x12e0] sm:$0xff]  ;;  %v646_v26 = vld [vmem:[#allocation2 + $0x12f0] sm:$0xff] }
 0x208   :  { %2087 = vmatpush1.msra.mxu0 %v100_v11  ;;  %2158 = vmatpush1.msra.mxu1 %v102_v27  ;;  %v613_v11 = vld [vmem:[#allocation2 + $0x11e8] sm:$0xff]  ;;  %v615_v27 = vld [vmem:[#allocation2 + $0x11f8] sm:$0xff] }
 0x209   :  { %2088 = vmatprep.subr.mxu0 %v69_v28  ;;  %2159 = vmatprep.subr.mxu1 %v71_v29  ;;  %v612_v28 = vld [vmem:[#allocation2 + $0x11e0] sm:$0xff]  ;;  %v614_v29 = vld [vmem:[#allocation2 + $0x11f0] sm:$0xff] }
 0x20a   :  { %2089 = vmatpush1.msra.mxu0 %v68_v31  ;;  %2160 = vmatpush1.msra.mxu1 %v70_v32  ;;  %v581_v31 = vld [vmem:[#allocation2 + $0x10e8] sm:$0xff]  ;;  %v583_v32 = vld [vmem:[#allocation2 + $0x10f8] sm:$0xff] }
 0x20b   :  { %2090 = vmatprep.subr.mxu0 %v1061_v33  ;;  %2161 = vmatprep.subr.mxu1 %v1063_v34 }
 0x20c   :  { %2091 = vmatpush2.msra.mxu0 %v1060_v36  ;;  %2162 = vmatpush2.msra.mxu1 %v1062_v1  ;;  %v580_v36 = vld [vmem:[#allocation2 + $0x10e0] sm:$0xff]  ;;  %v582_v1 = vld [vmem:[#allocation2 + $0x10f0] sm:$0xff] }
 0x20d   :  { %2092 = vmatprep.subr.mxu0 %v1029_v37  ;;  %2163 = vmatprep.subr.mxu1 %v1031_v38 }
 0x20e   :  { %2093 = vmatpush2.msra.mxu0 %v1028_v23  ;;  %2164 = vmatpush2.msra.mxu1 %v1030_v39 }
 0x20f   :  { %2094 = vmatprep.subr.mxu0 %v997_v40  ;;  %2165 = vmatprep.subr.mxu1 %v999_v41 }
 0x210   :  { %2095 = vmatpush2.msra.mxu0 %v996_v42  ;;  %2166 = vmatpush2.msra.mxu1 %v998_v43 }
 0x211   :  { %2096 = vmatprep.subr.mxu0 %v965_v44  ;;  %2167 = vmatprep.subr.mxu1 %v967_v45 }
 0x212   :  { %2097 = vmatpush2.msra.mxu0 %v964_v46  ;;  %2168 = vmatpush2.msra.mxu1 %v966_v47 }
 0x213   :  { %2098 = vmatprep.subr.mxu0 %v933_v48  ;;  %2169 = vmatprep.subr.mxu1 %v935_v49 }
 0x214   :  { %2099 = vmatpush2.msra.mxu0 %v932_v50  ;;  %2170 = vmatpush2.msra.mxu1 %v934_v51 }
 0x215   :  { %2100 = vmatprep.subr.mxu0 %v901_v52  ;;  %2171 = vmatprep.subr.mxu1 %v903_v53 }
 0x216   :  { %2101 = vmatpush2.msra.mxu0 %v900_v54  ;;  %2172 = vmatpush2.msra.mxu1 %v902_v55 }
 0x217   :  { %2102 = vmatprep.subr.mxu0 %v869_v56  ;;  %2173 = vmatprep.subr.mxu1 %v871_v57 }
 0x218   :  { %2103 = vmatpush2.msra.mxu0 %v868_v58  ;;  %2174 = vmatpush2.msra.mxu1 %v870_v59 }
 0x219   :  { %2104 = vmatprep.subr.mxu0 %v837_v60  ;;  %2175 = vmatprep.subr.mxu1 %v839_v61 }
 0x21a   :  { %2105 = vmatpush2.msra.mxu0 %v836_v62  ;;  %2176 = vmatpush2.msra.mxu1 %v838_v0 }
 0x21b   :  { %2106 = vmatprep.subr.mxu0 %v805_v2  ;;  %2177 = vmatprep.subr.mxu1 %v807_v3 }
 0x21c   :  { %2107 = vmatpush2.msra.mxu0 %v804_v4  ;;  %2178 = vmatpush2.msra.mxu1 %v806_v5 }
 0x21d   :  { %2108 = vmatprep.subr.mxu0 %v773_v7  ;;  %2179 = vmatprep.subr.mxu1 %v775_v8 }
 0x21e   :  { %2109 = vmatpush2.msra.mxu0 %v772_v9  ;;  %2180 = vmatpush2.msra.mxu1 %v774_v10 }
 0x21f   :  { %2110 = vmatprep.subr.mxu0 %v741_v12  ;;  %2181 = vmatprep.subr.mxu1 %v743_v13 }
 0x220   :  { %2111 = vmatpush2.msra.mxu0 %v740_v14  ;;  %2182 = vmatpush2.msra.mxu1 %v742_v15 }
 0x221   :  { %2112 = vmatprep.subr.mxu0 %v709_v16  ;;  %2183 = vmatprep.subr.mxu1 %v711_v63 }
 0x222   :  { %2113 = vmatpush2.msra.mxu0 %v708_v17  ;;  %2184 = vmatpush2.msra.mxu1 %v710_v18 }
 0x223   :  { %2114 = vmatprep.subr.mxu0 %v677_v19  ;;  %2185 = vmatprep.subr.mxu1 %v679_v20 }
 0x224   :  { %2115 = vmatpush2.msra.mxu0 %v676_v21  ;;  %2186 = vmatpush2.msra.mxu1 %v678_v22 }
 0x225   :  { %2116 = vmatprep.subr.mxu0 %v645_v24  ;;  %2187 = vmatprep.subr.mxu1 %v647_v6 }
 0x226   :  { %2117 = vmatpush2.msra.mxu0 %v644_v25  ;;  %2188 = vmatpush2.msra.mxu1 %v646_v26  ;;  %v1698_v33 = vpop.f32.mrf.mxu0  ;;  %v1769_v34 = vpop.f32.mrf.mxu1 }
 0x227   :  { %2118 = vmatprep.subr.mxu0 %v613_v11  ;;  %2189 = vmatprep.subr.mxu1 %v615_v27  ;;  %2216 = vst [vmem:[#allocation7 + $0x80] sm:$0xff] %v1698_v33  ;;  %2218 = vst [vmem:[#allocation7 + $0x90] sm:$0xff] %v1769_v34 }
 0x228   :  { %2119 = vmatpush2.msra.mxu0 %v612_v28  ;;  %2190 = vmatpush2.msra.mxu1 %v614_v29  ;;  %v1700_v37 = vpop.f32.mrf.mxu0  ;;  %v1771_v38 = vpop.f32.mrf.mxu1 }
 0x229   :  { %2120 = vmatprep.subr.mxu0 %v581_v31  ;;  %2191 = vmatprep.subr.mxu1 %v583_v32  ;;  %2217 = vst [vmem:[#allocation7 + $0x88] sm:$0xff] %v1700_v37  ;;  %2219 = vst [vmem:[#allocation7 + $0x98] sm:$0xff] %v1771_v38 }
 0x22a   :  { %2121 = vmatpush2.msra.mxu0 %v580_v36  ;;  %2122 = vmatprep.mubr.f32.mxu0 %v2387_v30 }
 0x22b   :  { %2192 = vmatpush2.msra.mxu1 %v582_v1  ;;  %2193 = vmatprep.mubr.f32.mxu1 %v2387_v30 }
 0x22c   :  { %2123 = vmatmul.mubr.f32.vlgmr.msra.gmra.mxu0 %v2391_v35  ;;  %2194 = vmatmul.mubr.f32.vlgmr.msra.gmra.mxu1 %v2391_v35 }
 0x268   :  { %v1840_v23 = vpop.f32.mrf.mxu0  ;;  %v1911_v39 = vpop.f32.mrf.mxu1 }
 0x269   :  { %2220 = vst [vmem:[#allocation7 + $0xa0] sm:$0xff] %v1840_v23  ;;  %2222 = vst [vmem:[#allocation7 + $0xb0] sm:$0xff] %v1911_v39 }
 0x26a   :  { %v1842_v40 = vpop.f32.mrf.mxu0  ;;  %v1913_v41 = vpop.f32.mrf.mxu1 }
 0x26b   :  { %2221 = vst [vmem:[#allocation7 + $0xa8] sm:$0xff] %v1842_v40  ;;  %2223 = vst [vmem:[#allocation7 + $0xb8] sm:$0xff] %v1913_v41 }
 0x2aa   :  { %v1982_v42 = vpop.f32.mrf.mxu0  ;;  %v2053_v43 = vpop.f32.mrf.mxu1 }
 0x2ab   :  { %2224 = vst [vmem:[#allocation7 + $0xc0] sm:$0xff] %v1982_v42  ;;  %2226 = vst [vmem:[#allocation7 + $0xd0] sm:$0xff] %v2053_v43 }
 0x2ac   :  { %v1984_v44 = vpop.f32.mrf.mxu0  ;;  %v2055_v45 = vpop.f32.mrf.mxu1 }
 0x2ad   :  { %2225 = vst [vmem:[#allocation7 + $0xc8] sm:$0xff] %v1984_v44  ;;  %2227 = vst [vmem:[#allocation7 + $0xd8] sm:$0xff] %v2055_v45 }
 0x2ec   :  { %v2124_v30 = vpop.f32.mrf.mxu0  ;;  %v2195_v35 = vpop.f32.mrf.mxu1 }
 0x2ed   :  { %2228 = vst [vmem:[#allocation7 + $0xe0] sm:$0xff] %v2124_v30  ;;  %2230 = vst [vmem:[#allocation7 + $0xf0] sm:$0xff] %v2195_v35 }
 0x2ee   :  { %v2126_v46 = vpop.f32.mrf.mxu0  ;;  %v2197_v47 = vpop.f32.mrf.mxu1 }
 0x2ef   :  { %2229 = vst [vmem:[#allocation7 + $0xe8] sm:$0xff] %v2126_v46  ;;  %2231 = vst [vmem:[#allocation7 + $0xf8] sm:$0xff] %v2197_v47 }
 0x2f0   :  { %2310 = shalt.err (!%p2307_p0)
}
 0x2f1   :  { %2241 = dma.vmem_to_hbm [thread:$0]  %s2239_s1, 4096, %s2404_s2, [#allocation4]  }
 0x2f2   :  { %2323 = dma.done.wait [#allocation4], 4096  }
 0x2f3   :  { %2324 = vsyncadd [#allocation4], 4294963200 }
 0x2f4   :  { %2245 = vsyncpa [#allocation3], 1 }
 0x2f5   :  { %2246 = vsyncpa [#allocation6], 1 }
 0x2f6   :  { %2247 = vsyncpa [#allocation4], 1 }

</bundles_post_ra>
